<compile_context>
chip_gen: v7x
topology: tpu7x:2x2x1
jax: 0.10.0
libtpu: 0.0.40
codegen_flags: <defaults>
</compile_context>

<pallas_src>
import jax
import jax.numpy as jnp
from jax.experimental import pallas as pl
from jax.experimental.pallas import tpu as pltpu


# ----------------------------------------------------------------------------
# Fused Pallas kernel
# ----------------------------------------------------------------------------
def make_fused_kernel(T, B, hidden_sizes, offsets, sub):
    """Fused forward kernel for fixed (T, B, per-layer hidden sizes)."""
    n_lstm = len(hidden_sizes)

    def kernel(x_ref, slab_ref, o_ref):
        # ---- load every parameter once from the packed slab ----------------
        def param(name):
            off, (r, c) = offsets[name]          # static Python ints
            return slab_ref[off:off + r, :c]

        wihs = [param(f"wih{l}") for l in range(n_lstm)]
        whhs = [param(f"whh{l}") for l in range(n_lstm)]
        bs = [param(f"b{l}") for l in range(n_lstm)]
        w1, b1 = param("fc1_w"), param("fc1_b")
        w2, b2 = param("fc2_w"), param("fc2_b")

        # ---- gate masks: built once per distinct gate width (#11) ----------
        g_masks = {}
        for H in sorted(set(hidden_sizes)):
            col = jax.lax.broadcasted_iota(jnp.int32, (B, 4 * H), 1)
            g_masks[H] = jnp.logical_and(col >= 2 * H, col < 3 * H)

        # ---- layer-0 input projection: one batched matmul over all T (#1) --
        xp0_all = jnp.dot(x_ref[...], wihs[0],
                          preferred_element_type=jnp.float32) + bs[0]

        xp = {}
        for t in range(T):
            # 8-aligned sublane start (each timestep occupies `sub` rows).
            xp[(0, t)] = xp0_all[t * sub: t * sub + B, :]

        h = [jnp.zeros((B, hidden_sizes[l]), jnp.float32) for l in range(n_lstm)]
        c = [jnp.zeros((B, hidden_sizes[l]), jnp.float32) for l in range(n_lstm)]

        # ---- wavefront/diagonal static unroll (#4) --------------------------
        # At diagonal d, emit step t = d - l of every layer l in range.
        for d in range(T + n_lstm - 1):
            for l in range(n_lstm):
                t = d - l
                if not (0 <= t < T):
                    continue
                H = hidden_sizes[l]

                # Serial path per step: one MXU op + activations.
                gates = xp.pop((l, t)) + jnp.dot(
                    h[l], whhs[l], preferred_element_type=jnp.float32)

                # Single EUP sigmoid pass; g-gate pre-activation was
                # pre-scaled by 2 in prepare_params so tanh(z) = 2*sig(2z)-1.
                s = jax.nn.sigmoid(gates)
                act = jnp.where(g_masks[H], 2.0 * s - 1.0, s)

                i_g = act[:, 0 * H:1 * H]
                f_g = act[:, 1 * H:2 * H]
                g_g = act[:, 2 * H:3 * H]
                o_g = act[:, 3 * H:4 * H]

                c[l] = f_g * c[l] + i_g * g_g
                h[l] = o_g * jnp.tanh(c[l])

                if l + 1 < n_lstm:
                    # Projection into the next layer's gates: emitted the
                    # moment h_t exists, one diagonal ahead of its consumer.
                    xp[(l + 1, t)] = jnp.dot(
                        h[l], wihs[l + 1],
                        preferred_element_type=jnp.float32) + bs[l + 1]

        # ---- head: fc1 -> ReLU -> (dropout = identity) -> fc2 --------------
        hid = jnp.dot(h[-1], w1, preferred_element_type=jnp.float32) + b1
        hid = jnp.maximum(hid, 0.0)
        out = jnp.dot(hid, w2, preferred_element_type=jnp.float32) + b2
        o_ref[...] = out.astype(o_ref.dtype)

    return kernel


# ----------------------------------------------------------------------------
# Parameter init (PyTorch layout, for the reference)
# ----------------------------------------------------------------------------
def init_params(key, input_size, hidden_size, num_layers, pred_length):
    """Deterministic init mimicking PyTorch uniform(-1/sqrt(H), 1/sqrt(H))."""
    params = {"lstm1": [], "lstm2": []}
    h1, h2 = hidden_size, hidden_size // 2

    def uni(key, shape, bound):
        return jax.random.uniform(key, shape, jnp.float32, -bound, bound)

    keys = iter(jax.random.split(key, 8 * num_layers * 2 + 4))

    for layer in range(num_layers):
        in_sz = input_size if layer == 0 else h1
        bound = 1.0 / jnp.sqrt(h1)
        params["lstm1"].append(dict(
            w_ih=uni(next(keys), (4 * h1, in_sz), bound),
            w_hh=uni(next(keys), (4 * h1, h1), bound),
            b_ih=uni(next(keys), (4 * h1,), bound),
            b_hh=uni(next(keys), (4 * h1,), bound),
        ))
    for layer in range(num_layers):
        in_sz = h1 if layer == 0 else h2
        bound = 1.0 / jnp.sqrt(h2)
        params["lstm2"].append(dict(
            w_ih=uni(next(keys), (4 * h2, in_sz), bound),
            w_hh=uni(next(keys), (4 * h2, h2), bound),
            b_ih=uni(next(keys), (4 * h2,), bound),
            b_hh=uni(next(keys), (4 * h2,), bound),
        ))

    h4 = hidden_size // 4
    bound1 = 1.0 / jnp.sqrt(h2)
    bound2 = 1.0 / jnp.sqrt(h4)
    params["fc1_w"] = uni(next(keys), (h4, h2), bound1)
    params["fc1_b"] = uni(next(keys), (h4,), bound1)
    params["fc2_w"] = uni(next(keys), (pred_length, h4), bound2)
    params["fc2_b"] = uni(next(keys), (pred_length,), bound2)
    return params


# ----------------------------------------------------------------------------
# One-time parameter preparation: transpose, fold biases, fold the x2 g-gate
# scale (single-sigmoid trick), and pack everything into one f32 slab.
# ----------------------------------------------------------------------------
def prepare_params(params, input_size, hidden_size, num_layers, pred_length):
    LANES = 128
    SUB = 8

    lstm_prepped = []
    for p in params["lstm1"] + params["lstm2"]:
        four_h = p["w_ih"].shape[0]
        H = four_h // 4
        wih_t = jnp.transpose(p["w_ih"])                     # (I, 4H)
        whh_t = jnp.transpose(p["w_hh"])                     # (H, 4H)
        b = (p["b_ih"] + p["b_hh"]).reshape(1, four_h)       # (1, 4H)
        # Fold tanh(z) = 2*sigmoid(2z) - 1: pre-scale g-gate columns by 2 (#2).
        scale = jnp.ones((four_h,), jnp.float32).at[2 * H:3 * H].set(2.0)
        lstm_prepped.append((wih_t * scale, whh_t * scale, b * scale))

    entries = []
    for l, (wih_t, whh_t, b) in enumerate(lstm_prepped):
        entries += [(f"wih{l}", wih_t), (f"whh{l}", whh_t), (f"b{l}", b)]
    entries += [
        ("fc1_w", jnp.transpose(params["fc1_w"])),           # (H2, H4)
        ("fc1_b", params["fc1_b"].reshape(1, -1)),
        ("fc2_w", jnp.transpose(params["fc2_w"])),           # (H4, P)
        ("fc2_b", params["fc2_b"].reshape(1, -1)),
    ]

    # Pack into a single (rows, 128) slab: 8-row aligned, zero lane-padded (#5).
    offsets = {}
    blocks = []
    row = 0
    for name, arr in entries:
        r, c = arr.shape
        r_pad = -(-r // SUB) * SUB
        block = jnp.zeros((r_pad, LANES), jnp.float32).at[:r, :c].set(
            arr.astype(jnp.float32))
        blocks.append(block)
        offsets[name] = (row, (r, c))
        row += r_pad
    slab = jnp.concatenate(blocks, axis=0)

    h1, h2 = hidden_size, hidden_size // 2
    hidden_sizes = [h1] * num_layers + [h2] * num_layers
    return dict(
        slab=slab, offsets=offsets, hidden_sizes=tuple(hidden_sizes),
        hidden_size=hidden_size, num_layers=num_layers,
        pred_length=pred_length, input_size=input_size,
    )


# ----------------------------------------------------------------------------
# Forward wrapper (single pallas_call, 2 inputs: activations + weight slab)
# ----------------------------------------------------------------------------
def lstm_soh_predictor(prepared, x_btf):
    """Forward pass. x_btf: (B, T, input_size) -> (B, pred_length)."""
    B, T, F = x_btf.shape
    P = prepared["pred_length"]
    hidden_sizes = list(prepared["hidden_sizes"])

    # Lay the sequence out time-major and pad each step's batch rows up to the
    # f32 sublane count so per-step slices of the batched layer-0 projection
    # start on 8-aligned sublanes (#1).
    sub = -(-B // 8) * 8
    x_tbf = jnp.transpose(x_btf, (1, 0, 2)).astype(jnp.float32)   # (T, B, F)
    x_pad = jnp.zeros((T, sub, F), jnp.float32).at[:, :B, :].set(x_tbf)
    x_flat = x_pad.reshape(T * sub, F)

    kernel = make_fused_kernel(T, B, hidden_sizes, prepared["offsets"], sub)
    vmem = pl.BlockSpec(memory_space=pltpu.MemorySpace.VMEM)

    return pl.pallas_call(
        kernel,
        out_shape=jax.ShapeDtypeStruct((B, P), jnp.float32),
        in_specs=[vmem, vmem],
        out_specs=vmem,
    )(x_flat, prepared["slab"])


# ----------------------------------------------------------------------------
# Pure-JAX reference (for correctness check)
# ----------------------------------------------------------------------------
def _ref_lstm_layer(x_tbi, w_ih, w_hh, b_ih, b_hh):
    T, B, _ = x_tbi.shape
    H = w_hh.shape[1]

    def step(carry, x_t):
        h, c = carry
        gates = x_t @ w_ih.T + h @ w_hh.T + b_ih + b_hh
        i = jax.nn.sigmoid(gates[:, 0 * H:1 * H])
        f = jax.nn.sigmoid(gates[:, 1 * H:2 * H])
        g = jnp.tanh(gates[:, 2 * H:3 * H])
        o = jax.nn.sigmoid(gates[:, 3 * H:4 * H])
        c = f * c + i * g
        h = o * jnp.tanh(c)
        return (h, c), h

    init = (jnp.zeros((B, H), jnp.float32), jnp.zeros((B, H), jnp.float32))
    _, ys = jax.lax.scan(step, init, x_tbi)
    return ys


def _ref_forward(params, x_btf):
    h = jnp.transpose(x_btf, (1, 0, 2)).astype(jnp.float32)
    for p in params["lstm1"]:
        h = _ref_lstm_layer(h, p["w_ih"], p["w_hh"], p["b_ih"], p["b_hh"])
    for p in params["lstm2"]:
        h = _ref_lstm_layer(h, p["w_ih"], p["w_hh"], p["b_ih"], p["b_hh"])
    out = jnp.maximum(h[-1] @ params["fc1_w"].T + params["fc1_b"], 0.0)
    return out @ params["fc2_w"].T + params["fc2_b"]


# ----------------------------------------------------------------------------
if __name__ == "__main__":
    INPUT_SIZE = 4
    HIDDEN_SIZE = 32
    NUM_LAYERS = 2
    PRED_LENGTH = 4
    BATCH = 2
    SEQ = 8

    key = jax.random.PRNGKey(0)
    key_p, key_x = jax.random.split(key)
    params = init_params(key_p, INPUT_SIZE, HIDDEN_SIZE, NUM_LAYERS, PRED_LENGTH)
    prepared = prepare_params(params, INPUT_SIZE, HIDDEN_SIZE, NUM_LAYERS,
                              PRED_LENGTH)
    x = jax.random.normal(key_x, (BATCH, SEQ, INPUT_SIZE), jnp.float32)

    out = lstm_soh_predictor(prepared, x)
    out = jax.block_until_ready(out)

    ref = jax.block_until_ready(_ref_forward(params, x))
    assert out.shape == (BATCH, PRED_LENGTH)
    assert jnp.max(jnp.abs(out - ref)) < 1e-4, "mismatch vs pure-JAX reference"

    print("KERNEL_OK")
</pallas_src>

<mosaic_0001>
module attributes {stable_mosaic.version = 11 : i64} {
  func.func @kernel(%arg0: memref<64x4xf32, #tpu.memory_space<vmem>>, %arg1: memref<256x128xf32, #tpu.memory_space<vmem>>, %arg2: memref<2x4xf32, #tpu.memory_space<vmem>>) attributes {dimension_semantics = [], scalar_prefetch = 0 : i64, scratch_operands = 0 : i64, tpu.core_type = #tpu.core_type<tc>} {
    %c0 = arith.constant 0 : index
    %c0_0 = arith.constant 0 : index
    %0 = vector.load %arg1[%c0, %c0_0] : memref<256x128xf32, #tpu.memory_space<vmem>>, vector<4x128xf32>
    %c48 = arith.constant 48 : index
    %c0_1 = arith.constant 0 : index
    %1 = vector.load %arg1[%c48, %c0_1] : memref<256x128xf32, #tpu.memory_space<vmem>>, vector<32x128xf32>
    %c120 = arith.constant 120 : index
    %c0_2 = arith.constant 0 : index
    %2 = vector.load %arg1[%c120, %c0_2] : memref<256x128xf32, #tpu.memory_space<vmem>>, vector<32x64xf32>
    %c176 = arith.constant 176 : index
    %c0_3 = arith.constant 0 : index
    %3 = vector.load %arg1[%c176, %c0_3] : memref<256x128xf32, #tpu.memory_space<vmem>>, vector<16x64xf32>
    %c8 = arith.constant 8 : index
    %c0_4 = arith.constant 0 : index
    %4 = vector.load %arg1[%c8, %c0_4] : memref<256x128xf32, #tpu.memory_space<vmem>>, vector<32x128xf32>
    %c80 = arith.constant 80 : index
    %c0_5 = arith.constant 0 : index
    %5 = vector.load %arg1[%c80, %c0_5] : memref<256x128xf32, #tpu.memory_space<vmem>>, vector<32x128xf32>
    %c152 = arith.constant 152 : index
    %c0_6 = arith.constant 0 : index
    %6 = vector.load %arg1[%c152, %c0_6] : memref<256x128xf32, #tpu.memory_space<vmem>>, vector<16x64xf32>
    %c192 = arith.constant 192 : index
    %c0_7 = arith.constant 0 : index
    %7 = vector.load %arg1[%c192, %c0_7] : memref<256x128xf32, #tpu.memory_space<vmem>>, vector<16x64xf32>
    %c40 = arith.constant 40 : index
    %c0_8 = arith.constant 0 : index
    %8 = vector.load %arg1[%c40, %c0_8] : memref<256x128xf32, #tpu.memory_space<vmem>>, vector<1x128xf32>
    %c112 = arith.constant 112 : index
    %c0_9 = arith.constant 0 : index
    %9 = vector.load %arg1[%c112, %c0_9] : memref<256x128xf32, #tpu.memory_space<vmem>>, vector<1x128xf32>
    %c168 = arith.constant 168 : index
    %c0_10 = arith.constant 0 : index
    %10 = vector.load %arg1[%c168, %c0_10] : memref<256x128xf32, #tpu.memory_space<vmem>>, vector<1x64xf32>
    %c208 = arith.constant 208 : index
    %c0_11 = arith.constant 0 : index
    %11 = vector.load %arg1[%c208, %c0_11] : memref<256x128xf32, #tpu.memory_space<vmem>>, vector<1x64xf32>
    %c216 = arith.constant 216 : index
    %c0_12 = arith.constant 0 : index
    %12 = vector.load %arg1[%c216, %c0_12] : memref<256x128xf32, #tpu.memory_space<vmem>>, vector<16x8xf32>
    %c232 = arith.constant 232 : index
    %c0_13 = arith.constant 0 : index
    %13 = vector.load %arg1[%c232, %c0_13] : memref<256x128xf32, #tpu.memory_space<vmem>>, vector<1x8xf32>
    %c240 = arith.constant 240 : index
    %c0_14 = arith.constant 0 : index
    %14 = vector.load %arg1[%c240, %c0_14] : memref<256x128xf32, #tpu.memory_space<vmem>>, vector<8x4xf32>
    %c248 = arith.constant 248 : index
    %c0_15 = arith.constant 0 : index
    %15 = vector.load %arg1[%c248, %c0_15] : memref<256x128xf32, #tpu.memory_space<vmem>>, vector<1x4xf32>
    %16 = tpu.iota {dimensions = array<i32: 1>} : vector<2x64xi32>
    %c32_i32 = arith.constant 32 : i32
    %17 = vector.broadcast %c32_i32 : i32 to vector<2x64xi32>
    %18 = arith.cmpi sge, %16, %17 : vector<2x64xi32>
    %c48_i32 = arith.constant 48 : i32
    %19 = vector.broadcast %c48_i32 : i32 to vector<2x64xi32>
    %20 = arith.cmpi slt, %16, %19 : vector<2x64xi32>
    %21 = arith.andi %18, %20 : vector<2x64xi1>
    %22 = tpu.iota {dimensions = array<i32: 1>} : vector<2x128xi32>
    %c64_i32 = arith.constant 64 : i32
    %23 = vector.broadcast %c64_i32 : i32 to vector<2x128xi32>
    %24 = arith.cmpi sge, %22, %23 : vector<2x128xi32>
    %c96_i32 = arith.constant 96 : i32
    %25 = vector.broadcast %c96_i32 : i32 to vector<2x128xi32>
    %26 = arith.cmpi slt, %22, %25 : vector<2x128xi32>
    %27 = arith.andi %24, %26 : vector<2x128xi1>
    %c0_16 = arith.constant 0 : index
    %c0_17 = arith.constant 0 : index
    %28 = vector.load %arg0[%c0_16, %c0_17] : memref<64x4xf32, #tpu.memory_space<vmem>>, vector<64x4xf32>
    %cst = arith.constant dense<0.000000e+00> : vector<64x128xf32>
    %29 = tpu.matmul %28, %0, %cst {dimension_numbers = #tpu.dot_dimension_numbers<[1], [0], [0], [1], [0, 0, 1, 1], [], []>} : vector<64x4xf32>, vector<4x128xf32>, vector<64x128xf32> -> vector<64x128xf32>
    %30 = vector.broadcast %8 : vector<1x128xf32> to vector<64x128xf32>
    %31 = arith.addf %29, %30 : vector<64x128xf32>
    %32 = vector.extract_strided_slice %31 {offsets = [0, 0], sizes = [2, 128], strides = [1, 1]} : vector<64x128xf32> to vector<2x128xf32>
    %33 = vector.extract_strided_slice %31 {offsets = [8, 0], sizes = [2, 128], strides = [1, 1]} : vector<64x128xf32> to vector<2x128xf32>
    %34 = vector.extract_strided_slice %31 {offsets = [16, 0], sizes = [2, 128], strides = [1, 1]} : vector<64x128xf32> to vector<2x128xf32>
    %35 = vector.extract_strided_slice %31 {offsets = [24, 0], sizes = [2, 128], strides = [1, 1]} : vector<64x128xf32> to vector<2x128xf32>
    %36 = vector.extract_strided_slice %31 {offsets = [32, 0], sizes = [2, 128], strides = [1, 1]} : vector<64x128xf32> to vector<2x128xf32>
    %37 = vector.extract_strided_slice %31 {offsets = [40, 0], sizes = [2, 128], strides = [1, 1]} : vector<64x128xf32> to vector<2x128xf32>
    %38 = vector.extract_strided_slice %31 {offsets = [48, 0], sizes = [2, 128], strides = [1, 1]} : vector<64x128xf32> to vector<2x128xf32>
    %39 = vector.extract_strided_slice %31 {offsets = [56, 0], sizes = [2, 128], strides = [1, 1]} : vector<64x128xf32> to vector<2x128xf32>
    %cst_18 = arith.constant 0.000000e+00 : f32
    %40 = vector.broadcast %cst_18 : f32 to vector<2x32xf32>
    %cst_19 = arith.constant 0.000000e+00 : f32
    %41 = vector.broadcast %cst_19 : f32 to vector<2x32xf32>
    %cst_20 = arith.constant 0.000000e+00 : f32
    %42 = vector.broadcast %cst_20 : f32 to vector<2x16xf32>
    %cst_21 = arith.constant 0.000000e+00 : f32
    %43 = vector.broadcast %cst_21 : f32 to vector<2x16xf32>
    %cst_22 = arith.constant 0.000000e+00 : f32
    %44 = vector.broadcast %cst_22 : f32 to vector<2x32xf32>
    %cst_23 = arith.constant 0.000000e+00 : f32
    %45 = vector.broadcast %cst_23 : f32 to vector<2x32xf32>
    %cst_24 = arith.constant 0.000000e+00 : f32
    %46 = vector.broadcast %cst_24 : f32 to vector<2x16xf32>
    %cst_25 = arith.constant 0.000000e+00 : f32
    %47 = vector.broadcast %cst_25 : f32 to vector<2x16xf32>
    %cst_26 = arith.constant dense<0.000000e+00> : vector<2x128xf32>
    %48 = tpu.matmul %40, %4, %cst_26 {dimension_numbers = #tpu.dot_dimension_numbers<[1], [0], [0], [1], [0, 0, 1, 1], [], []>} : vector<2x32xf32>, vector<32x128xf32>, vector<2x128xf32> -> vector<2x128xf32>
    %49 = arith.addf %32, %48 : vector<2x128xf32>
    %50 = arith.negf %49 : vector<2x128xf32>
    %51 = math.exp %50 : vector<2x128xf32>
    %cst_27 = arith.constant 1.000000e+00 : f32
    %52 = vector.broadcast %cst_27 : f32 to vector<2x128xf32>
    %53 = arith.addf %52, %51 : vector<2x128xf32>
    %54 = arith.divf %52, %53 : vector<2x128xf32>
    %cst_28 = arith.constant 2.000000e+00 : f32
    %55 = vector.broadcast %cst_28 : f32 to vector<2x128xf32>
    %56 = arith.mulf %55, %54 : vector<2x128xf32>
    %cst_29 = arith.constant 1.000000e+00 : f32
    %57 = vector.broadcast %cst_29 : f32 to vector<2x128xf32>
    %58 = arith.subf %56, %57 : vector<2x128xf32>
    %59 = arith.select %27, %58, %54 : vector<2x128xi1>, vector<2x128xf32>
    %60 = vector.extract_strided_slice %59 {offsets = [0, 0], sizes = [2, 32], strides = [1, 1]} : vector<2x128xf32> to vector<2x32xf32>
    %61 = vector.extract_strided_slice %59 {offsets = [0, 32], sizes = [2, 32], strides = [1, 1]} : vector<2x128xf32> to vector<2x32xf32>
    %62 = vector.extract_strided_slice %59 {offsets = [0, 64], sizes = [2, 32], strides = [1, 1]} : vector<2x128xf32> to vector<2x32xf32>
    %63 = vector.extract_strided_slice %59 {offsets = [0, 96], sizes = [2, 32], strides = [1, 1]} : vector<2x128xf32> to vector<2x32xf32>
    %64 = arith.mulf %61, %44 : vector<2x32xf32>
    %65 = arith.mulf %60, %62 : vector<2x32xf32>
    %66 = arith.addf %64, %65 : vector<2x32xf32>
    %67 = math.tanh %66 : vector<2x32xf32>
    %68 = arith.mulf %63, %67 : vector<2x32xf32>
    %cst_30 = arith.constant dense<0.000000e+00> : vector<2x128xf32>
    %69 = tpu.matmul %68, %1, %cst_30 {dimension_numbers = #tpu.dot_dimension_numbers<[1], [0], [0], [1], [0, 0, 1, 1], [], []>} : vector<2x32xf32>, vector<32x128xf32>, vector<2x128xf32> -> vector<2x128xf32>
    %70 = vector.broadcast %9 : vector<1x128xf32> to vector<2x128xf32>
    %71 = arith.addf %69, %70 : vector<2x128xf32>
    %cst_31 = arith.constant dense<0.000000e+00> : vector<2x128xf32>
    %72 = tpu.matmul %68, %4, %cst_31 {dimension_numbers = #tpu.dot_dimension_numbers<[1], [0], [0], [1], [0, 0, 1, 1], [], []>} : vector<2x32xf32>, vector<32x128xf32>, vector<2x128xf32> -> vector<2x128xf32>
    %73 = arith.addf %33, %72 : vector<2x128xf32>
    %74 = arith.negf %73 : vector<2x128xf32>
    %75 = math.exp %74 : vector<2x128xf32>
    %cst_32 = arith.constant 1.000000e+00 : f32
    %76 = vector.broadcast %cst_32 : f32 to vector<2x128xf32>
    %77 = arith.addf %76, %75 : vector<2x128xf32>
    %78 = arith.divf %76, %77 : vector<2x128xf32>
    %cst_33 = arith.constant 2.000000e+00 : f32
    %79 = vector.broadcast %cst_33 : f32 to vector<2x128xf32>
    %80 = arith.mulf %79, %78 : vector<2x128xf32>
    %cst_34 = arith.constant 1.000000e+00 : f32
    %81 = vector.broadcast %cst_34 : f32 to vector<2x128xf32>
    %82 = arith.subf %80, %81 : vector<2x128xf32>
    %83 = arith.select %27, %82, %78 : vector<2x128xi1>, vector<2x128xf32>
    %84 = vector.extract_strided_slice %83 {offsets = [0, 0], sizes = [2, 32], strides = [1, 1]} : vector<2x128xf32> to vector<2x32xf32>
    %85 = vector.extract_strided_slice %83 {offsets = [0, 32], sizes = [2, 32], strides = [1, 1]} : vector<2x128xf32> to vector<2x32xf32>
    %86 = vector.extract_strided_slice %83 {offsets = [0, 64], sizes = [2, 32], strides = [1, 1]} : vector<2x128xf32> to vector<2x32xf32>
    %87 = vector.extract_strided_slice %83 {offsets = [0, 96], sizes = [2, 32], strides = [1, 1]} : vector<2x128xf32> to vector<2x32xf32>
    %88 = arith.mulf %85, %66 : vector<2x32xf32>
    %89 = arith.mulf %84, %86 : vector<2x32xf32>
    %90 = arith.addf %88, %89 : vector<2x32xf32>
    %91 = math.tanh %90 : vector<2x32xf32>
    %92 = arith.mulf %87, %91 : vector<2x32xf32>
    %cst_35 = arith.constant dense<0.000000e+00> : vector<2x128xf32>
    %93 = tpu.matmul %92, %1, %cst_35 {dimension_numbers = #tpu.dot_dimension_numbers<[1], [0], [0], [1], [0, 0, 1, 1], [], []>} : vector<2x32xf32>, vector<32x128xf32>, vector<2x128xf32> -> vector<2x128xf32>
    %94 = vector.broadcast %9 : vector<1x128xf32> to vector<2x128xf32>
    %95 = arith.addf %93, %94 : vector<2x128xf32>
    %cst_36 = arith.constant dense<0.000000e+00> : vector<2x128xf32>
    %96 = tpu.matmul %41, %5, %cst_36 {dimension_numbers = #tpu.dot_dimension_numbers<[1], [0], [0], [1], [0, 0, 1, 1], [], []>} : vector<2x32xf32>, vector<32x128xf32>, vector<2x128xf32> -> vector<2x128xf32>
    %97 = arith.addf %71, %96 : vector<2x128xf32>
    %98 = arith.negf %97 : vector<2x128xf32>
    %99 = math.exp %98 : vector<2x128xf32>
    %cst_37 = arith.constant 1.000000e+00 : f32
    %100 = vector.broadcast %cst_37 : f32 to vector<2x128xf32>
    %101 = arith.addf %100, %99 : vector<2x128xf32>
    %102 = arith.divf %100, %101 : vector<2x128xf32>
    %cst_38 = arith.constant 2.000000e+00 : f32
    %103 = vector.broadcast %cst_38 : f32 to vector<2x128xf32>
    %104 = arith.mulf %103, %102 : vector<2x128xf32>
    %cst_39 = arith.constant 1.000000e+00 : f32
    %105 = vector.broadcast %cst_39 : f32 to vector<2x128xf32>
    %106 = arith.subf %104, %105 : vector<2x128xf32>
    %107 = arith.select %27, %106, %102 : vector<2x128xi1>, vector<2x128xf32>
    %108 = vector.extract_strided_slice %107 {offsets = [0, 0], sizes = [2, 32], strides = [1, 1]} : vector<2x128xf32> to vector<2x32xf32>
    %109 = vector.extract_strided_slice %107 {offsets = [0, 32], sizes = [2, 32], strides = [1, 1]} : vector<2x128xf32> to vector<2x32xf32>
    %110 = vector.extract_strided_slice %107 {offsets = [0, 64], sizes = [2, 32], strides = [1, 1]} : vector<2x128xf32> to vector<2x32xf32>
    %111 = vector.extract_strided_slice %107 {offsets = [0, 96], sizes = [2, 32], strides = [1, 1]} : vector<2x128xf32> to vector<2x32xf32>
    %112 = arith.mulf %109, %45 : vector<2x32xf32>
    %113 = arith.mulf %108, %110 : vector<2x32xf32>
    %114 = arith.addf %112, %113 : vector<2x32xf32>
    %115 = math.tanh %114 : vector<2x32xf32>
    %116 = arith.mulf %111, %115 : vector<2x32xf32>
    %cst_40 = arith.constant dense<0.000000e+00> : vector<2x64xf32>
    %117 = tpu.matmul %116, %2, %cst_40 {dimension_numbers = #tpu.dot_dimension_numbers<[1], [0], [0], [1], [0, 0, 1, 1], [], []>} : vector<2x32xf32>, vector<32x64xf32>, vector<2x64xf32> -> vector<2x64xf32>
    %118 = vector.broadcast %10 : vector<1x64xf32> to vector<2x64xf32>
    %119 = arith.addf %117, %118 : vector<2x64xf32>
    %cst_41 = arith.constant dense<0.000000e+00> : vector<2x128xf32>
    %120 = tpu.matmul %92, %4, %cst_41 {dimension_numbers = #tpu.dot_dimension_numbers<[1], [0], [0], [1], [0, 0, 1, 1], [], []>} : vector<2x32xf32>, vector<32x128xf32>, vector<2x128xf32> -> vector<2x128xf32>
    %121 = arith.addf %34, %120 : vector<2x128xf32>
    %122 = arith.negf %121 : vector<2x128xf32>
    %123 = math.exp %122 : vector<2x128xf32>
    %cst_42 = arith.constant 1.000000e+00 : f32
    %124 = vector.broadcast %cst_42 : f32 to vector<2x128xf32>
    %125 = arith.addf %124, %123 : vector<2x128xf32>
    %126 = arith.divf %124, %125 : vector<2x128xf32>
    %cst_43 = arith.constant 2.000000e+00 : f32
    %127 = vector.broadcast %cst_43 : f32 to vector<2x128xf32>
    %128 = arith.mulf %127, %126 : vector<2x128xf32>
    %cst_44 = arith.constant 1.000000e+00 : f32
    %129 = vector.broadcast %cst_44 : f32 to vector<2x128xf32>
    %130 = arith.subf %128, %129 : vector<2x128xf32>
    %131 = arith.select %27, %130, %126 : vector<2x128xi1>, vector<2x128xf32>
    %132 = vector.extract_strided_slice %131 {offsets = [0, 0], sizes = [2, 32], strides = [1, 1]} : vector<2x128xf32> to vector<2x32xf32>
    %133 = vector.extract_strided_slice %131 {offsets = [0, 32], sizes = [2, 32], strides = [1, 1]} : vector<2x128xf32> to vector<2x32xf32>
    %134 = vector.extract_strided_slice %131 {offsets = [0, 64], sizes = [2, 32], strides = [1, 1]} : vector<2x128xf32> to vector<2x32xf32>
    %135 = vector.extract_strided_slice %131 {offsets = [0, 96], sizes = [2, 32], strides = [1, 1]} : vector<2x128xf32> to vector<2x32xf32>
    %136 = arith.mulf %133, %90 : vector<2x32xf32>
    %137 = arith.mulf %132, %134 : vector<2x32xf32>
    %138 = arith.addf %136, %137 : vector<2x32xf32>
    %139 = math.tanh %138 : vector<2x32xf32>
    %140 = arith.mulf %135, %139 : vector<2x32xf32>
    %cst_45 = arith.constant dense<0.000000e+00> : vector<2x128xf32>
    %141 = tpu.matmul %140, %1, %cst_45 {dimension_numbers = #tpu.dot_dimension_numbers<[1], [0], [0], [1], [0, 0, 1, 1], [], []>} : vector<2x32xf32>, vector<32x128xf32>, vector<2x128xf32> -> vector<2x128xf32>
    %142 = vector.broadcast %9 : vector<1x128xf32> to vector<2x128xf32>
    %143 = arith.addf %141, %142 : vector<2x128xf32>
    %cst_46 = arith.constant dense<0.000000e+00> : vector<2x128xf32>
    %144 = tpu.matmul %116, %5, %cst_46 {dimension_numbers = #tpu.dot_dimension_numbers<[1], [0], [0], [1], [0, 0, 1, 1], [], []>} : vector<2x32xf32>, vector<32x128xf32>, vector<2x128xf32> -> vector<2x128xf32>
    %145 = arith.addf %95, %144 : vector<2x128xf32>
    %146 = arith.negf %145 : vector<2x128xf32>
    %147 = math.exp %146 : vector<2x128xf32>
    %cst_47 = arith.constant 1.000000e+00 : f32
    %148 = vector.broadcast %cst_47 : f32 to vector<2x128xf32>
    %149 = arith.addf %148, %147 : vector<2x128xf32>
    %150 = arith.divf %148, %149 : vector<2x128xf32>
    %cst_48 = arith.constant 2.000000e+00 : f32
    %151 = vector.broadcast %cst_48 : f32 to vector<2x128xf32>
    %152 = arith.mulf %151, %150 : vector<2x128xf32>
    %cst_49 = arith.constant 1.000000e+00 : f32
    %153 = vector.broadcast %cst_49 : f32 to vector<2x128xf32>
    %154 = arith.subf %152, %153 : vector<2x128xf32>
    %155 = arith.select %27, %154, %150 : vector<2x128xi1>, vector<2x128xf32>
    %156 = vector.extract_strided_slice %155 {offsets = [0, 0], sizes = [2, 32], strides = [1, 1]} : vector<2x128xf32> to vector<2x32xf32>
    %157 = vector.extract_strided_slice %155 {offsets = [0, 32], sizes = [2, 32], strides = [1, 1]} : vector<2x128xf32> to vector<2x32xf32>
    %158 = vector.extract_strided_slice %155 {offsets = [0, 64], sizes = [2, 32], strides = [1, 1]} : vector<2x128xf32> to vector<2x32xf32>
    %159 = vector.extract_strided_slice %155 {offsets = [0, 96], sizes = [2, 32], strides = [1, 1]} : vector<2x128xf32> to vector<2x32xf32>
    %160 = arith.mulf %157, %114 : vector<2x32xf32>
    %161 = arith.mulf %156, %158 : vector<2x32xf32>
    %162 = arith.addf %160, %161 : vector<2x32xf32>
    %163 = math.tanh %162 : vector<2x32xf32>
    %164 = arith.mulf %159, %163 : vector<2x32xf32>
    %cst_50 = arith.constant dense<0.000000e+00> : vector<2x64xf32>
    %165 = tpu.matmul %164, %2, %cst_50 {dimension_numbers = #tpu.dot_dimension_numbers<[1], [0], [0], [1], [0, 0, 1, 1], [], []>} : vector<2x32xf32>, vector<32x64xf32>, vector<2x64xf32> -> vector<2x64xf32>
    %166 = vector.broadcast %10 : vector<1x64xf32> to vector<2x64xf32>
    %167 = arith.addf %165, %166 : vector<2x64xf32>
    %cst_51 = arith.constant dense<0.000000e+00> : vector<2x64xf32>
    %168 = tpu.matmul %42, %6, %cst_51 {dimension_numbers = #tpu.dot_dimension_numbers<[1], [0], [0], [1], [0, 0, 1, 1], [], []>} : vector<2x16xf32>, vector<16x64xf32>, vector<2x64xf32> -> vector<2x64xf32>
    %169 = arith.addf %119, %168 : vector<2x64xf32>
    %170 = arith.negf %169 : vector<2x64xf32>
    %171 = math.exp %170 : vector<2x64xf32>
    %cst_52 = arith.constant 1.000000e+00 : f32
    %172 = vector.broadcast %cst_52 : f32 to vector<2x64xf32>
    %173 = arith.addf %172, %171 : vector<2x64xf32>
    %174 = arith.divf %172, %173 : vector<2x64xf32>
    %cst_53 = arith.constant 2.000000e+00 : f32
    %175 = vector.broadcast %cst_53 : f32 to vector<2x64xf32>
    %176 = arith.mulf %175, %174 : vector<2x64xf32>
    %cst_54 = arith.constant 1.000000e+00 : f32
    %177 = vector.broadcast %cst_54 : f32 to vector<2x64xf32>
    %178 = arith.subf %176, %177 : vector<2x64xf32>
    %179 = arith.select %21, %178, %174 : vector<2x64xi1>, vector<2x64xf32>
    %180 = vector.extract_strided_slice %179 {offsets = [0, 0], sizes = [2, 16], strides = [1, 1]} : vector<2x64xf32> to vector<2x16xf32>
    %181 = vector.extract_strided_slice %179 {offsets = [0, 16], sizes = [2, 16], strides = [1, 1]} : vector<2x64xf32> to vector<2x16xf32>
    %182 = vector.extract_strided_slice %179 {offsets = [0, 32], sizes = [2, 16], strides = [1, 1]} : vector<2x64xf32> to vector<2x16xf32>
    %183 = vector.extract_strided_slice %179 {offsets = [0, 48], sizes = [2, 16], strides = [1, 1]} : vector<2x64xf32> to vector<2x16xf32>
    %184 = arith.mulf %181, %46 : vector<2x16xf32>
    %185 = arith.mulf %180, %182 : vector<2x16xf32>
    %186 = arith.addf %184, %185 : vector<2x16xf32>
    %187 = math.tanh %186 : vector<2x16xf32>
    %188 = arith.mulf %183, %187 : vector<2x16xf32>
    %cst_55 = arith.constant dense<0.000000e+00> : vector<2x64xf32>
    %189 = tpu.matmul %188, %3, %cst_55 {dimension_numbers = #tpu.dot_dimension_numbers<[1], [0], [0], [1], [0, 0, 1, 1], [], []>} : vector<2x16xf32>, vector<16x64xf32>, vector<2x64xf32> -> vector<2x64xf32>
    %190 = vector.broadcast %11 : vector<1x64xf32> to vector<2x64xf32>
    %191 = arith.addf %189, %190 : vector<2x64xf32>
    %cst_56 = arith.constant dense<0.000000e+00> : vector<2x128xf32>
    %192 = tpu.matmul %140, %4, %cst_56 {dimension_numbers = #tpu.dot_dimension_numbers<[1], [0], [0], [1], [0, 0, 1, 1], [], []>} : vector<2x32xf32>, vector<32x128xf32>, vector<2x128xf32> -> vector<2x128xf32>
    %193 = arith.addf %35, %192 : vector<2x128xf32>
    %194 = arith.negf %193 : vector<2x128xf32>
    %195 = math.exp %194 : vector<2x128xf32>
    %cst_57 = arith.constant 1.000000e+00 : f32
    %196 = vector.broadcast %cst_57 : f32 to vector<2x128xf32>
    %197 = arith.addf %196, %195 : vector<2x128xf32>
    %198 = arith.divf %196, %197 : vector<2x128xf32>
    %cst_58 = arith.constant 2.000000e+00 : f32
    %199 = vector.broadcast %cst_58 : f32 to vector<2x128xf32>
    %200 = arith.mulf %199, %198 : vector<2x128xf32>
    %cst_59 = arith.constant 1.000000e+00 : f32
    %201 = vector.broadcast %cst_59 : f32 to vector<2x128xf32>
    %202 = arith.subf %200, %201 : vector<2x128xf32>
    %203 = arith.select %27, %202, %198 : vector<2x128xi1>, vector<2x128xf32>
    %204 = vector.extract_strided_slice %203 {offsets = [0, 0], sizes = [2, 32], strides = [1, 1]} : vector<2x128xf32> to vector<2x32xf32>
    %205 = vector.extract_strided_slice %203 {offsets = [0, 32], sizes = [2, 32], strides = [1, 1]} : vector<2x128xf32> to vector<2x32xf32>
    %206 = vector.extract_strided_slice %203 {offsets = [0, 64], sizes = [2, 32], strides = [1, 1]} : vector<2x128xf32> to vector<2x32xf32>
    %207 = vector.extract_strided_slice %203 {offsets = [0, 96], sizes = [2, 32], strides = [1, 1]} : vector<2x128xf32> to vector<2x32xf32>
    %208 = arith.mulf %205, %138 : vector<2x32xf32>
    %209 = arith.mulf %204, %206 : vector<2x32xf32>
    %210 = arith.addf %208, %209 : vector<2x32xf32>
    %211 = math.tanh %210 : vector<2x32xf32>
    %212 = arith.mulf %207, %211 : vector<2x32xf32>
    %cst_60 = arith.constant dense<0.000000e+00> : vector<2x128xf32>
    %213 = tpu.matmul %212, %1, %cst_60 {dimension_numbers = #tpu.dot_dimension_numbers<[1], [0], [0], [1], [0, 0, 1, 1], [], []>} : vector<2x32xf32>, vector<32x128xf32>, vector<2x128xf32> -> vector<2x128xf32>
    %214 = vector.broadcast %9 : vector<1x128xf32> to vector<2x128xf32>
    %215 = arith.addf %213, %214 : vector<2x128xf32>
    %cst_61 = arith.constant dense<0.000000e+00> : vector<2x128xf32>
    %216 = tpu.matmul %164, %5, %cst_61 {dimension_numbers = #tpu.dot_dimension_numbers<[1], [0], [0], [1], [0, 0, 1, 1], [], []>} : vector<2x32xf32>, vector<32x128xf32>, vector<2x128xf32> -> vector<2x128xf32>
    %217 = arith.addf %143, %216 : vector<2x128xf32>
    %218 = arith.negf %217 : vector<2x128xf32>
    %219 = math.exp %218 : vector<2x128xf32>
    %cst_62 = arith.constant 1.000000e+00 : f32
    %220 = vector.broadcast %cst_62 : f32 to vector<2x128xf32>
    %221 = arith.addf %220, %219 : vector<2x128xf32>
    %222 = arith.divf %220, %221 : vector<2x128xf32>
    %cst_63 = arith.constant 2.000000e+00 : f32
    %223 = vector.broadcast %cst_63 : f32 to vector<2x128xf32>
    %224 = arith.mulf %223, %222 : vector<2x128xf32>
    %cst_64 = arith.constant 1.000000e+00 : f32
    %225 = vector.broadcast %cst_64 : f32 to vector<2x128xf32>
    %226 = arith.subf %224, %225 : vector<2x128xf32>
    %227 = arith.select %27, %226, %222 : vector<2x128xi1>, vector<2x128xf32>
    %228 = vector.extract_strided_slice %227 {offsets = [0, 0], sizes = [2, 32], strides = [1, 1]} : vector<2x128xf32> to vector<2x32xf32>
    %229 = vector.extract_strided_slice %227 {offsets = [0, 32], sizes = [2, 32], strides = [1, 1]} : vector<2x128xf32> to vector<2x32xf32>
    %230 = vector.extract_strided_slice %227 {offsets = [0, 64], sizes = [2, 32], strides = [1, 1]} : vector<2x128xf32> to vector<2x32xf32>
    %231 = vector.extract_strided_slice %227 {offsets = [0, 96], sizes = [2, 32], strides = [1, 1]} : vector<2x128xf32> to vector<2x32xf32>
    %232 = arith.mulf %229, %162 : vector<2x32xf32>
    %233 = arith.mulf %228, %230 : vector<2x32xf32>
    %234 = arith.addf %232, %233 : vector<2x32xf32>
    %235 = math.tanh %234 : vector<2x32xf32>
    %236 = arith.mulf %231, %235 : vector<2x32xf32>
    %cst_65 = arith.constant dense<0.000000e+00> : vector<2x64xf32>
    %237 = tpu.matmul %236, %2, %cst_65 {dimension_numbers = #tpu.dot_dimension_numbers<[1], [0], [0], [1], [0, 0, 1, 1], [], []>} : vector<2x32xf32>, vector<32x64xf32>, vector<2x64xf32> -> vector<2x64xf32>
    %238 = vector.broadcast %10 : vector<1x64xf32> to vector<2x64xf32>
    %239 = arith.addf %237, %238 : vector<2x64xf32>
    %cst_66 = arith.constant dense<0.000000e+00> : vector<2x64xf32>
    %240 = tpu.matmul %188, %6, %cst_66 {dimension_numbers = #tpu.dot_dimension_numbers<[1], [0], [0], [1], [0, 0, 1, 1], [], []>} : vector<2x16xf32>, vector<16x64xf32>, vector<2x64xf32> -> vector<2x64xf32>
    %241 = arith.addf %167, %240 : vector<2x64xf32>
    %242 = arith.negf %241 : vector<2x64xf32>
    %243 = math.exp %242 : vector<2x64xf32>
    %cst_67 = arith.constant 1.000000e+00 : f32
    %244 = vector.broadcast %cst_67 : f32 to vector<2x64xf32>
    %245 = arith.addf %244, %243 : vector<2x64xf32>
    %246 = arith.divf %244, %245 : vector<2x64xf32>
    %cst_68 = arith.constant 2.000000e+00 : f32
    %247 = vector.broadcast %cst_68 : f32 to vector<2x64xf32>
    %248 = arith.mulf %247, %246 : vector<2x64xf32>
    %cst_69 = arith.constant 1.000000e+00 : f32
    %249 = vector.broadcast %cst_69 : f32 to vector<2x64xf32>
    %250 = arith.subf %248, %249 : vector<2x64xf32>
    %251 = arith.select %21, %250, %246 : vector<2x64xi1>, vector<2x64xf32>
    %252 = vector.extract_strided_slice %251 {offsets = [0, 0], sizes = [2, 16], strides = [1, 1]} : vector<2x64xf32> to vector<2x16xf32>
    %253 = vector.extract_strided_slice %251 {offsets = [0, 16], sizes = [2, 16], strides = [1, 1]} : vector<2x64xf32> to vector<2x16xf32>
    %254 = vector.extract_strided_slice %251 {offsets = [0, 32], sizes = [2, 16], strides = [1, 1]} : vector<2x64xf32> to vector<2x16xf32>
    %255 = vector.extract_strided_slice %251 {offsets = [0, 48], sizes = [2, 16], strides = [1, 1]} : vector<2x64xf32> to vector<2x16xf32>
    %256 = arith.mulf %253, %186 : vector<2x16xf32>
    %257 = arith.mulf %252, %254 : vector<2x16xf32>
    %258 = arith.addf %256, %257 : vector<2x16xf32>
    %259 = math.tanh %258 : vector<2x16xf32>
    %260 = arith.mulf %255, %259 : vector<2x16xf32>
    %cst_70 = arith.constant dense<0.000000e+00> : vector<2x64xf32>
    %261 = tpu.matmul %260, %3, %cst_70 {dimension_numbers = #tpu.dot_dimension_numbers<[1], [0], [0], [1], [0, 0, 1, 1], [], []>} : vector<2x16xf32>, vector<16x64xf32>, vector<2x64xf32> -> vector<2x64xf32>
    %262 = vector.broadcast %11 : vector<1x64xf32> to vector<2x64xf32>
    %263 = arith.addf %261, %262 : vector<2x64xf32>
    %cst_71 = arith.constant dense<0.000000e+00> : vector<2x64xf32>
    %264 = tpu.matmul %43, %7, %cst_71 {dimension_numbers = #tpu.dot_dimension_numbers<[1], [0], [0], [1], [0, 0, 1, 1], [], []>} : vector<2x16xf32>, vector<16x64xf32>, vector<2x64xf32> -> vector<2x64xf32>
    %265 = arith.addf %191, %264 : vector<2x64xf32>
    %266 = arith.negf %265 : vector<2x64xf32>
    %267 = math.exp %266 : vector<2x64xf32>
    %cst_72 = arith.constant 1.000000e+00 : f32
    %268 = vector.broadcast %cst_72 : f32 to vector<2x64xf32>
    %269 = arith.addf %268, %267 : vector<2x64xf32>
    %270 = arith.divf %268, %269 : vector<2x64xf32>
    %cst_73 = arith.constant 2.000000e+00 : f32
    %271 = vector.broadcast %cst_73 : f32 to vector<2x64xf32>
    %272 = arith.mulf %271, %270 : vector<2x64xf32>
    %cst_74 = arith.constant 1.000000e+00 : f32
    %273 = vector.broadcast %cst_74 : f32 to vector<2x64xf32>
    %274 = arith.subf %272, %273 : vector<2x64xf32>
    %275 = arith.select %21, %274, %270 : vector<2x64xi1>, vector<2x64xf32>
    %276 = vector.extract_strided_slice %275 {offsets = [0, 0], sizes = [2, 16], strides = [1, 1]} : vector<2x64xf32> to vector<2x16xf32>
    %277 = vector.extract_strided_slice %275 {offsets = [0, 16], sizes = [2, 16], strides = [1, 1]} : vector<2x64xf32> to vector<2x16xf32>
    %278 = vector.extract_strided_slice %275 {offsets = [0, 32], sizes = [2, 16], strides = [1, 1]} : vector<2x64xf32> to vector<2x16xf32>
    %279 = vector.extract_strided_slice %275 {offsets = [0, 48], sizes = [2, 16], strides = [1, 1]} : vector<2x64xf32> to vector<2x16xf32>
    %280 = arith.mulf %277, %47 : vector<2x16xf32>
    %281 = arith.mulf %276, %278 : vector<2x16xf32>
    %282 = arith.addf %280, %281 : vector<2x16xf32>
    %283 = math.tanh %282 : vector<2x16xf32>
    %284 = arith.mulf %279, %283 : vector<2x16xf32>
    %cst_75 = arith.constant dense<0.000000e+00> : vector<2x128xf32>
    %285 = tpu.matmul %212, %4, %cst_75 {dimension_numbers = #tpu.dot_dimension_numbers<[1], [0], [0], [1], [0, 0, 1, 1], [], []>} : vector<2x32xf32>, vector<32x128xf32>, vector<2x128xf32> -> vector<2x128xf32>
    %286 = arith.addf %36, %285 : vector<2x128xf32>
    %287 = arith.negf %286 : vector<2x128xf32>
    %288 = math.exp %287 : vector<2x128xf32>
    %cst_76 = arith.constant 1.000000e+00 : f32
    %289 = vector.broadcast %cst_76 : f32 to vector<2x128xf32>
    %290 = arith.addf %289, %288 : vector<2x128xf32>
    %291 = arith.divf %289, %290 : vector<2x128xf32>
    %cst_77 = arith.constant 2.000000e+00 : f32
    %292 = vector.broadcast %cst_77 : f32 to vector<2x128xf32>
    %293 = arith.mulf %292, %291 : vector<2x128xf32>
    %cst_78 = arith.constant 1.000000e+00 : f32
    %294 = vector.broadcast %cst_78 : f32 to vector<2x128xf32>
    %295 = arith.subf %293, %294 : vector<2x128xf32>
    %296 = arith.select %27, %295, %291 : vector<2x128xi1>, vector<2x128xf32>
    %297 = vector.extract_strided_slice %296 {offsets = [0, 0], sizes = [2, 32], strides = [1, 1]} : vector<2x128xf32> to vector<2x32xf32>
    %298 = vector.extract_strided_slice %296 {offsets = [0, 32], sizes = [2, 32], strides = [1, 1]} : vector<2x128xf32> to vector<2x32xf32>
    %299 = vector.extract_strided_slice %296 {offsets = [0, 64], sizes = [2, 32], strides = [1, 1]} : vector<2x128xf32> to vector<2x32xf32>
    %300 = vector.extract_strided_slice %296 {offsets = [0, 96], sizes = [2, 32], strides = [1, 1]} : vector<2x128xf32> to vector<2x32xf32>
    %301 = arith.mulf %298, %210 : vector<2x32xf32>
    %302 = arith.mulf %297, %299 : vector<2x32xf32>
    %303 = arith.addf %301, %302 : vector<2x32xf32>
    %304 = math.tanh %303 : vector<2x32xf32>
    %305 = arith.mulf %300, %304 : vector<2x32xf32>
    %cst_79 = arith.constant dense<0.000000e+00> : vector<2x128xf32>
    %306 = tpu.matmul %305, %1, %cst_79 {dimension_numbers = #tpu.dot_dimension_numbers<[1], [0], [0], [1], [0, 0, 1, 1], [], []>} : vector<2x32xf32>, vector<32x128xf32>, vector<2x128xf32> -> vector<2x128xf32>
    %307 = vector.broadcast %9 : vector<1x128xf32> to vector<2x128xf32>
    %308 = arith.addf %306, %307 : vector<2x128xf32>
    %cst_80 = arith.constant dense<0.000000e+00> : vector<2x128xf32>
    %309 = tpu.matmul %236, %5, %cst_80 {dimension_numbers = #tpu.dot_dimension_numbers<[1], [0], [0], [1], [0, 0, 1, 1], [], []>} : vector<2x32xf32>, vector<32x128xf32>, vector<2x128xf32> -> vector<2x128xf32>
    %310 = arith.addf %215, %309 : vector<2x128xf32>
    %311 = arith.negf %310 : vector<2x128xf32>
    %312 = math.exp %311 : vector<2x128xf32>
    %cst_81 = arith.constant 1.000000e+00 : f32
    %313 = vector.broadcast %cst_81 : f32 to vector<2x128xf32>
    %314 = arith.addf %313, %312 : vector<2x128xf32>
    %315 = arith.divf %313, %314 : vector<2x128xf32>
    %cst_82 = arith.constant 2.000000e+00 : f32
    %316 = vector.broadcast %cst_82 : f32 to vector<2x128xf32>
    %317 = arith.mulf %316, %315 : vector<2x128xf32>
    %cst_83 = arith.constant 1.000000e+00 : f32
    %318 = vector.broadcast %cst_83 : f32 to vector<2x128xf32>
    %319 = arith.subf %317, %318 : vector<2x128xf32>
    %320 = arith.select %27, %319, %315 : vector<2x128xi1>, vector<2x128xf32>
    %321 = vector.extract_strided_slice %320 {offsets = [0, 0], sizes = [2, 32], strides = [1, 1]} : vector<2x128xf32> to vector<2x32xf32>
    %322 = vector.extract_strided_slice %320 {offsets = [0, 32], sizes = [2, 32], strides = [1, 1]} : vector<2x128xf32> to vector<2x32xf32>
    %323 = vector.extract_strided_slice %320 {offsets = [0, 64], sizes = [2, 32], strides = [1, 1]} : vector<2x128xf32> to vector<2x32xf32>
    %324 = vector.extract_strided_slice %320 {offsets = [0, 96], sizes = [2, 32], strides = [1, 1]} : vector<2x128xf32> to vector<2x32xf32>
    %325 = arith.mulf %322, %234 : vector<2x32xf32>
    %326 = arith.mulf %321, %323 : vector<2x32xf32>
    %327 = arith.addf %325, %326 : vector<2x32xf32>
    %328 = math.tanh %327 : vector<2x32xf32>
    %329 = arith.mulf %324, %328 : vector<2x32xf32>
    %cst_84 = arith.constant dense<0.000000e+00> : vector<2x64xf32>
    %330 = tpu.matmul %329, %2, %cst_84 {dimension_numbers = #tpu.dot_dimension_numbers<[1], [0], [0], [1], [0, 0, 1, 1], [], []>} : vector<2x32xf32>, vector<32x64xf32>, vector<2x64xf32> -> vector<2x64xf32>
    %331 = vector.broadcast %10 : vector<1x64xf32> to vector<2x64xf32>
    %332 = arith.addf %330, %331 : vector<2x64xf32>
    %cst_85 = arith.constant dense<0.000000e+00> : vector<2x64xf32>
    %333 = tpu.matmul %260, %6, %cst_85 {dimension_numbers = #tpu.dot_dimension_numbers<[1], [0], [0], [1], [0, 0, 1, 1], [], []>} : vector<2x16xf32>, vector<16x64xf32>, vector<2x64xf32> -> vector<2x64xf32>
    %334 = arith.addf %239, %333 : vector<2x64xf32>
    %335 = arith.negf %334 : vector<2x64xf32>
    %336 = math.exp %335 : vector<2x64xf32>
    %cst_86 = arith.constant 1.000000e+00 : f32
    %337 = vector.broadcast %cst_86 : f32 to vector<2x64xf32>
    %338 = arith.addf %337, %336 : vector<2x64xf32>
    %339 = arith.divf %337, %338 : vector<2x64xf32>
    %cst_87 = arith.constant 2.000000e+00 : f32
    %340 = vector.broadcast %cst_87 : f32 to vector<2x64xf32>
    %341 = arith.mulf %340, %339 : vector<2x64xf32>
    %cst_88 = arith.constant 1.000000e+00 : f32
    %342 = vector.broadcast %cst_88 : f32 to vector<2x64xf32>
    %343 = arith.subf %341, %342 : vector<2x64xf32>
    %344 = arith.select %21, %343, %339 : vector<2x64xi1>, vector<2x64xf32>
    %345 = vector.extract_strided_slice %344 {offsets = [0, 0], sizes = [2, 16], strides = [1, 1]} : vector<2x64xf32> to vector<2x16xf32>
    %346 = vector.extract_strided_slice %344 {offsets = [0, 16], sizes = [2, 16], strides = [1, 1]} : vector<2x64xf32> to vector<2x16xf32>
    %347 = vector.extract_strided_slice %344 {offsets = [0, 32], sizes = [2, 16], strides = [1, 1]} : vector<2x64xf32> to vector<2x16xf32>
    %348 = vector.extract_strided_slice %344 {offsets = [0, 48], sizes = [2, 16], strides = [1, 1]} : vector<2x64xf32> to vector<2x16xf32>
    %349 = arith.mulf %346, %258 : vector<2x16xf32>
    %350 = arith.mulf %345, %347 : vector<2x16xf32>
    %351 = arith.addf %349, %350 : vector<2x16xf32>
    %352 = math.tanh %351 : vector<2x16xf32>
    %353 = arith.mulf %348, %352 : vector<2x16xf32>
    %cst_89 = arith.constant dense<0.000000e+00> : vector<2x64xf32>
    %354 = tpu.matmul %353, %3, %cst_89 {dimension_numbers = #tpu.dot_dimension_numbers<[1], [0], [0], [1], [0, 0, 1, 1], [], []>} : vector<2x16xf32>, vector<16x64xf32>, vector<2x64xf32> -> vector<2x64xf32>
    %355 = vector.broadcast %11 : vector<1x64xf32> to vector<2x64xf32>
    %356 = arith.addf %354, %355 : vector<2x64xf32>
    %cst_90 = arith.constant dense<0.000000e+00> : vector<2x64xf32>
    %357 = tpu.matmul %284, %7, %cst_90 {dimension_numbers = #tpu.dot_dimension_numbers<[1], [0], [0], [1], [0, 0, 1, 1], [], []>} : vector<2x16xf32>, vector<16x64xf32>, vector<2x64xf32> -> vector<2x64xf32>
    %358 = arith.addf %263, %357 : vector<2x64xf32>
    %359 = arith.negf %358 : vector<2x64xf32>
    %360 = math.exp %359 : vector<2x64xf32>
    %cst_91 = arith.constant 1.000000e+00 : f32
    %361 = vector.broadcast %cst_91 : f32 to vector<2x64xf32>
    %362 = arith.addf %361, %360 : vector<2x64xf32>
    %363 = arith.divf %361, %362 : vector<2x64xf32>
    %cst_92 = arith.constant 2.000000e+00 : f32
    %364 = vector.broadcast %cst_92 : f32 to vector<2x64xf32>
    %365 = arith.mulf %364, %363 : vector<2x64xf32>
    %cst_93 = arith.constant 1.000000e+00 : f32
    %366 = vector.broadcast %cst_93 : f32 to vector<2x64xf32>
    %367 = arith.subf %365, %366 : vector<2x64xf32>
    %368 = arith.select %21, %367, %363 : vector<2x64xi1>, vector<2x64xf32>
    %369 = vector.extract_strided_slice %368 {offsets = [0, 0], sizes = [2, 16], strides = [1, 1]} : vector<2x64xf32> to vector<2x16xf32>
    %370 = vector.extract_strided_slice %368 {offsets = [0, 16], sizes = [2, 16], strides = [1, 1]} : vector<2x64xf32> to vector<2x16xf32>
    %371 = vector.extract_strided_slice %368 {offsets = [0, 32], sizes = [2, 16], strides = [1, 1]} : vector<2x64xf32> to vector<2x16xf32>
    %372 = vector.extract_strided_slice %368 {offsets = [0, 48], sizes = [2, 16], strides = [1, 1]} : vector<2x64xf32> to vector<2x16xf32>
    %373 = arith.mulf %370, %282 : vector<2x16xf32>
    %374 = arith.mulf %369, %371 : vector<2x16xf32>
    %375 = arith.addf %373, %374 : vector<2x16xf32>
    %376 = math.tanh %375 : vector<2x16xf32>
    %377 = arith.mulf %372, %376 : vector<2x16xf32>
    %cst_94 = arith.constant dense<0.000000e+00> : vector<2x128xf32>
    %378 = tpu.matmul %305, %4, %cst_94 {dimension_numbers = #tpu.dot_dimension_numbers<[1], [0], [0], [1], [0, 0, 1, 1], [], []>} : vector<2x32xf32>, vector<32x128xf32>, vector<2x128xf32> -> vector<2x128xf32>
    %379 = arith.addf %37, %378 : vector<2x128xf32>
    %380 = arith.negf %379 : vector<2x128xf32>
    %381 = math.exp %380 : vector<2x128xf32>
    %cst_95 = arith.constant 1.000000e+00 : f32
    %382 = vector.broadcast %cst_95 : f32 to vector<2x128xf32>
    %383 = arith.addf %382, %381 : vector<2x128xf32>
    %384 = arith.divf %382, %383 : vector<2x128xf32>
    %cst_96 = arith.constant 2.000000e+00 : f32
    %385 = vector.broadcast %cst_96 : f32 to vector<2x128xf32>
    %386 = arith.mulf %385, %384 : vector<2x128xf32>
    %cst_97 = arith.constant 1.000000e+00 : f32
    %387 = vector.broadcast %cst_97 : f32 to vector<2x128xf32>
    %388 = arith.subf %386, %387 : vector<2x128xf32>
    %389 = arith.select %27, %388, %384 : vector<2x128xi1>, vector<2x128xf32>
    %390 = vector.extract_strided_slice %389 {offsets = [0, 0], sizes = [2, 32], strides = [1, 1]} : vector<2x128xf32> to vector<2x32xf32>
    %391 = vector.extract_strided_slice %389 {offsets = [0, 32], sizes = [2, 32], strides = [1, 1]} : vector<2x128xf32> to vector<2x32xf32>
    %392 = vector.extract_strided_slice %389 {offsets = [0, 64], sizes = [2, 32], strides = [1, 1]} : vector<2x128xf32> to vector<2x32xf32>
    %393 = vector.extract_strided_slice %389 {offsets = [0, 96], sizes = [2, 32], strides = [1, 1]} : vector<2x128xf32> to vector<2x32xf32>
    %394 = arith.mulf %391, %303 : vector<2x32xf32>
    %395 = arith.mulf %390, %392 : vector<2x32xf32>
    %396 = arith.addf %394, %395 : vector<2x32xf32>
    %397 = math.tanh %396 : vector<2x32xf32>
    %398 = arith.mulf %393, %397 : vector<2x32xf32>
    %cst_98 = arith.constant dense<0.000000e+00> : vector<2x128xf32>
    %399 = tpu.matmul %398, %1, %cst_98 {dimension_numbers = #tpu.dot_dimension_numbers<[1], [0], [0], [1], [0, 0, 1, 1], [], []>} : vector<2x32xf32>, vector<32x128xf32>, vector<2x128xf32> -> vector<2x128xf32>
    %400 = vector.broadcast %9 : vector<1x128xf32> to vector<2x128xf32>
    %401 = arith.addf %399, %400 : vector<2x128xf32>
    %cst_99 = arith.constant dense<0.000000e+00> : vector<2x128xf32>
    %402 = tpu.matmul %329, %5, %cst_99 {dimension_numbers = #tpu.dot_dimension_numbers<[1], [0], [0], [1], [0, 0, 1, 1], [], []>} : vector<2x32xf32>, vector<32x128xf32>, vector<2x128xf32> -> vector<2x128xf32>
    %403 = arith.addf %308, %402 : vector<2x128xf32>
    %404 = arith.negf %403 : vector<2x128xf32>
    %405 = math.exp %404 : vector<2x128xf32>
    %cst_100 = arith.constant 1.000000e+00 : f32
    %406 = vector.broadcast %cst_100 : f32 to vector<2x128xf32>
    %407 = arith.addf %406, %405 : vector<2x128xf32>
    %408 = arith.divf %406, %407 : vector<2x128xf32>
    %cst_101 = arith.constant 2.000000e+00 : f32
    %409 = vector.broadcast %cst_101 : f32 to vector<2x128xf32>
    %410 = arith.mulf %409, %408 : vector<2x128xf32>
    %cst_102 = arith.constant 1.000000e+00 : f32
    %411 = vector.broadcast %cst_102 : f32 to vector<2x128xf32>
    %412 = arith.subf %410, %411 : vector<2x128xf32>
    %413 = arith.select %27, %412, %408 : vector<2x128xi1>, vector<2x128xf32>
    %414 = vector.extract_strided_slice %413 {offsets = [0, 0], sizes = [2, 32], strides = [1, 1]} : vector<2x128xf32> to vector<2x32xf32>
    %415 = vector.extract_strided_slice %413 {offsets = [0, 32], sizes = [2, 32], strides = [1, 1]} : vector<2x128xf32> to vector<2x32xf32>
    %416 = vector.extract_strided_slice %413 {offsets = [0, 64], sizes = [2, 32], strides = [1, 1]} : vector<2x128xf32> to vector<2x32xf32>
    %417 = vector.extract_strided_slice %413 {offsets = [0, 96], sizes = [2, 32], strides = [1, 1]} : vector<2x128xf32> to vector<2x32xf32>
    %418 = arith.mulf %415, %327 : vector<2x32xf32>
    %419 = arith.mulf %414, %416 : vector<2x32xf32>
    %420 = arith.addf %418, %419 : vector<2x32xf32>
    %421 = math.tanh %420 : vector<2x32xf32>
    %422 = arith.mulf %417, %421 : vector<2x32xf32>
    %cst_103 = arith.constant dense<0.000000e+00> : vector<2x64xf32>
    %423 = tpu.matmul %422, %2, %cst_103 {dimension_numbers = #tpu.dot_dimension_numbers<[1], [0], [0], [1], [0, 0, 1, 1], [], []>} : vector<2x32xf32>, vector<32x64xf32>, vector<2x64xf32> -> vector<2x64xf32>
    %424 = vector.broadcast %10 : vector<1x64xf32> to vector<2x64xf32>
    %425 = arith.addf %423, %424 : vector<2x64xf32>
    %cst_104 = arith.constant dense<0.000000e+00> : vector<2x64xf32>
    %426 = tpu.matmul %353, %6, %cst_104 {dimension_numbers = #tpu.dot_dimension_numbers<[1], [0], [0], [1], [0, 0, 1, 1], [], []>} : vector<2x16xf32>, vector<16x64xf32>, vector<2x64xf32> -> vector<2x64xf32>
    %427 = arith.addf %332, %426 : vector<2x64xf32>
    %428 = arith.negf %427 : vector<2x64xf32>
    %429 = math.exp %428 : vector<2x64xf32>
    %cst_105 = arith.constant 1.000000e+00 : f32
    %430 = vector.broadcast %cst_105 : f32 to vector<2x64xf32>
    %431 = arith.addf %430, %429 : vector<2x64xf32>
    %432 = arith.divf %430, %431 : vector<2x64xf32>
    %cst_106 = arith.constant 2.000000e+00 : f32
    %433 = vector.broadcast %cst_106 : f32 to vector<2x64xf32>
    %434 = arith.mulf %433, %432 : vector<2x64xf32>
    %cst_107 = arith.constant 1.000000e+00 : f32
    %435 = vector.broadcast %cst_107 : f32 to vector<2x64xf32>
    %436 = arith.subf %434, %435 : vector<2x64xf32>
    %437 = arith.select %21, %436, %432 : vector<2x64xi1>, vector<2x64xf32>
    %438 = vector.extract_strided_slice %437 {offsets = [0, 0], sizes = [2, 16], strides = [1, 1]} : vector<2x64xf32> to vector<2x16xf32>
    %439 = vector.extract_strided_slice %437 {offsets = [0, 16], sizes = [2, 16], strides = [1, 1]} : vector<2x64xf32> to vector<2x16xf32>
    %440 = vector.extract_strided_slice %437 {offsets = [0, 32], sizes = [2, 16], strides = [1, 1]} : vector<2x64xf32> to vector<2x16xf32>
    %441 = vector.extract_strided_slice %437 {offsets = [0, 48], sizes = [2, 16], strides = [1, 1]} : vector<2x64xf32> to vector<2x16xf32>
    %442 = arith.mulf %439, %351 : vector<2x16xf32>
    %443 = arith.mulf %438, %440 : vector<2x16xf32>
    %444 = arith.addf %442, %443 : vector<2x16xf32>
    %445 = math.tanh %444 : vector<2x16xf32>
    %446 = arith.mulf %441, %445 : vector<2x16xf32>
    %cst_108 = arith.constant dense<0.000000e+00> : vector<2x64xf32>
    %447 = tpu.matmul %446, %3, %cst_108 {dimension_numbers = #tpu.dot_dimension_numbers<[1], [0], [0], [1], [0, 0, 1, 1], [], []>} : vector<2x16xf32>, vector<16x64xf32>, vector<2x64xf32> -> vector<2x64xf32>
    %448 = vector.broadcast %11 : vector<1x64xf32> to vector<2x64xf32>
    %449 = arith.addf %447, %448 : vector<2x64xf32>
    %cst_109 = arith.constant dense<0.000000e+00> : vector<2x64xf32>
    %450 = tpu.matmul %377, %7, %cst_109 {dimension_numbers = #tpu.dot_dimension_numbers<[1], [0], [0], [1], [0, 0, 1, 1], [], []>} : vector<2x16xf32>, vector<16x64xf32>, vector<2x64xf32> -> vector<2x64xf32>
    %451 = arith.addf %356, %450 : vector<2x64xf32>
    %452 = arith.negf %451 : vector<2x64xf32>
    %453 = math.exp %452 : vector<2x64xf32>
    %cst_110 = arith.constant 1.000000e+00 : f32
    %454 = vector.broadcast %cst_110 : f32 to vector<2x64xf32>
    %455 = arith.addf %454, %453 : vector<2x64xf32>
    %456 = arith.divf %454, %455 : vector<2x64xf32>
    %cst_111 = arith.constant 2.000000e+00 : f32
    %457 = vector.broadcast %cst_111 : f32 to vector<2x64xf32>
    %458 = arith.mulf %457, %456 : vector<2x64xf32>
    %cst_112 = arith.constant 1.000000e+00 : f32
    %459 = vector.broadcast %cst_112 : f32 to vector<2x64xf32>
    %460 = arith.subf %458, %459 : vector<2x64xf32>
    %461 = arith.select %21, %460, %456 : vector<2x64xi1>, vector<2x64xf32>
    %462 = vector.extract_strided_slice %461 {offsets = [0, 0], sizes = [2, 16], strides = [1, 1]} : vector<2x64xf32> to vector<2x16xf32>
    %463 = vector.extract_strided_slice %461 {offsets = [0, 16], sizes = [2, 16], strides = [1, 1]} : vector<2x64xf32> to vector<2x16xf32>
    %464 = vector.extract_strided_slice %461 {offsets = [0, 32], sizes = [2, 16], strides = [1, 1]} : vector<2x64xf32> to vector<2x16xf32>
    %465 = vector.extract_strided_slice %461 {offsets = [0, 48], sizes = [2, 16], strides = [1, 1]} : vector<2x64xf32> to vector<2x16xf32>
    %466 = arith.mulf %463, %375 : vector<2x16xf32>
    %467 = arith.mulf %462, %464 : vector<2x16xf32>
    %468 = arith.addf %466, %467 : vector<2x16xf32>
    %469 = math.tanh %468 : vector<2x16xf32>
    %470 = arith.mulf %465, %469 : vector<2x16xf32>
    %cst_113 = arith.constant dense<0.000000e+00> : vector<2x128xf32>
    %471 = tpu.matmul %398, %4, %cst_113 {dimension_numbers = #tpu.dot_dimension_numbers<[1], [0], [0], [1], [0, 0, 1, 1], [], []>} : vector<2x32xf32>, vector<32x128xf32>, vector<2x128xf32> -> vector<2x128xf32>
    %472 = arith.addf %38, %471 : vector<2x128xf32>
    %473 = arith.negf %472 : vector<2x128xf32>
    %474 = math.exp %473 : vector<2x128xf32>
    %cst_114 = arith.constant 1.000000e+00 : f32
    %475 = vector.broadcast %cst_114 : f32 to vector<2x128xf32>
    %476 = arith.addf %475, %474 : vector<2x128xf32>
    %477 = arith.divf %475, %476 : vector<2x128xf32>
    %cst_115 = arith.constant 2.000000e+00 : f32
    %478 = vector.broadcast %cst_115 : f32 to vector<2x128xf32>
    %479 = arith.mulf %478, %477 : vector<2x128xf32>
    %cst_116 = arith.constant 1.000000e+00 : f32
    %480 = vector.broadcast %cst_116 : f32 to vector<2x128xf32>
    %481 = arith.subf %479, %480 : vector<2x128xf32>
    %482 = arith.select %27, %481, %477 : vector<2x128xi1>, vector<2x128xf32>
    %483 = vector.extract_strided_slice %482 {offsets = [0, 0], sizes = [2, 32], strides = [1, 1]} : vector<2x128xf32> to vector<2x32xf32>
    %484 = vector.extract_strided_slice %482 {offsets = [0, 32], sizes = [2, 32], strides = [1, 1]} : vector<2x128xf32> to vector<2x32xf32>
    %485 = vector.extract_strided_slice %482 {offsets = [0, 64], sizes = [2, 32], strides = [1, 1]} : vector<2x128xf32> to vector<2x32xf32>
    %486 = vector.extract_strided_slice %482 {offsets = [0, 96], sizes = [2, 32], strides = [1, 1]} : vector<2x128xf32> to vector<2x32xf32>
    %487 = arith.mulf %484, %396 : vector<2x32xf32>
    %488 = arith.mulf %483, %485 : vector<2x32xf32>
    %489 = arith.addf %487, %488 : vector<2x32xf32>
    %490 = math.tanh %489 : vector<2x32xf32>
    %491 = arith.mulf %486, %490 : vector<2x32xf32>
    %cst_117 = arith.constant dense<0.000000e+00> : vector<2x128xf32>
    %492 = tpu.matmul %491, %1, %cst_117 {dimension_numbers = #tpu.dot_dimension_numbers<[1], [0], [0], [1], [0, 0, 1, 1], [], []>} : vector<2x32xf32>, vector<32x128xf32>, vector<2x128xf32> -> vector<2x128xf32>
    %493 = vector.broadcast %9 : vector<1x128xf32> to vector<2x128xf32>
    %494 = arith.addf %492, %493 : vector<2x128xf32>
    %cst_118 = arith.constant dense<0.000000e+00> : vector<2x128xf32>
    %495 = tpu.matmul %422, %5, %cst_118 {dimension_numbers = #tpu.dot_dimension_numbers<[1], [0], [0], [1], [0, 0, 1, 1], [], []>} : vector<2x32xf32>, vector<32x128xf32>, vector<2x128xf32> -> vector<2x128xf32>
    %496 = arith.addf %401, %495 : vector<2x128xf32>
    %497 = arith.negf %496 : vector<2x128xf32>
    %498 = math.exp %497 : vector<2x128xf32>
    %cst_119 = arith.constant 1.000000e+00 : f32
    %499 = vector.broadcast %cst_119 : f32 to vector<2x128xf32>
    %500 = arith.addf %499, %498 : vector<2x128xf32>
    %501 = arith.divf %499, %500 : vector<2x128xf32>
    %cst_120 = arith.constant 2.000000e+00 : f32
    %502 = vector.broadcast %cst_120 : f32 to vector<2x128xf32>
    %503 = arith.mulf %502, %501 : vector<2x128xf32>
    %cst_121 = arith.constant 1.000000e+00 : f32
    %504 = vector.broadcast %cst_121 : f32 to vector<2x128xf32>
    %505 = arith.subf %503, %504 : vector<2x128xf32>
    %506 = arith.select %27, %505, %501 : vector<2x128xi1>, vector<2x128xf32>
    %507 = vector.extract_strided_slice %506 {offsets = [0, 0], sizes = [2, 32], strides = [1, 1]} : vector<2x128xf32> to vector<2x32xf32>
    %508 = vector.extract_strided_slice %506 {offsets = [0, 32], sizes = [2, 32], strides = [1, 1]} : vector<2x128xf32> to vector<2x32xf32>
    %509 = vector.extract_strided_slice %506 {offsets = [0, 64], sizes = [2, 32], strides = [1, 1]} : vector<2x128xf32> to vector<2x32xf32>
    %510 = vector.extract_strided_slice %506 {offsets = [0, 96], sizes = [2, 32], strides = [1, 1]} : vector<2x128xf32> to vector<2x32xf32>
    %511 = arith.mulf %508, %420 : vector<2x32xf32>
    %512 = arith.mulf %507, %509 : vector<2x32xf32>
    %513 = arith.addf %511, %512 : vector<2x32xf32>
    %514 = math.tanh %513 : vector<2x32xf32>
    %515 = arith.mulf %510, %514 : vector<2x32xf32>
    %cst_122 = arith.constant dense<0.000000e+00> : vector<2x64xf32>
    %516 = tpu.matmul %515, %2, %cst_122 {dimension_numbers = #tpu.dot_dimension_numbers<[1], [0], [0], [1], [0, 0, 1, 1], [], []>} : vector<2x32xf32>, vector<32x64xf32>, vector<2x64xf32> -> vector<2x64xf32>
    %517 = vector.broadcast %10 : vector<1x64xf32> to vector<2x64xf32>
    %518 = arith.addf %516, %517 : vector<2x64xf32>
    %cst_123 = arith.constant dense<0.000000e+00> : vector<2x64xf32>
    %519 = tpu.matmul %446, %6, %cst_123 {dimension_numbers = #tpu.dot_dimension_numbers<[1], [0], [0], [1], [0, 0, 1, 1], [], []>} : vector<2x16xf32>, vector<16x64xf32>, vector<2x64xf32> -> vector<2x64xf32>
    %520 = arith.addf %425, %519 : vector<2x64xf32>
    %521 = arith.negf %520 : vector<2x64xf32>
    %522 = math.exp %521 : vector<2x64xf32>
    %cst_124 = arith.constant 1.000000e+00 : f32
    %523 = vector.broadcast %cst_124 : f32 to vector<2x64xf32>
    %524 = arith.addf %523, %522 : vector<2x64xf32>
    %525 = arith.divf %523, %524 : vector<2x64xf32>
    %cst_125 = arith.constant 2.000000e+00 : f32
    %526 = vector.broadcast %cst_125 : f32 to vector<2x64xf32>
    %527 = arith.mulf %526, %525 : vector<2x64xf32>
    %cst_126 = arith.constant 1.000000e+00 : f32
    %528 = vector.broadcast %cst_126 : f32 to vector<2x64xf32>
    %529 = arith.subf %527, %528 : vector<2x64xf32>
    %530 = arith.select %21, %529, %525 : vector<2x64xi1>, vector<2x64xf32>
    %531 = vector.extract_strided_slice %530 {offsets = [0, 0], sizes = [2, 16], strides = [1, 1]} : vector<2x64xf32> to vector<2x16xf32>
    %532 = vector.extract_strided_slice %530 {offsets = [0, 16], sizes = [2, 16], strides = [1, 1]} : vector<2x64xf32> to vector<2x16xf32>
    %533 = vector.extract_strided_slice %530 {offsets = [0, 32], sizes = [2, 16], strides = [1, 1]} : vector<2x64xf32> to vector<2x16xf32>
    %534 = vector.extract_strided_slice %530 {offsets = [0, 48], sizes = [2, 16], strides = [1, 1]} : vector<2x64xf32> to vector<2x16xf32>
    %535 = arith.mulf %532, %444 : vector<2x16xf32>
    %536 = arith.mulf %531, %533 : vector<2x16xf32>
    %537 = arith.addf %535, %536 : vector<2x16xf32>
    %538 = math.tanh %537 : vector<2x16xf32>
    %539 = arith.mulf %534, %538 : vector<2x16xf32>
    %cst_127 = arith.constant dense<0.000000e+00> : vector<2x64xf32>
    %540 = tpu.matmul %539, %3, %cst_127 {dimension_numbers = #tpu.dot_dimension_numbers<[1], [0], [0], [1], [0, 0, 1, 1], [], []>} : vector<2x16xf32>, vector<16x64xf32>, vector<2x64xf32> -> vector<2x64xf32>
    %541 = vector.broadcast %11 : vector<1x64xf32> to vector<2x64xf32>
    %542 = arith.addf %540, %541 : vector<2x64xf32>
    %cst_128 = arith.constant dense<0.000000e+00> : vector<2x64xf32>
    %543 = tpu.matmul %470, %7, %cst_128 {dimension_numbers = #tpu.dot_dimension_numbers<[1], [0], [0], [1], [0, 0, 1, 1], [], []>} : vector<2x16xf32>, vector<16x64xf32>, vector<2x64xf32> -> vector<2x64xf32>
    %544 = arith.addf %449, %543 : vector<2x64xf32>
    %545 = arith.negf %544 : vector<2x64xf32>
    %546 = math.exp %545 : vector<2x64xf32>
    %cst_129 = arith.constant 1.000000e+00 : f32
    %547 = vector.broadcast %cst_129 : f32 to vector<2x64xf32>
    %548 = arith.addf %547, %546 : vector<2x64xf32>
    %549 = arith.divf %547, %548 : vector<2x64xf32>
    %cst_130 = arith.constant 2.000000e+00 : f32
    %550 = vector.broadcast %cst_130 : f32 to vector<2x64xf32>
    %551 = arith.mulf %550, %549 : vector<2x64xf32>
    %cst_131 = arith.constant 1.000000e+00 : f32
    %552 = vector.broadcast %cst_131 : f32 to vector<2x64xf32>
    %553 = arith.subf %551, %552 : vector<2x64xf32>
    %554 = arith.select %21, %553, %549 : vector<2x64xi1>, vector<2x64xf32>
    %555 = vector.extract_strided_slice %554 {offsets = [0, 0], sizes = [2, 16], strides = [1, 1]} : vector<2x64xf32> to vector<2x16xf32>
    %556 = vector.extract_strided_slice %554 {offsets = [0, 16], sizes = [2, 16], strides = [1, 1]} : vector<2x64xf32> to vector<2x16xf32>
    %557 = vector.extract_strided_slice %554 {offsets = [0, 32], sizes = [2, 16], strides = [1, 1]} : vector<2x64xf32> to vector<2x16xf32>
    %558 = vector.extract_strided_slice %554 {offsets = [0, 48], sizes = [2, 16], strides = [1, 1]} : vector<2x64xf32> to vector<2x16xf32>
    %559 = arith.mulf %556, %468 : vector<2x16xf32>
    %560 = arith.mulf %555, %557 : vector<2x16xf32>
    %561 = arith.addf %559, %560 : vector<2x16xf32>
    %562 = math.tanh %561 : vector<2x16xf32>
    %563 = arith.mulf %558, %562 : vector<2x16xf32>
    %cst_132 = arith.constant dense<0.000000e+00> : vector<2x128xf32>
    %564 = tpu.matmul %491, %4, %cst_132 {dimension_numbers = #tpu.dot_dimension_numbers<[1], [0], [0], [1], [0, 0, 1, 1], [], []>} : vector<2x32xf32>, vector<32x128xf32>, vector<2x128xf32> -> vector<2x128xf32>
    %565 = arith.addf %39, %564 : vector<2x128xf32>
    %566 = arith.negf %565 : vector<2x128xf32>
    %567 = math.exp %566 : vector<2x128xf32>
    %cst_133 = arith.constant 1.000000e+00 : f32
    %568 = vector.broadcast %cst_133 : f32 to vector<2x128xf32>
    %569 = arith.addf %568, %567 : vector<2x128xf32>
    %570 = arith.divf %568, %569 : vector<2x128xf32>
    %cst_134 = arith.constant 2.000000e+00 : f32
    %571 = vector.broadcast %cst_134 : f32 to vector<2x128xf32>
    %572 = arith.mulf %571, %570 : vector<2x128xf32>
    %cst_135 = arith.constant 1.000000e+00 : f32
    %573 = vector.broadcast %cst_135 : f32 to vector<2x128xf32>
    %574 = arith.subf %572, %573 : vector<2x128xf32>
    %575 = arith.select %27, %574, %570 : vector<2x128xi1>, vector<2x128xf32>
    %576 = vector.extract_strided_slice %575 {offsets = [0, 0], sizes = [2, 32], strides = [1, 1]} : vector<2x128xf32> to vector<2x32xf32>
    %577 = vector.extract_strided_slice %575 {offsets = [0, 32], sizes = [2, 32], strides = [1, 1]} : vector<2x128xf32> to vector<2x32xf32>
    %578 = vector.extract_strided_slice %575 {offsets = [0, 64], sizes = [2, 32], strides = [1, 1]} : vector<2x128xf32> to vector<2x32xf32>
    %579 = vector.extract_strided_slice %575 {offsets = [0, 96], sizes = [2, 32], strides = [1, 1]} : vector<2x128xf32> to vector<2x32xf32>
    %580 = arith.mulf %577, %489 : vector<2x32xf32>
    %581 = arith.mulf %576, %578 : vector<2x32xf32>
    %582 = arith.addf %580, %581 : vector<2x32xf32>
    %583 = math.tanh %582 : vector<2x32xf32>
    %584 = arith.mulf %579, %583 : vector<2x32xf32>
    %cst_136 = arith.constant dense<0.000000e+00> : vector<2x128xf32>
    %585 = tpu.matmul %584, %1, %cst_136 {dimension_numbers = #tpu.dot_dimension_numbers<[1], [0], [0], [1], [0, 0, 1, 1], [], []>} : vector<2x32xf32>, vector<32x128xf32>, vector<2x128xf32> -> vector<2x128xf32>
    %586 = vector.broadcast %9 : vector<1x128xf32> to vector<2x128xf32>
    %587 = arith.addf %585, %586 : vector<2x128xf32>
    %cst_137 = arith.constant dense<0.000000e+00> : vector<2x128xf32>
    %588 = tpu.matmul %515, %5, %cst_137 {dimension_numbers = #tpu.dot_dimension_numbers<[1], [0], [0], [1], [0, 0, 1, 1], [], []>} : vector<2x32xf32>, vector<32x128xf32>, vector<2x128xf32> -> vector<2x128xf32>
    %589 = arith.addf %494, %588 : vector<2x128xf32>
    %590 = arith.negf %589 : vector<2x128xf32>
    %591 = math.exp %590 : vector<2x128xf32>
    %cst_138 = arith.constant 1.000000e+00 : f32
    %592 = vector.broadcast %cst_138 : f32 to vector<2x128xf32>
    %593 = arith.addf %592, %591 : vector<2x128xf32>
    %594 = arith.divf %592, %593 : vector<2x128xf32>
    %cst_139 = arith.constant 2.000000e+00 : f32
    %595 = vector.broadcast %cst_139 : f32 to vector<2x128xf32>
    %596 = arith.mulf %595, %594 : vector<2x128xf32>
    %cst_140 = arith.constant 1.000000e+00 : f32
    %597 = vector.broadcast %cst_140 : f32 to vector<2x128xf32>
    %598 = arith.subf %596, %597 : vector<2x128xf32>
    %599 = arith.select %27, %598, %594 : vector<2x128xi1>, vector<2x128xf32>
    %600 = vector.extract_strided_slice %599 {offsets = [0, 0], sizes = [2, 32], strides = [1, 1]} : vector<2x128xf32> to vector<2x32xf32>
    %601 = vector.extract_strided_slice %599 {offsets = [0, 32], sizes = [2, 32], strides = [1, 1]} : vector<2x128xf32> to vector<2x32xf32>
    %602 = vector.extract_strided_slice %599 {offsets = [0, 64], sizes = [2, 32], strides = [1, 1]} : vector<2x128xf32> to vector<2x32xf32>
    %603 = vector.extract_strided_slice %599 {offsets = [0, 96], sizes = [2, 32], strides = [1, 1]} : vector<2x128xf32> to vector<2x32xf32>
    %604 = arith.mulf %601, %513 : vector<2x32xf32>
    %605 = arith.mulf %600, %602 : vector<2x32xf32>
    %606 = arith.addf %604, %605 : vector<2x32xf32>
    %607 = math.tanh %606 : vector<2x32xf32>
    %608 = arith.mulf %603, %607 : vector<2x32xf32>
    %cst_141 = arith.constant dense<0.000000e+00> : vector<2x64xf32>
    %609 = tpu.matmul %608, %2, %cst_141 {dimension_numbers = #tpu.dot_dimension_numbers<[1], [0], [0], [1], [0, 0, 1, 1], [], []>} : vector<2x32xf32>, vector<32x64xf32>, vector<2x64xf32> -> vector<2x64xf32>
    %610 = vector.broadcast %10 : vector<1x64xf32> to vector<2x64xf32>
    %611 = arith.addf %609, %610 : vector<2x64xf32>
    %cst_142 = arith.constant dense<0.000000e+00> : vector<2x64xf32>
    %612 = tpu.matmul %539, %6, %cst_142 {dimension_numbers = #tpu.dot_dimension_numbers<[1], [0], [0], [1], [0, 0, 1, 1], [], []>} : vector<2x16xf32>, vector<16x64xf32>, vector<2x64xf32> -> vector<2x64xf32>
    %613 = arith.addf %518, %612 : vector<2x64xf32>
    %614 = arith.negf %613 : vector<2x64xf32>
    %615 = math.exp %614 : vector<2x64xf32>
    %cst_143 = arith.constant 1.000000e+00 : f32
    %616 = vector.broadcast %cst_143 : f32 to vector<2x64xf32>
    %617 = arith.addf %616, %615 : vector<2x64xf32>
    %618 = arith.divf %616, %617 : vector<2x64xf32>
    %cst_144 = arith.constant 2.000000e+00 : f32
    %619 = vector.broadcast %cst_144 : f32 to vector<2x64xf32>
    %620 = arith.mulf %619, %618 : vector<2x64xf32>
    %cst_145 = arith.constant 1.000000e+00 : f32
    %621 = vector.broadcast %cst_145 : f32 to vector<2x64xf32>
    %622 = arith.subf %620, %621 : vector<2x64xf32>
    %623 = arith.select %21, %622, %618 : vector<2x64xi1>, vector<2x64xf32>
    %624 = vector.extract_strided_slice %623 {offsets = [0, 0], sizes = [2, 16], strides = [1, 1]} : vector<2x64xf32> to vector<2x16xf32>
    %625 = vector.extract_strided_slice %623 {offsets = [0, 16], sizes = [2, 16], strides = [1, 1]} : vector<2x64xf32> to vector<2x16xf32>
    %626 = vector.extract_strided_slice %623 {offsets = [0, 32], sizes = [2, 16], strides = [1, 1]} : vector<2x64xf32> to vector<2x16xf32>
    %627 = vector.extract_strided_slice %623 {offsets = [0, 48], sizes = [2, 16], strides = [1, 1]} : vector<2x64xf32> to vector<2x16xf32>
    %628 = arith.mulf %625, %537 : vector<2x16xf32>
    %629 = arith.mulf %624, %626 : vector<2x16xf32>
    %630 = arith.addf %628, %629 : vector<2x16xf32>
    %631 = math.tanh %630 : vector<2x16xf32>
    %632 = arith.mulf %627, %631 : vector<2x16xf32>
    %cst_146 = arith.constant dense<0.000000e+00> : vector<2x64xf32>
    %633 = tpu.matmul %632, %3, %cst_146 {dimension_numbers = #tpu.dot_dimension_numbers<[1], [0], [0], [1], [0, 0, 1, 1], [], []>} : vector<2x16xf32>, vector<16x64xf32>, vector<2x64xf32> -> vector<2x64xf32>
    %634 = vector.broadcast %11 : vector<1x64xf32> to vector<2x64xf32>
    %635 = arith.addf %633, %634 : vector<2x64xf32>
    %cst_147 = arith.constant dense<0.000000e+00> : vector<2x64xf32>
    %636 = tpu.matmul %563, %7, %cst_147 {dimension_numbers = #tpu.dot_dimension_numbers<[1], [0], [0], [1], [0, 0, 1, 1], [], []>} : vector<2x16xf32>, vector<16x64xf32>, vector<2x64xf32> -> vector<2x64xf32>
    %637 = arith.addf %542, %636 : vector<2x64xf32>
    %638 = arith.negf %637 : vector<2x64xf32>
    %639 = math.exp %638 : vector<2x64xf32>
    %cst_148 = arith.constant 1.000000e+00 : f32
    %640 = vector.broadcast %cst_148 : f32 to vector<2x64xf32>
    %641 = arith.addf %640, %639 : vector<2x64xf32>
    %642 = arith.divf %640, %641 : vector<2x64xf32>
    %cst_149 = arith.constant 2.000000e+00 : f32
    %643 = vector.broadcast %cst_149 : f32 to vector<2x64xf32>
    %644 = arith.mulf %643, %642 : vector<2x64xf32>
    %cst_150 = arith.constant 1.000000e+00 : f32
    %645 = vector.broadcast %cst_150 : f32 to vector<2x64xf32>
    %646 = arith.subf %644, %645 : vector<2x64xf32>
    %647 = arith.select %21, %646, %642 : vector<2x64xi1>, vector<2x64xf32>
    %648 = vector.extract_strided_slice %647 {offsets = [0, 0], sizes = [2, 16], strides = [1, 1]} : vector<2x64xf32> to vector<2x16xf32>
    %649 = vector.extract_strided_slice %647 {offsets = [0, 16], sizes = [2, 16], strides = [1, 1]} : vector<2x64xf32> to vector<2x16xf32>
    %650 = vector.extract_strided_slice %647 {offsets = [0, 32], sizes = [2, 16], strides = [1, 1]} : vector<2x64xf32> to vector<2x16xf32>
    %651 = vector.extract_strided_slice %647 {offsets = [0, 48], sizes = [2, 16], strides = [1, 1]} : vector<2x64xf32> to vector<2x16xf32>
    %652 = arith.mulf %649, %561 : vector<2x16xf32>
    %653 = arith.mulf %648, %650 : vector<2x16xf32>
    %654 = arith.addf %652, %653 : vector<2x16xf32>
    %655 = math.tanh %654 : vector<2x16xf32>
    %656 = arith.mulf %651, %655 : vector<2x16xf32>
    %cst_151 = arith.constant dense<0.000000e+00> : vector<2x128xf32>
    %657 = tpu.matmul %608, %5, %cst_151 {dimension_numbers = #tpu.dot_dimension_numbers<[1], [0], [0], [1], [0, 0, 1, 1], [], []>} : vector<2x32xf32>, vector<32x128xf32>, vector<2x128xf32> -> vector<2x128xf32>
    %658 = arith.addf %587, %657 : vector<2x128xf32>
    %659 = arith.negf %658 : vector<2x128xf32>
    %660 = math.exp %659 : vector<2x128xf32>
    %cst_152 = arith.constant 1.000000e+00 : f32
    %661 = vector.broadcast %cst_152 : f32 to vector<2x128xf32>
    %662 = arith.addf %661, %660 : vector<2x128xf32>
    %663 = arith.divf %661, %662 : vector<2x128xf32>
    %cst_153 = arith.constant 2.000000e+00 : f32
    %664 = vector.broadcast %cst_153 : f32 to vector<2x128xf32>
    %665 = arith.mulf %664, %663 : vector<2x128xf32>
    %cst_154 = arith.constant 1.000000e+00 : f32
    %666 = vector.broadcast %cst_154 : f32 to vector<2x128xf32>
    %667 = arith.subf %665, %666 : vector<2x128xf32>
    %668 = arith.select %27, %667, %663 : vector<2x128xi1>, vector<2x128xf32>
    %669 = vector.extract_strided_slice %668 {offsets = [0, 0], sizes = [2, 32], strides = [1, 1]} : vector<2x128xf32> to vector<2x32xf32>
    %670 = vector.extract_strided_slice %668 {offsets = [0, 32], sizes = [2, 32], strides = [1, 1]} : vector<2x128xf32> to vector<2x32xf32>
    %671 = vector.extract_strided_slice %668 {offsets = [0, 64], sizes = [2, 32], strides = [1, 1]} : vector<2x128xf32> to vector<2x32xf32>
    %672 = vector.extract_strided_slice %668 {offsets = [0, 96], sizes = [2, 32], strides = [1, 1]} : vector<2x128xf32> to vector<2x32xf32>
    %673 = arith.mulf %670, %606 : vector<2x32xf32>
    %674 = arith.mulf %669, %671 : vector<2x32xf32>
    %675 = arith.addf %673, %674 : vector<2x32xf32>
    %676 = math.tanh %675 : vector<2x32xf32>
    %677 = arith.mulf %672, %676 : vector<2x32xf32>
    %cst_155 = arith.constant dense<0.000000e+00> : vector<2x64xf32>
    %678 = tpu.matmul %677, %2, %cst_155 {dimension_numbers = #tpu.dot_dimension_numbers<[1], [0], [0], [1], [0, 0, 1, 1], [], []>} : vector<2x32xf32>, vector<32x64xf32>, vector<2x64xf32> -> vector<2x64xf32>
    %679 = vector.broadcast %10 : vector<1x64xf32> to vector<2x64xf32>
    %680 = arith.addf %678, %679 : vector<2x64xf32>
    %cst_156 = arith.constant dense<0.000000e+00> : vector<2x64xf32>
    %681 = tpu.matmul %632, %6, %cst_156 {dimension_numbers = #tpu.dot_dimension_numbers<[1], [0], [0], [1], [0, 0, 1, 1], [], []>} : vector<2x16xf32>, vector<16x64xf32>, vector<2x64xf32> -> vector<2x64xf32>
    %682 = arith.addf %611, %681 : vector<2x64xf32>
    %683 = arith.negf %682 : vector<2x64xf32>
    %684 = math.exp %683 : vector<2x64xf32>
    %cst_157 = arith.constant 1.000000e+00 : f32
    %685 = vector.broadcast %cst_157 : f32 to vector<2x64xf32>
    %686 = arith.addf %685, %684 : vector<2x64xf32>
    %687 = arith.divf %685, %686 : vector<2x64xf32>
    %cst_158 = arith.constant 2.000000e+00 : f32
    %688 = vector.broadcast %cst_158 : f32 to vector<2x64xf32>
    %689 = arith.mulf %688, %687 : vector<2x64xf32>
    %cst_159 = arith.constant 1.000000e+00 : f32
    %690 = vector.broadcast %cst_159 : f32 to vector<2x64xf32>
    %691 = arith.subf %689, %690 : vector<2x64xf32>
    %692 = arith.select %21, %691, %687 : vector<2x64xi1>, vector<2x64xf32>
    %693 = vector.extract_strided_slice %692 {offsets = [0, 0], sizes = [2, 16], strides = [1, 1]} : vector<2x64xf32> to vector<2x16xf32>
    %694 = vector.extract_strided_slice %692 {offsets = [0, 16], sizes = [2, 16], strides = [1, 1]} : vector<2x64xf32> to vector<2x16xf32>
    %695 = vector.extract_strided_slice %692 {offsets = [0, 32], sizes = [2, 16], strides = [1, 1]} : vector<2x64xf32> to vector<2x16xf32>
    %696 = vector.extract_strided_slice %692 {offsets = [0, 48], sizes = [2, 16], strides = [1, 1]} : vector<2x64xf32> to vector<2x16xf32>
    %697 = arith.mulf %694, %630 : vector<2x16xf32>
    %698 = arith.mulf %693, %695 : vector<2x16xf32>
    %699 = arith.addf %697, %698 : vector<2x16xf32>
    %700 = math.tanh %699 : vector<2x16xf32>
    %701 = arith.mulf %696, %700 : vector<2x16xf32>
    %cst_160 = arith.constant dense<0.000000e+00> : vector<2x64xf32>
    %702 = tpu.matmul %701, %3, %cst_160 {dimension_numbers = #tpu.dot_dimension_numbers<[1], [0], [0], [1], [0, 0, 1, 1], [], []>} : vector<2x16xf32>, vector<16x64xf32>, vector<2x64xf32> -> vector<2x64xf32>
    %703 = vector.broadcast %11 : vector<1x64xf32> to vector<2x64xf32>
    %704 = arith.addf %702, %703 : vector<2x64xf32>
    %cst_161 = arith.constant dense<0.000000e+00> : vector<2x64xf32>
    %705 = tpu.matmul %656, %7, %cst_161 {dimension_numbers = #tpu.dot_dimension_numbers<[1], [0], [0], [1], [0, 0, 1, 1], [], []>} : vector<2x16xf32>, vector<16x64xf32>, vector<2x64xf32> -> vector<2x64xf32>
    %706 = arith.addf %635, %705 : vector<2x64xf32>
    %707 = arith.negf %706 : vector<2x64xf32>
    %708 = math.exp %707 : vector<2x64xf32>
    %cst_162 = arith.constant 1.000000e+00 : f32
    %709 = vector.broadcast %cst_162 : f32 to vector<2x64xf32>
    %710 = arith.addf %709, %708 : vector<2x64xf32>
    %711 = arith.divf %709, %710 : vector<2x64xf32>
    %cst_163 = arith.constant 2.000000e+00 : f32
    %712 = vector.broadcast %cst_163 : f32 to vector<2x64xf32>
    %713 = arith.mulf %712, %711 : vector<2x64xf32>
    %cst_164 = arith.constant 1.000000e+00 : f32
    %714 = vector.broadcast %cst_164 : f32 to vector<2x64xf32>
    %715 = arith.subf %713, %714 : vector<2x64xf32>
    %716 = arith.select %21, %715, %711 : vector<2x64xi1>, vector<2x64xf32>
    %717 = vector.extract_strided_slice %716 {offsets = [0, 0], sizes = [2, 16], strides = [1, 1]} : vector<2x64xf32> to vector<2x16xf32>
    %718 = vector.extract_strided_slice %716 {offsets = [0, 16], sizes = [2, 16], strides = [1, 1]} : vector<2x64xf32> to vector<2x16xf32>
    %719 = vector.extract_strided_slice %716 {offsets = [0, 32], sizes = [2, 16], strides = [1, 1]} : vector<2x64xf32> to vector<2x16xf32>
    %720 = vector.extract_strided_slice %716 {offsets = [0, 48], sizes = [2, 16], strides = [1, 1]} : vector<2x64xf32> to vector<2x16xf32>
    %721 = arith.mulf %718, %654 : vector<2x16xf32>
    %722 = arith.mulf %717, %719 : vector<2x16xf32>
    %723 = arith.addf %721, %722 : vector<2x16xf32>
    %724 = math.tanh %723 : vector<2x16xf32>
    %725 = arith.mulf %720, %724 : vector<2x16xf32>
    %cst_165 = arith.constant dense<0.000000e+00> : vector<2x64xf32>
    %726 = tpu.matmul %701, %6, %cst_165 {dimension_numbers = #tpu.dot_dimension_numbers<[1], [0], [0], [1], [0, 0, 1, 1], [], []>} : vector<2x16xf32>, vector<16x64xf32>, vector<2x64xf32> -> vector<2x64xf32>
    %727 = arith.addf %680, %726 : vector<2x64xf32>
    %728 = arith.negf %727 : vector<2x64xf32>
    %729 = math.exp %728 : vector<2x64xf32>
    %cst_166 = arith.constant 1.000000e+00 : f32
    %730 = vector.broadcast %cst_166 : f32 to vector<2x64xf32>
    %731 = arith.addf %730, %729 : vector<2x64xf32>
    %732 = arith.divf %730, %731 : vector<2x64xf32>
    %cst_167 = arith.constant 2.000000e+00 : f32
    %733 = vector.broadcast %cst_167 : f32 to vector<2x64xf32>
    %734 = arith.mulf %733, %732 : vector<2x64xf32>
    %cst_168 = arith.constant 1.000000e+00 : f32
    %735 = vector.broadcast %cst_168 : f32 to vector<2x64xf32>
    %736 = arith.subf %734, %735 : vector<2x64xf32>
    %737 = arith.select %21, %736, %732 : vector<2x64xi1>, vector<2x64xf32>
    %738 = vector.extract_strided_slice %737 {offsets = [0, 0], sizes = [2, 16], strides = [1, 1]} : vector<2x64xf32> to vector<2x16xf32>
    %739 = vector.extract_strided_slice %737 {offsets = [0, 16], sizes = [2, 16], strides = [1, 1]} : vector<2x64xf32> to vector<2x16xf32>
    %740 = vector.extract_strided_slice %737 {offsets = [0, 32], sizes = [2, 16], strides = [1, 1]} : vector<2x64xf32> to vector<2x16xf32>
    %741 = vector.extract_strided_slice %737 {offsets = [0, 48], sizes = [2, 16], strides = [1, 1]} : vector<2x64xf32> to vector<2x16xf32>
    %742 = arith.mulf %739, %699 : vector<2x16xf32>
    %743 = arith.mulf %738, %740 : vector<2x16xf32>
    %744 = arith.addf %742, %743 : vector<2x16xf32>
    %745 = math.tanh %744 : vector<2x16xf32>
    %746 = arith.mulf %741, %745 : vector<2x16xf32>
    %cst_169 = arith.constant dense<0.000000e+00> : vector<2x64xf32>
    %747 = tpu.matmul %746, %3, %cst_169 {dimension_numbers = #tpu.dot_dimension_numbers<[1], [0], [0], [1], [0, 0, 1, 1], [], []>} : vector<2x16xf32>, vector<16x64xf32>, vector<2x64xf32> -> vector<2x64xf32>
    %748 = vector.broadcast %11 : vector<1x64xf32> to vector<2x64xf32>
    %749 = arith.addf %747, %748 : vector<2x64xf32>
    %cst_170 = arith.constant dense<0.000000e+00> : vector<2x64xf32>
    %750 = tpu.matmul %725, %7, %cst_170 {dimension_numbers = #tpu.dot_dimension_numbers<[1], [0], [0], [1], [0, 0, 1, 1], [], []>} : vector<2x16xf32>, vector<16x64xf32>, vector<2x64xf32> -> vector<2x64xf32>
    %751 = arith.addf %704, %750 : vector<2x64xf32>
    %752 = arith.negf %751 : vector<2x64xf32>
    %753 = math.exp %752 : vector<2x64xf32>
    %cst_171 = arith.constant 1.000000e+00 : f32
    %754 = vector.broadcast %cst_171 : f32 to vector<2x64xf32>
    %755 = arith.addf %754, %753 : vector<2x64xf32>
    %756 = arith.divf %754, %755 : vector<2x64xf32>
    %cst_172 = arith.constant 2.000000e+00 : f32
    %757 = vector.broadcast %cst_172 : f32 to vector<2x64xf32>
    %758 = arith.mulf %757, %756 : vector<2x64xf32>
    %cst_173 = arith.constant 1.000000e+00 : f32
    %759 = vector.broadcast %cst_173 : f32 to vector<2x64xf32>
    %760 = arith.subf %758, %759 : vector<2x64xf32>
    %761 = arith.select %21, %760, %756 : vector<2x64xi1>, vector<2x64xf32>
    %762 = vector.extract_strided_slice %761 {offsets = [0, 0], sizes = [2, 16], strides = [1, 1]} : vector<2x64xf32> to vector<2x16xf32>
    %763 = vector.extract_strided_slice %761 {offsets = [0, 16], sizes = [2, 16], strides = [1, 1]} : vector<2x64xf32> to vector<2x16xf32>
    %764 = vector.extract_strided_slice %761 {offsets = [0, 32], sizes = [2, 16], strides = [1, 1]} : vector<2x64xf32> to vector<2x16xf32>
    %765 = vector.extract_strided_slice %761 {offsets = [0, 48], sizes = [2, 16], strides = [1, 1]} : vector<2x64xf32> to vector<2x16xf32>
    %766 = arith.mulf %763, %723 : vector<2x16xf32>
    %767 = arith.mulf %762, %764 : vector<2x16xf32>
    %768 = arith.addf %766, %767 : vector<2x16xf32>
    %769 = math.tanh %768 : vector<2x16xf32>
    %770 = arith.mulf %765, %769 : vector<2x16xf32>
    %cst_174 = arith.constant dense<0.000000e+00> : vector<2x64xf32>
    %771 = tpu.matmul %770, %7, %cst_174 {dimension_numbers = #tpu.dot_dimension_numbers<[1], [0], [0], [1], [0, 0, 1, 1], [], []>} : vector<2x16xf32>, vector<16x64xf32>, vector<2x64xf32> -> vector<2x64xf32>
    %772 = arith.addf %749, %771 : vector<2x64xf32>
    %773 = arith.negf %772 : vector<2x64xf32>
    %774 = math.exp %773 : vector<2x64xf32>
    %cst_175 = arith.constant 1.000000e+00 : f32
    %775 = vector.broadcast %cst_175 : f32 to vector<2x64xf32>
    %776 = arith.addf %775, %774 : vector<2x64xf32>
    %777 = arith.divf %775, %776 : vector<2x64xf32>
    %cst_176 = arith.constant 2.000000e+00 : f32
    %778 = vector.broadcast %cst_176 : f32 to vector<2x64xf32>
    %779 = arith.mulf %778, %777 : vector<2x64xf32>
    %cst_177 = arith.constant 1.000000e+00 : f32
    %780 = vector.broadcast %cst_177 : f32 to vector<2x64xf32>
    %781 = arith.subf %779, %780 : vector<2x64xf32>
    %782 = arith.select %21, %781, %777 : vector<2x64xi1>, vector<2x64xf32>
    %783 = vector.extract_strided_slice %782 {offsets = [0, 0], sizes = [2, 16], strides = [1, 1]} : vector<2x64xf32> to vector<2x16xf32>
    %784 = vector.extract_strided_slice %782 {offsets = [0, 16], sizes = [2, 16], strides = [1, 1]} : vector<2x64xf32> to vector<2x16xf32>
    %785 = vector.extract_strided_slice %782 {offsets = [0, 32], sizes = [2, 16], strides = [1, 1]} : vector<2x64xf32> to vector<2x16xf32>
    %786 = vector.extract_strided_slice %782 {offsets = [0, 48], sizes = [2, 16], strides = [1, 1]} : vector<2x64xf32> to vector<2x16xf32>
    %787 = arith.mulf %784, %768 : vector<2x16xf32>
    %788 = arith.mulf %783, %785 : vector<2x16xf32>
    %789 = arith.addf %787, %788 : vector<2x16xf32>
    %790 = math.tanh %789 : vector<2x16xf32>
    %791 = arith.mulf %786, %790 : vector<2x16xf32>
    %cst_178 = arith.constant dense<0.000000e+00> : vector<2x8xf32>
    %792 = tpu.matmul %791, %12, %cst_178 {dimension_numbers = #tpu.dot_dimension_numbers<[1], [0], [0], [1], [0, 0, 1, 1], [], []>} : vector<2x16xf32>, vector<16x8xf32>, vector<2x8xf32> -> vector<2x8xf32>
    %793 = vector.broadcast %13 : vector<1x8xf32> to vector<2x8xf32>
    %794 = arith.addf %792, %793 : vector<2x8xf32>
    %cst_179 = arith.constant 0.000000e+00 : f32
    %795 = vector.broadcast %cst_179 : f32 to vector<2x8xf32>
    %796 = arith.maximumf %794, %795 : vector<2x8xf32>
    %cst_180 = arith.constant dense<0.000000e+00> : vector<2x4xf32>
    %797 = tpu.matmul %796, %14, %cst_180 {dimension_numbers = #tpu.dot_dimension_numbers<[1], [0], [0], [1], [0, 0, 1, 1], [], []>} : vector<2x8xf32>, vector<8x4xf32>, vector<2x4xf32> -> vector<2x4xf32>
    %798 = vector.broadcast %15 : vector<1x4xf32> to vector<2x4xf32>
    %799 = arith.addf %797, %798 : vector<2x4xf32>
    %c0_181 = arith.constant 0 : index
    %c0_182 = arith.constant 0 : index
    %800 = vector.load %arg2[%c0_181, %c0_182] : memref<2x4xf32, #tpu.memory_space<vmem>>, vector<2x4xf32>
    tpu.vector_store %arg2[%c0_181, %c0_182], %799 {strides = array<i32>} : memref<2x4xf32, #tpu.memory_space<vmem>>, vector<2x4xf32>,
    return
  }
}

</mosaic_0001>

<bundles_post_ra>
// kernel: tpu_custom_call.1
= control target key start
LH: loop header
LB: loop body
LE: loop exit
PB: predicated region body
PF: predicated region fallthrough
CT: control target
= control target key end

     0   :  { %7 = vsyncpa [#allocation3], 0  ;;  %s7750_s0 = inlined_call_operand.vmem [shape: f32[64,4], index: 0, kind: input, shape index: {}]   ;;  %s7751_s1 = inlined_call_operand.hbm [shape: f32[256,128], index: 1, kind: input, shape index: {}]   ;;  %s7752_s2 = inlined_call_operand.hbm [shape: f32[2,4], index: 2, kind: output, shape index: {}]  }
   0x1   :  { %8 = vsyncpa [#allocation4], 0  ;;  %s6865_s9 = smov [#allocation2]   ;;  %s6817_s13 = scalar_lea.hbm %s7751_s1, 4096 }
   0x2   :  { %s16_s10 = sshll.u32 %s6865_s9, 4  ;;  %p6818_p0 = scmp.ne.s32.totalorder %s7751_s1, %s6817_s13  ;;  %s17_s10 = int_to_ptr.vmem [resolvable:$true] %s16_s10 }
   0x3   :  { %p6821_p1 = scmp.lt.u32.totalorder %s6817_s13, %s7751_s1 }
   0x5   :  { %p6823_p2 = pnand %p6821_p1, %p6818_p0 }
   0x7   :  { %6826 = shalt.err (!%p6823_p2)
}
   0x8   :  { %s6827_s18 = scalar_lea.vmem %s17_s10, 4096  ;;  %p6832_p4 = scmp.lt.s32.totalorder %s17_s10, %s17_s10 }
   0x9   :  { %p6828_p3 = scmp.ne.s32.totalorder %s17_s10, %s6827_s18  ;;  %p6833_p5 = scmp.lt.s32.totalorder %s6827_s18, %s6827_s18 }
   0xb   :  { %p6834_p6 = por %p6833_p5, %p6832_p4 }
   0xd   :  { %p6835_p7 = pnand %p6834_p6, %p6828_p3 }
   0xf   :  { %6838 = shalt.err (!%p6835_p7)
}
  0x10   :  { %s6866_s19 = smov 128   ;;  %s6867_s20 = smov 8  }
  0x11   :  { %22 = dma.hbm_to_vmem [thread:$0]  %s7751_s1, 4096, %s17_s10, [#allocation3], %s6866_s19, %s6866_s19, %s6867_s20  }
  0x12   :  { %6861 = dma.done.wait [#allocation3], 4096  }
  0x13   :  { %6862 = vsyncadd [#allocation3], 4294963200  ;;  %v6868_v0 = vmov 0.0|0.0   ;;  %vm6869_vm0 = vmmov 0   ;;  %v6870_v1 = vmov 0.0   ;;  %vm103_vm1 = vcmask 1043456  }
  0x14   :  { %6270 = vmatprep.subr.bf16.mxu1 %v6868_v0  ;;  %5746 = vmatprep.mubr.msk.f32.mxu1 %vm6869_vm0, %v6870_v1  ;;  %vm78_vm2 = vcmask 31744   ;;  %v37_v2 = vld [vmem:[#allocation2 + $0x8] sm:$0xff]  ;;  %v38_v3 = vld [vmem:[#allocation2 + $0x10] sm:$0xff]  ;;  %v26_v4 = vld [vmem:[#allocation2] sm:$0xf]  ;;  %v58_v21 = vlaneseq  ;;  %s6871_s26 = smov 64  }
  0x15   :  { %v6907_v5 = vpack.c.bf16 %v38_v3, %v37_v2  ;;  %5724 = vmatprep.subr.msk.mxu0 %vm103_vm1, %v26_v4  ;;  %v66_v6 = vld [vmem:[%s7750_s0] sm:$0xff]  ;;  %v67_v7 = vld [vmem:[%s7750_s0 + $0x8] sm:$0xff]  ;;  %v39_v8 = vld [vmem:[#allocation2 + $0x18] sm:$0xff]  ;;  %s6872_s27 = smov 32   ;;  %vm212_vm6 = vcmask 261120   ;;  %s6874_s12 = smov 16  }
  0x16   :  { %5725 = vmatpush3.msk.msra.mxu0 %vm103_vm1, %v26_v4  ;;  %5726 = vmatprep.mubr.msk.f32.mxu0 %vm78_vm2, %v66_v6  ;;  %v40_v9 = vld [vmem:[#allocation2 + $0x20] sm:$0xff]  ;;  %v6933_v12 = vld [vmem:[#allocation2 + $0x28] ss:$0 sm:$0xff]  ;;  %v6936_v22 = vand.u32 127, %v58_v21  ;;  %v68_v33 = vld [vmem:[%s7750_s0 + $0x10] sm:$0xff]  ;;  %s6875_s13 = smov 80  }
  0x17   :  { %6272 = vmatpush3.bf16.msra.mxu1 %v6907_v5  ;;  %5727 = vmatmul.mubr.msk.f32.vlgmr.msra.gmra.mrb[0].mxu0 %vm78_vm2, %v67_v7  ;;  %v6918_v10 = vpack.c.bf16 %v40_v9, %v39_v8  ;;  %v69_v34 = vld [vmem:[%s7750_s0 + $0x18] sm:$0xff]  ;;  %v70_v35 = vld [vmem:[%s7750_s0 + $0x20] sm:$0xff]  ;;  %v27_v36 = vld [vmem:[#allocation2 + $0x30] sm:$0xff]  ;;  %vm1084_vm10 = vcmask 130048   ;;  %vm5254_vm11 = vcmask 64512   ;;  %s6876_s14 = smov [#allocation5]  }
  0x18   :  { %6273 = vmatprep.subr.bf16.mxu1 %v6868_v0  ;;  %6282 = vmatprep.subr.bf16.mxu0 %v6868_v0  ;;  %vm63_vm3 = vcmp.ge.s32.totalorder %v6936_v22, 64  ;;  %vm64_vm4 = vcmp.lt.s32.totalorder %v6936_v22, 96  ;;  %v28_v37 = vld [vmem:[#allocation2 + $0x38] sm:$0xff]  ;;  %v29_v39 = vld [vmem:[#allocation2 + $0x40] sm:$0xff]  ;;  %v71_v40 = vld [vmem:[%s7750_s0 + $0x28] sm:$0xff]  ;;  %vm60_vm7 = vcmp.ge.s32.totalorder %v6936_v22, 32 }
  0x19   :  { %6284 = vmatpush3.bf16.msra.mxu0 %v6907_v5  ;;  %vm6940_vm5 = vmand %vm63_vm3, %vm64_vm4  ;;  %5729 = vmatprep.mubr.msk.f32.mxu0 %vm78_vm2, %v68_v33  ;;  %v6962_v38 = vpack.c.bf16 %v28_v37, %v27_v36  ;;  %v30_v41 = vld [vmem:[#allocation2 + $0x48] sm:$0xff]  ;;  %v72_v42 = vld [vmem:[%s7750_s0 + $0x30] sm:$0xff]  ;;  %vm61_vm8 = vcmp.lt.s32.totalorder %v6936_v22, 48  ;;  %s5336_s15 = sshll.u32 %s6876_s14, 4  ;;  %vm5328_vm12 = vcmask 25600   ;;  %s5337_s15 = int_to_ptr.vmem [resolvable:$true] %s5336_s15 }
  0x1a   :  { %6285 = vmatprep.subr.bf16.mxu0 %v6868_v0  ;;  %v6972_v43 = vpack.c.bf16 %v30_v41, %v29_v39  ;;  %v73_v44 = vld [vmem:[%s7750_s0 + $0x38] sm:$0xff]  ;;  %vm7144_vm9 = vmand %vm60_vm7, %vm61_vm8  ;;  %s6873_s0 = smov 96   ;;  %s6839_s16 = scalar_lea.vmem %s5337_s15, 32 }
  0x1b   :  { %6275 = vmatpush3.bf16.msra.mxu1 %v6918_v10  ;;  %5730 = vmatmul.mubr.msk.f32.gmra.mrb[2].mxu0 %vm78_vm2, %v69_v34  ;;  %v31_v41 = vld [vmem:[#allocation2 + $0x78] sm:$0xff]  ;;  %p6840_p8 = scmp.ne.s32.totalorder %s5337_s15, %s6839_s16  ;;  %p6844_p9 = scmp.lt.s32.totalorder %s5337_s15, %s5337_s15 }
  0x1c   :  { %6276 = vmatprep.subr.bf16.mxu1 %v6868_v0  ;;  %5732 = vmatprep.mubr.msk.f32.mxu0 %vm78_vm2, %v70_v35  ;;  %p6845_p10 = scmp.lt.s32.totalorder %s6839_s16, %s6839_s16 }
  0x1d   :  { %6287 = vmatpush3.bf16.msra.mxu0 %v6918_v10 }
  0x1e   :  { %5747 = vmatmul.mubr.f32.vlgmr.msra.gmra.mrb[0].mxu1 %v6870_v1  ;;  %6300 = vmatprep.subr.bf16.mxu0 %v6868_v0  ;;  %p6846_p11 = por %p6845_p10, %p6844_p9 }
  0x1f   :  { %5757 = vmatprep.mubr.msk.f32.mxu1 %vm6869_vm0, %v6870_v1  ;;  %6278 = vmatpush3.bf16.msra.mxu1 %v6962_v38 }
  0x20   :  { %6279 = vmatprep.subr.bf16.mxu1 %v6868_v0  ;;  %5733 = vmatmul.mubr.msk.f32.gmra.mrb[4].mxu0 %vm78_vm2, %v71_v40  ;;  %p6847_p12 = pnand %p6846_p11, %p6840_p8 }
  0x21   :  { %5735 = vmatprep.mubr.msk.f32.mxu0 %vm78_vm2, %v72_v42  ;;  %v32_v42 = vld [vmem:[#allocation2 + $0x80] sm:$0xff] }
  0x23   :  { %6281 = vmatpush3.bf16.msra.mxu1 %v6972_v43 }
  0x24   :  { %6288 = vmatprep.subr.bf16.mxu1 %v6868_v0  ;;  %5736 = vmatmul.mubr.msk.f32.gmra.mrb[6].mxu0 %vm78_vm2, %v73_v44  ;;  %v33_v44 = vld [vmem:[#allocation2 + $0x88] sm:$0xff] }
  0x25   :  { %5768 = vmatprep.mubr.msk.f32.mxu0 %vm6869_vm0, %v6870_v1 }
  0xea   :  { %v6931_v11 = vpop.f32.mrb[0].mxu0 }
  0xeb   :  { %v173_v13 = vpop.f32.mrb[1].mxu0  ;;  %v179_v55 = vadd.f32 %v6931_v11, %v6933_v12 }
  0xec   :  { %v174_v14 = vadd.f32 %v6933_v12, %v173_v13 }
  0xee   :  { %v6987_v48 = vpop.f32.mrb[2].mxu0 }
  0xef   :  { %v6989_v49 = vpop.f32.mrb[3].mxu0 }
  0xf1   :  { %v282_v15 = vpop.f32.mrb[0].mxu1 }
  0xf2   :  { %v286_v16 = vadd.f32 %v282_v15, %v174_v14  ;;  %v5748_v17 = vpop.f32.mrb[1].mxu1  ;;  %v41_v15 = vld [vmem:[#allocation2 + $0x50] sm:$0xff] }
  0xf3   :  { %v6991_v50 = vpop.f32.mrb[4].mxu0 }
  0xf4   :  { %v5355_v18 = vmul.f32 -1.442695, %v286_v16  ;;  %v6993_v51 = vpop.f32.mrb[5].mxu0  ;;  %v42_v16 = vld [vmem:[#allocation2 + $0x58] sm:$0xff] }
  0xf5   :  { %v7021_v17 = vpack.c.bf16 %v42_v16, %v41_v15 }
  0xf6   :  { %6621 = vpow2.f32 %v5355_v18  ;;  %v43_v18 = vld [vmem:[#allocation2 + $0x60] sm:$0xff] }
  0xf7   :  { %v6995_v52 = vpop.f32.mrb[6].mxu0 }
  0xf8   :  { %v6997_v53 = vpop.f32.mrb[7].mxu0 }
 0x100   :  { %v6622_v19 = vpop.eup %6621 }
 0x101   :  { %v290_v20 = vadd.f32 1.0, %v6622_v19  ;;  %v44_v19 = vld [vmem:[#allocation2 + $0x68] sm:$0xff] }
 0x102   :  { %v7025_v21 = vpack.c.bf16 %v44_v19, %v43_v18 }
 0x103   :  { %6623 = vrcp.f32 %v290_v20 }
 0x10d   :  { %v6624_v23 = vpop.eup %6623 }
 0x10e   :  { %v293_v24 = vmul.f32 2.0, %v6624_v23 }
 0x110   :  { %v5356_v26 = vadd.f32 -1.0, %v293_v24 }
 0x112   :  { %v295_v27 = vsel %vm6940_vm5, %v5356_v26, %v6624_v23  ;;  %v7039_v23 = vld [vmem:[#allocation2 + $0x70] ss:$0 sm:$0xff] }
 0x113   :  { %298 = vrot.lane.b32.xlu0 %v295_v27, %s6871_s26  ;;  %v296_v30 = vmul.f32 0.0, %v295_v27 }
 0x185   :  { %v299_v28 = vpop.permute.xlu0 %298 }
 0x186   :  { %v301_v29 = vmul.f32 %v299_v28, %v295_v27 }
 0x188   :  { %303 = vrot.lane.b32.xlu0 %v301_v29, %s6872_s27 }
 0x1fa   :  { %v304_v31 = vpop.permute.xlu0 %303 }
 0x1fb   :  { %v6948_v32 = vadd.f32 %v304_v31, %v296_v30 }
 0x1fd   :  { %6625 = vtanh.f32 %v6948_v32 }
 0x207   :  { %v6626_v45 = vpop.eup %6625 }
 0x208   :  { %309 = vrot.lane.b32.xlu1 %v6626_v45, %s6871_s26  ;;  %v7049_v45 = vpack.c.bf16 %v32_v42, %v31_v41 }
 0x27a   :  { %v310_v46 = vpop.permute.xlu1 %309 }
 0x27b   :  { %v312_v47 = vmul.f32 %v310_v46, %v295_v27  ;;  %v34_v46 = vld [vmem:[#allocation2 + $0x90] sm:$0xff] }
 0x27d   :  { %318 = vrot.lane.b32.xlu1 %v312_v47, %s6872_s27  ;;  %v7052_v47 = vpack.c.bf16 %v34_v46, %v33_v44 }
 0x2ef   :  { %v319_v54 = vpop.permute.xlu1 %318 }
 0x2f0   :  { %5758 = vmatmul.mubr.msk.f32.vlgmr.msra.gmra.mrb[2].mxu1 %vm212_vm6, %v319_v54  ;;  %5769 = vmatmul.mubr.msk.f32.vlgmr.msra.gmra.mrb[8].mxu0 %vm212_vm6, %v319_v54 }
 0x2f1   :  { %6290 = vmatpush3.bf16.msra.mxu1 %v6962_v38  ;;  %5779 = vmatprep.mubr.msk.f32.mxu1 %vm6869_vm0, %v6870_v1 }
 0x2f2   :  { %6291 = vmatprep.subr.bf16.mxu1 %v6868_v0  ;;  %5801 = vmatprep.mubr.msk.f32.mxu0 %vm6869_vm0, %v6870_v1 }
 0x2f3   :  { %6302 = vmatpush3.bf16.msra.mxu0 %v7049_v45 }
 0x2f4   :  { %6303 = vmatprep.subr.bf16.mxu0 %v6868_v0 }
 0x2f5   :  { %6293 = vmatpush3.bf16.msra.mxu1 %v6972_v43 }
 0x2f6   :  { %6294 = vmatprep.subr.bf16.mxu1 %v6868_v0 }
 0x2f7   :  { %6305 = vmatpush3.bf16.msra.mxu0 %v7052_v47 }
 0x2f8   :  { %6306 = vmatprep.subr.bf16.mxu0 %v6868_v0 }
 0x3c3   :  { %v458_v56 = vpop.f32.mrb[8].mxu0 }
 0x3c4   :  { %v462_v57 = vadd.f32 %v458_v56, %v179_v55  ;;  %v5770_v58 = vpop.f32.mrb[9].mxu0 }
 0x3c5   :  { %v184_v58 = vadd.f32 %v6933_v12, %v6989_v49 }
 0x3c6   :  { %v5360_v59 = vmul.f32 -1.442695, %v462_v57 }
 0x3c8   :  { %6627 = vpow2.f32 %v5360_v59 }
 0x3d2   :  { %v6628_v60 = vpop.eup %6627 }
 0x3d3   :  { %v466_v61 = vadd.f32 1.0, %v6628_v60 }
 0x3d5   :  { %6629 = vrcp.f32 %v466_v61 }
 0x3df   :  { %v6630_v62 = vpop.eup %6629 }
 0x3e0   :  { %v469_v63 = vmul.f32 2.0, %v6630_v62 }
 0x3e2   :  { %v5361_v2 = vadd.f32 -1.0, %v469_v63 }
 0x3e4   :  { %v471_v3 = vsel %vm6940_vm5, %v5361_v2, %v6630_v62 }
 0x3e5   :  { %474 = vrot.lane.b32.xlu0 %v471_v3, %s6871_s26  ;;  %v472_v7 = vmul.f32 %v471_v3, %v6948_v32 }
 0x457   :  { %v475_v4 = vpop.permute.xlu0 %474 }
 0x458   :  { %v477_v6 = vmul.f32 %v475_v4, %v471_v3 }
 0x45a   :  { %479 = vrot.lane.b32.xlu1 %v477_v6, %s6872_s27 }
 0x4cc   :  { %v480_v8 = vpop.permute.xlu1 %479 }
 0x4cd   :  { %v7016_v9 = vadd.f32 %v480_v8, %v472_v7 }
 0x4cf   :  { %6631 = vtanh.f32 %v7016_v9 }
 0x4d9   :  { %v6632_v11 = vpop.eup %6631 }
 0x4da   :  { %485 = vrot.lane.b32.xlu0 %v6632_v11, %s6871_s26 }
 0x54c   :  { %v486_v13 = vpop.permute.xlu0 %485 }
 0x54d   :  { %v488_v14 = vmul.f32 %v486_v13, %v471_v3 }
 0x54f   :  { %490 = vrot.lane.b32.xlu1 %v488_v14, %s6872_s27 }
 0x5c1   :  { %v491_v20 = vpop.permute.xlu1 %490 }
 0x5c2   :  { %5780 = vmatmul.mubr.msk.f32.vlgmr.msra.gmra.mrb[4].mxu1 %vm212_vm6, %v491_v20 }
 0x5c3   :  { %6296 = vmatpush3.bf16.msra.mxu1 %v7021_v17  ;;  %5790 = vmatprep.mubr.msk.f32.mxu1 %vm6869_vm0, %v6870_v1 }
 0x5c4   :  { %6297 = vmatprep.subr.bf16.mxu1 %v6868_v0 }
 0x5c7   :  { %6299 = vmatpush3.bf16.msra.mxu1 %v7025_v21 }
 0x5c8   :  { %6312 = vmatprep.subr.bf16.mxu1 %v6868_v0 }
 0x5ca   :  { %5791 = vmatmul.mubr.f32.vlgmr.msra.gmra.mrb[2].mxu1 %v6870_v1 }
 0x5cb   :  { %6314 = vmatpush3.bf16.msra.mxu1 %v6962_v38  ;;  %5823 = vmatprep.mubr.msk.f32.mxu1 %vm6869_vm0, %v6870_v1 }
 0x5cc   :  { %6315 = vmatprep.subr.bf16.mxu1 %v6868_v0 }
 0x5cf   :  { %6317 = vmatpush3.bf16.msra.mxu1 %v6972_v43 }
 0x5d0   :  { %6318 = vmatprep.subr.bf16.mxu1 %v6868_v0 }
 0x69d   :  { %v630_v24 = vpop.f32.mrb[2].mxu1 }
 0x69e   :  { %v6537_v26 = vadd.f32 %v7039_v23, %v630_v24  ;;  %v5792_v27 = vpop.f32.mrb[3].mxu1 }
 0x69f   :  { %v189_v27 = vadd.f32 %v6987_v48, %v6933_v12 }
 0x6a0   :  { %v5363_v28 = vmul.f32 -1.442695, %v6537_v26 }
 0x6a2   :  { %6633 = vpow2.f32 %v5363_v28 }
 0x6ac   :  { %v6634_v29 = vpop.eup %6633 }
 0x6ad   :  { %v638_v30 = vadd.f32 1.0, %v6634_v29 }
 0x6af   :  { %6635 = vrcp.f32 %v638_v30 }
 0x6b9   :  { %v6636_v31 = vpop.eup %6635 }
 0x6ba   :  { %v641_v32 = vmul.f32 2.0, %v6636_v31 }
 0x6bc   :  { %v5364_v33 = vadd.f32 -1.0, %v641_v32 }
 0x6be   :  { %v643_v34 = vsel %vm6940_vm5, %v5364_v33, %v6636_v31 }
 0x6bf   :  { %646 = vrot.lane.b32.xlu0 %v643_v34, %s6871_s26  ;;  %v644_v37 = vmul.f32 0.0, %v643_v34 }
 0x731   :  { %v647_v35 = vpop.permute.xlu0 %646 }
 0x732   :  { %v649_v36 = vmul.f32 %v647_v35, %v643_v34 }
 0x734   :  { %651 = vrot.lane.b32.xlu1 %v649_v36, %s6872_s27 }
 0x7a6   :  { %v652_v39 = vpop.permute.xlu1 %651 }
 0x7a7   :  { %v7046_v40 = vadd.f32 %v652_v39, %v644_v37 }
 0x7a9   :  { %6637 = vtanh.f32 %v7046_v40 }
 0x7b3   :  { %v6638_v54 = vpop.eup %6637 }
 0x7b4   :  { %657 = vrot.lane.b32.xlu0 %v6638_v54, %s6871_s26 }
 0x826   :  { %v658_v55 = vpop.permute.xlu0 %657 }
 0x827   :  { %v660_v56 = vmul.f32 %v658_v55, %v643_v34 }
 0x829   :  { %666 = vrot.lane.b32.xlu1 %v660_v56, %s6872_s27 }
 0x89b   :  { %v667_v57 = vpop.permute.xlu1 %666 }
 0x89c   :  { %5802 = vmatmul.mubr.msk.f32.vlgmr.msra.gmra.mrb[10].mxu0 %vm212_vm6, %v667_v57 }
 0x89d   :  { %6308 = vmatpush3.bf16.msra.mxu0 %v6907_v5  ;;  %5812 = vmatprep.mubr.msk.f32.mxu0 %vm6869_vm0, %v6870_v1 }
 0x89e   :  { %6309 = vmatprep.subr.bf16.mxu0 %v6868_v0 }
 0x8a1   :  { %6311 = vmatpush3.bf16.msra.mxu0 %v6918_v10 }
 0x8a2   :  { %6324 = vmatprep.subr.bf16.mxu0 %v6868_v0 }
 0x8a4   :  { %5813 = vmatmul.mubr.msk.f32.vlgmr.msra.gmra.mrb[12].mxu0 %vm212_vm6, %v491_v20 }
 0x8a5   :  { %6326 = vmatpush3.bf16.msra.mxu0 %v7049_v45  ;;  %5845 = vmatprep.mubr.msk.f32.mxu0 %vm6869_vm0, %v6870_v1 }
 0x8a6   :  { %6327 = vmatprep.subr.bf16.mxu0 %v6868_v0 }
 0x8a9   :  { %6329 = vmatpush3.bf16.msra.mxu0 %v7052_v47 }
 0x8aa   :  { %6330 = vmatprep.subr.bf16.mxu0 %v6868_v0 }
 0x977   :  { %v806_v59 = vpop.f32.mrb[12].mxu0 }
 0x978   :  { %v810_v60 = vadd.f32 %v806_v59, %v184_v58  ;;  %v5814_v61 = vpop.f32.mrb[13].mxu0 }
 0x979   :  { %v45_v61 = vld [vmem:[#allocation2 + $0x98] sm:$0xff] }
 0x97a   :  { %v5368_v62 = vmul.f32 -1.442695, %v810_v60 }
 0x97c   :  { %6639 = vpow2.f32 %v5368_v62  ;;  %v46_v62 = vld [vmem:[#allocation2 + $0xa0] sm:$0xff] }
 0x986   :  { %v6640_v63 = vpop.eup %6639 }
 0x987   :  { %v814_v2 = vadd.f32 1.0, %v6640_v63  ;;  %v7125_v63 = vpack.c.bf16 %v46_v62, %v45_v61 }
 0x989   :  { %6641 = vrcp.f32 %v814_v2 }
 0x993   :  { %v6642_v3 = vpop.eup %6641 }
 0x994   :  { %v817_v4 = vmul.f32 2.0, %v6642_v3 }
 0x996   :  { %v5369_v6 = vadd.f32 -1.0, %v817_v4 }
 0x998   :  { %v819_v7 = vsel %vm6940_vm5, %v5369_v6, %v6642_v3 }
 0x999   :  { %822 = vrot.lane.b32.xlu0 %v819_v7, %s6871_s26  ;;  %v820_v49 = vmul.f32 %v819_v7, %v7016_v9 }
 0xa0b   :  { %v823_v8 = vpop.permute.xlu0 %822 }
 0xa0c   :  { %v825_v11 = vmul.f32 %v823_v8, %v819_v7 }
 0xa0e   :  { %827 = vrot.lane.b32.xlu1 %v825_v11, %s6872_s27 }
 0xa80   :  { %v828_v13 = vpop.permute.xlu1 %827 }
 0xa81   :  { %v7080_v14 = vadd.f32 %v828_v13, %v820_v49 }
 0xa83   :  { %6643 = vtanh.f32 %v7080_v14 }
 0xa8d   :  { %v6644_v15 = vpop.eup %6643 }
 0xa8e   :  { %833 = vrot.lane.b32.xlu0 %v6644_v15, %s6871_s26 }
 0xb00   :  { %v834_v16 = vpop.permute.xlu0 %833 }
 0xb01   :  { %v836_v18 = vmul.f32 %v834_v16, %v819_v7  ;;  %v7139_v7 = vld [vmem:[#allocation2 + $0xa8] ss:$0 sm:$0xff] }
 0xb03   :  { %838 = vrot.lane.b32.xlu1 %v836_v18, %s6872_s27 }
 0xb75   :  { %v839_v19 = vpop.permute.xlu1 %838 }
 0xb76   :  { %5824 = vmatmul.mubr.msk.f32.vlgmr.msra.gmra.mrb[6].mxu1 %vm212_vm6, %v839_v19 }
 0xb77   :  { %6320 = vmatpush3.bf16.msra.mxu1 %v7021_v17  ;;  %5834 = vmatprep.mubr.msk.f32.mxu1 %vm6869_vm0, %v6870_v1 }
 0xb78   :  { %6321 = vmatprep.subr.bf16.mxu1 %v6868_v0 }
 0xb7b   :  { %6323 = vmatpush3.bf16.msra.mxu1 %v7025_v21 }
 0xb7c   :  { %6336 = vmatprep.subr.bf16.mxu1 %v6868_v0 }
 0xb7e   :  { %5835 = vmatmul.mubr.msk.f32.vlgmr.msra.gmra.mrb[4].mxu1 %vm212_vm6, %v667_v57 }
 0xb7f   :  { %6338 = vmatpush3.bf16.msra.mxu1 %v6907_v5  ;;  %5870 = vmatprep.mubr.msk.f32.mxu1 %vm6869_vm0, %v6870_v1 }
 0xb80   :  { %6339 = vmatprep.subr.bf16.mxu1 %v6868_v0 }
 0xb83   :  { %6341 = vmatpush3.bf16.msra.mxu1 %v6918_v10 }
 0xb84   :  { %6348 = vmatprep.subr.bf16.mxu1 %v6868_v0 }
 0xb86   :  { %5871 = vmatmul.mubr.msk.f32.vlgmr.msra.gmra.mrb[8].mxu1 %vm212_vm6, %v839_v19 }
 0xb87   :  { %6350 = vmatpush3.bf16.msra.mxu1 %v7021_v17  ;;  %5892 = vmatprep.mubr.msk.f32.mxu1 %vm6869_vm0, %v6870_v1 }
 0xb88   :  { %6351 = vmatprep.subr.bf16.mxu1 %v6868_v0 }
 0xb8b   :  { %6353 = vmatpush3.bf16.msra.mxu1 %v7025_v21 }
 0xb8c   :  { %6363 = vmatprep.subr.bf16.mxu1 %v6868_v0 }
 0xc51   :  { %v978_v9 = vpop.f32.mrb[4].mxu1 }
 0xc52   :  { %v6538_v20 = vadd.f32 %v7039_v23, %v978_v9  ;;  %v5836_v24 = vpop.f32.mrb[5].mxu1 }
 0xc54   :  { %v5372_v26 = vmul.f32 -1.442695, %v6538_v20 }
 0xc56   :  { %6645 = vpow2.f32 %v5372_v26 }
 0xc59   :  { %v1329_v28 = vpop.f32.mrb[8].mxu1 }
 0xc5a   :  { %v1333_v29 = vadd.f32 %v1329_v28, %v189_v27  ;;  %v5872_v30 = vpop.f32.mrb[9].mxu1 }
 0xc5c   :  { %v5380_v46 = vmul.f32 -1.442695, %v1333_v29 }
 0xc60   :  { %v6646_v31 = vpop.eup %6645 }
 0xc61   :  { %v986_v32 = vadd.f32 1.0, %v6646_v31 }
 0xc63   :  { %6647 = vrcp.f32 %v986_v32 }
 0xc6d   :  { %v6648_v33 = vpop.eup %6647 }
 0xc6e   :  { %v989_v34 = vmul.f32 2.0, %v6648_v33 }
 0xc70   :  { %v5373_v35 = vadd.f32 -1.0, %v989_v34 }
 0xc72   :  { %v991_v36 = vsel %vm6940_vm5, %v5373_v35, %v6648_v33 }
 0xc73   :  { %994 = vrot.lane.b32.xlu0 %v991_v36, %s6871_s26  ;;  %v992_v48 = vmul.f32 %v991_v36, %v7046_v40 }
 0xce5   :  { %v995_v37 = vpop.permute.xlu0 %994 }
 0xce6   :  { %v997_v39 = vmul.f32 %v995_v37, %v991_v36 }
 0xce8   :  { %999 = vrot.lane.b32.xlu1 %v997_v39, %s6872_s27 }
 0xd5a   :  { %v1000_v41 = vpop.permute.xlu1 %999 }
 0xd5b   :  { %v7114_v42 = vadd.f32 %v1000_v41, %v992_v48 }
 0xd5d   :  { %6649 = vtanh.f32 %v7114_v42 }
 0xd5e   :  { %6651 = vpow2.f32 %v5380_v46 }
 0xd67   :  { %v6650_v44 = vpop.eup %6649 }
 0xd68   :  { %1005 = vrot.lane.b32.xlu0 %v6650_v44, %s6871_s26  ;;  %v6652_v54 = vpop.eup %6651 }
 0xd69   :  { %v1337_v55 = vadd.f32 1.0, %v6652_v54 }
 0xd6b   :  { %6653 = vrcp.f32 %v1337_v55 }
 0xd75   :  { %v6654_v56 = vpop.eup %6653 }
 0xd76   :  { %v1340_v57 = vmul.f32 2.0, %v6654_v56 }
 0xd78   :  { %v5381_v60 = vadd.f32 -1.0, %v1340_v57 }
 0xd7a   :  { %v7121_v40 = vsel %vm6940_vm5, %v5381_v60, %v6654_v56 }
 0xd7b   :  { %v1343_v39 = vmul.f32 %v7121_v40, %v7080_v14  ;;  %v35_v14 = vld [vmem:[#allocation2 + $0xb0] sm:$0xff] }
 0xdda   :  { %v1006_v58 = vpop.permute.xlu0 %1005 }
 0xddb   :  { %v1008_v59 = vmul.f32 %v1006_v58, %v991_v36 }
 0xddd   :  { %1010 = vrot.lane.b32.xlu1 %v1008_v59, %s6872_s27  ;;  %v36_v59 = vld [vmem:[#allocation2 + $0xb8] sm:$0xff] }
 0xdde   :  { %v7171_v60 = vpack.c.bf16 %v36_v59, %v35_v14 }
 0xde1   :  { %1345 = vrot.lane.b32.xlu1 %v7121_v40, %s6871_s26 }
 0xe4f   :  { %v1011_v2 = vpop.permute.xlu1 %1010 }
 0xe50   :  { %5846 = vmatmul.mubr.msk.f32.vlgmr.msra.gmra.mrb[14].mxu0 %vm212_vm6, %v1011_v2  ;;  %5893 = vmatmul.mubr.msk.f32.vlgmr.msra.gmra.mrb[6].mxu1 %vm212_vm6, %v1011_v2 }
 0xe51   :  { %6332 = vmatpush3.bf16.msra.mxu0 %v7125_v63  ;;  %5852 = vmatprep.mubr.msk.f32.mxu0 %vm6869_vm0, %v6870_v1 }
 0xe52   :  { %6333 = vmatprep.subr.bf16.mxu0 %v6868_v0  ;;  %5917 = vmatprep.mubr.msk.f32.mxu1 %vm6869_vm0, %v6870_v1 }
 0xe53   :  { %v1346_v32 = vpop.permute.xlu1 %1345  ;;  %6365 = vmatpush3.bf16.msra.mxu1 %v7171_v60 }
 0xe54   :  { %5853 = vmatmul.mubr.f32.vlgmr.msra.gmra.mrb[10].mxu0 %v6870_v1  ;;  %v1348_v22 = vmul.f32 %v1346_v32, %v7121_v40  ;;  %6369 = vmatprep.subr.bf16.mxu1 %v6868_v0 }
 0xe55   :  { %5859 = vmatprep.mubr.msk.f32.mxu0 %vm6869_vm0, %v6870_v1  ;;  %6335 = vmatpush3.bf16.msra.mxu0 %v7171_v60 }
 0xe56   :  { %6342 = vmatprep.subr.bf16.mxu0 %v6868_v0 }
 0xf23   :  { %v1501_v3 = vpop.f32.mrb[6].mxu1 }
 0xf24   :  { %v6540_v4 = vadd.f32 %v7039_v23, %v1501_v3  ;;  %v5894_v6 = vpop.f32.mrb[7].mxu1 }
 0xf26   :  { %v5384_v8 = vmul.f32 -1.442695, %v6540_v4 }
 0xf27   :  { %v1153_v11 = vpop.f32.mrb[10].mxu0 }
 0xf28   :  { %6655 = vpow2.f32 %v5384_v8  ;;  %v6539_v49 = vadd.f32 %v7139_v7, %v1153_v11  ;;  %v5854_v13 = vpop.f32.mrb[11].mxu0 }
 0xf29   :  { %v48_v13 = vld [vmem:[#allocation2 + $0xc8] sm:$0xff] }
 0xf2a   :  { %v5375_v15 = vmul.f32 -1.442695, %v6539_v49  ;;  %v47_v49 = vld [vmem:[#allocation2 + $0xc0] sm:$0xff] }
 0xf2c   :  { %6657 = vpow2.f32 %v5375_v15 }
 0xf32   :  { %v6656_v16 = vpop.eup %6655 }
 0xf33   :  { %v1509_v18 = vadd.f32 1.0, %v6656_v16  ;;  %v7204_v16 = vpack.c.bf16 %v48_v13, %v47_v49 }
 0xf35   :  { %6659 = vrcp.f32 %v1509_v18 }
 0xf36   :  { %v6658_v19 = vpop.eup %6657 }
 0xf37   :  { %v1161_v9 = vadd.f32 1.0, %v6658_v19 }
 0xf39   :  { %6661 = vrcp.f32 %v1161_v9 }
 0xf3f   :  { %v6660_v20 = vpop.eup %6659 }
 0xf40   :  { %v1512_v27 = vmul.f32 2.0, %v6660_v20 }
 0xf42   :  { %v5385_v31 = vadd.f32 -1.0, %v1512_v27 }
 0xf43   :  { %v6662_v24 = vpop.eup %6661 }
 0xf44   :  { %v1164_v26 = vmul.f32 2.0, %v6662_v24  ;;  %v1514_v33 = vsel %vm6940_vm5, %v5385_v31, %v6660_v20 }
 0xf45   :  { %v1515_v56 = vmul.f32 %v1514_v33, %v7114_v42 }
 0xf46   :  { %v5376_v29 = vadd.f32 -1.0, %v1164_v26 }
 0xf48   :  { %v1166_v30 = vsel %vm7144_vm9, %v5376_v29, %v6662_v24 }
 0xf49   :  { %1169 = vrot.lane.b32.xlu0 %v1166_v30, %s6873_s0  ;;  %v1167_v46 = vmul.f32 0.0, %v1166_v30 }
 0xf4d   :  { %1517 = vrot.lane.b32.xlu0 %v1514_v33, %s6871_s26 }
 0xf51   :  { %1350 = vrot.lane.b32.xlu0 %v1348_v22, %s6872_s27 }
 0xfbb   :  { %v1170_v34 = vpop.permute.xlu0 %1169 }
 0xfbc   :  { %v1172_v35 = vmul.f32 %v1170_v34, %v1166_v30 }
 0xfbe   :  { %1174 = vrot.lane.b32.xlu1 %v1172_v35, %s6874_s12 }
 0xfbf   :  { %v1518_v36 = vpop.permute.xlu0 %1517 }
 0xfc0   :  { %v1520_v37 = vmul.f32 %v1518_v36, %v1514_v33 }
 0xfc2   :  { %1522 = vrot.lane.b32.xlu1 %v1520_v37, %s6872_s27 }
 0xfc3   :  { %v1351_v48 = vpop.permute.xlu0 %1350 }
 0xfc4   :  { %v7160_v41 = vadd.f32 %v1351_v48, %v1343_v39 }
 0xfc6   :  { %6663 = vtanh.f32 %v7160_v41 }
 0xfd0   :  { %v6664_v44 = vpop.eup %6663 }
 0xfd1   :  { %1356 = vrot.lane.b32.xlu1 %v6664_v44, %s6871_s26 }
0x1030   :  { %v1175_v54 = vpop.permute.xlu1 %1174 }
0x1031   :  { %v7164_v55 = vadd.f32 %v1175_v54, %v1167_v46  ;;  %v194_v54 = vadd.f32 %v6933_v12, %v6993_v51 }
0x1033   :  { %6665 = vtanh.f32 %v7164_v55 }
0x1034   :  { %v1523_v57 = vpop.permute.xlu1 %1522 }
0x1035   :  { %v7168_v58 = vadd.f32 %v1523_v57, %v1515_v56 }
0x1037   :  { %6667 = vtanh.f32 %v7168_v58 }
0x103d   :  { %v6666_v61 = vpop.eup %6665 }
0x103e   :  { %1180 = vrot.lane.b32.xlu0 %v6666_v61, %s6872_s27 }
0x1041   :  { %v6668_v42 = vpop.eup %6667 }
0x1042   :  { %1528 = vrot.lane.b32.xlu0 %v6668_v42, %s6871_s26 }
0x1043   :  { %v1357_v62 = vpop.permute.xlu1 %1356 }
0x1044   :  { %v1359_v2 = vmul.f32 %v1357_v62, %v7121_v40 }
0x1046   :  { %1361 = vrot.lane.b32.xlu0 %v1359_v2, %s6872_s27 }
0x10b0   :  { %v1181_v3 = vpop.permute.xlu0 %1180 }
0x10b1   :  { %v1183_v4 = vmul.f32 %v1181_v3, %v1166_v30 }
0x10b3   :  { %1189 = vrot.lane.b32.xlu1 %v1183_v4, %s6875_s13 }
0x10b4   :  { %v1529_v6 = vpop.permute.xlu0 %1528 }
0x10b5   :  { %v1531_v8 = vmul.f32 %v1529_v6, %v1514_v33 }
0x10b7   :  { %1533 = vrot.lane.b32.xlu1 %v1531_v8, %s6872_s27 }
0x10b8   :  { %v1362_v40 = vpop.permute.xlu0 %1361 }
0x1125   :  { %v1190_v11 = vpop.permute.xlu1 %1189 }
0x1126   :  { %5860 = vmatmul.mubr.msk.f32.vlgmr.msra.gmra.mrb[16].mxu0 %vm1084_vm10, %v1190_v11 }
0x1127   :  { %6344 = vmatpush3.bf16.msra.mxu0 %v6962_v38  ;;  %5881 = vmatprep.mubr.msk.f32.mxu0 %vm6869_vm0, %v6870_v1 }
0x1128   :  { %6345 = vmatprep.subr.bf16.mxu0 %v6868_v0 }
0x1129   :  { %v7197_v15 = vpop.permute.xlu1 %1533 }
0x112b   :  { %6347 = vmatpush3.bf16.msra.mxu0 %v6972_v43 }
0x112c   :  { %6354 = vmatprep.subr.bf16.mxu0 %v6868_v0 }
0x112e   :  { %5882 = vmatmul.mubr.msk.f32.vlgmr.msra.gmra.mrb[18].mxu0 %vm212_vm6, %v1362_v40 }
0x112f   :  { %6356 = vmatpush3.bf16.msra.mxu0 %v7049_v45  ;;  %5903 = vmatprep.mubr.msk.f32.mxu0 %vm6869_vm0, %v6870_v1 }
0x1130   :  { %6357 = vmatprep.subr.bf16.mxu0 %v6868_v0 }
0x1133   :  { %6359 = vmatpush3.bf16.msra.mxu0 %v7052_v47 }
0x1134   :  { %6360 = vmatprep.subr.bf16.mxu0 %v6868_v0 }
0x1136   :  { %5904 = vmatmul.mubr.msk.f32.vlgmr.msra.gmra.mrb[20].mxu0 %vm212_vm6, %v7197_v15 }
0x1137   :  { %6362 = vmatpush3.bf16.msra.mxu0 %v7125_v63  ;;  %5910 = vmatprep.mubr.msk.f32.mxu0 %vm6869_vm0, %v6870_v1 }
0x1138   :  { %6366 = vmatprep.subr.bf16.mxu0 %v6868_v0 }
0x113a   :  { %5911 = vmatmul.mubr.msk.f32.vlgmr.msra.gmra.mrb[14].mxu0 %vm1084_vm10, %v1190_v11 }
0x113b   :  { %6368 = vmatpush3.bf16.msra.mxu0 %v7204_v16  ;;  %5924 = vmatprep.mubr.msk.f32.mxu0 %vm6869_vm0, %v6870_v1 }
0x113c   :  { %6375 = vmatprep.subr.bf16.mxu0 %v6868_v0 }
0x113e   :  { %5925 = vmatmul.mubr.f32.vlgmr.msra.gmra.mrb[16].mxu0 %v6870_v1 }
0x113f   :  { %6377 = vmatpush3.bf16.msra.mxu0 %v6962_v38  ;;  %5946 = vmatprep.mubr.msk.f32.mxu0 %vm6869_vm0, %v6870_v1 }
0x1140   :  { %6378 = vmatprep.subr.bf16.mxu0 %v6868_v0 }
0x1143   :  { %6380 = vmatpush3.bf16.msra.mxu0 %v6972_v43 }
0x1144   :  { %6381 = vmatprep.subr.bf16.mxu0 %v6868_v0 }
0x120d   :  { %v1673_v18 = vpop.f32.mrb[14].mxu0 }
0x120e   :  { %v6541_v19 = vadd.f32 %v7139_v7, %v1673_v18  ;;  %v5912_v9 = vpop.f32.mrb[15].mxu0 }
0x1210   :  { %v5388_v20 = vmul.f32 -1.442695, %v6541_v19 }
0x1211   :  { %v7220_v24 = vpop.f32.mrb[16].mxu0 }
0x1212   :  { %6669 = vpow2.f32 %v5388_v20  ;;  %v5926_v26 = vpop.f32.mrb[17].mxu0 }
0x121c   :  { %v6670_v27 = vpop.eup %6669 }
0x121d   :  { %v1681_v29 = vadd.f32 1.0, %v6670_v27 }
0x121f   :  { %6671 = vrcp.f32 %v1681_v29 }
0x1229   :  { %v6672_v30 = vpop.eup %6671 }
0x122a   :  { %v1684_v31 = vmul.f32 2.0, %v6672_v30 }
0x122c   :  { %v5389_v32 = vadd.f32 -1.0, %v1684_v31 }
0x122e   :  { %v1686_v33 = vsel %vm7144_vm9, %v5389_v32, %v6672_v30 }
0x122f   :  { %1689 = vrot.lane.b32.xlu0 %v1686_v33, %s6873_s0  ;;  %v1687_v35 = vmul.f32 %v1686_v33, %v7164_v55 }
0x12a1   :  { %v1690_v22 = vpop.permute.xlu0 %1689 }
0x12a2   :  { %v1692_v34 = vmul.f32 %v1690_v22, %v1686_v33 }
0x12a4   :  { %1694 = vrot.lane.b32.xlu1 %v1692_v34, %s6874_s12 }
0x1316   :  { %v1695_v36 = vpop.permute.xlu1 %1694 }
0x1317   :  { %v7227_v37 = vadd.f32 %v1695_v36, %v1687_v35 }
0x1319   :  { %6673 = vtanh.f32 %v7227_v37 }
0x1323   :  { %v6674_v39 = vpop.eup %6673 }
0x1324   :  { %1700 = vrot.lane.b32.xlu0 %v6674_v39, %s6872_s27 }
0x1396   :  { %v1701_v48 = vpop.permute.xlu0 %1700 }
0x1397   :  { %v1703_v44 = vmul.f32 %v1701_v48, %v1686_v33 }
0x1399   :  { %1705 = vrot.lane.b32.xlu1 %v1703_v44, %s6875_s13 }
0x140b   :  { %v1706_v46 = vpop.permute.xlu1 %1705 }
0x140c   :  { %5918 = vmatmul.mubr.msk.f32.vlgmr.msra.gmra.mrb[10].mxu1 %vm1084_vm10, %v1706_v46 }
0x140d   :  { %6371 = vmatpush3.bf16.msra.mxu1 %v6907_v5  ;;  %5935 = vmatprep.mubr.msk.f32.mxu1 %vm6869_vm0, %v6870_v1 }
0x140e   :  { %6372 = vmatprep.subr.bf16.mxu1 %v6868_v0 }
0x1411   :  { %6374 = vmatpush3.bf16.msra.mxu1 %v6918_v10 }
0x1412   :  { %6387 = vmatprep.subr.bf16.mxu1 %v6868_v0 }
0x1414   :  { %5936 = vmatmul.mubr.msk.f32.vlgmr.msra.gmra.mrb[12].mxu1 %vm212_vm6, %v1362_v40 }
0x1415   :  { %6389 = vmatpush3.bf16.msra.mxu1 %v7049_v45  ;;  %5968 = vmatprep.mubr.msk.f32.mxu1 %vm6869_vm0, %v6870_v1 }
0x1416   :  { %6390 = vmatprep.subr.bf16.mxu1 %v6868_v0 }
0x1419   :  { %6392 = vmatpush3.bf16.msra.mxu1 %v7052_v47 }
0x141a   :  { %6396 = vmatprep.subr.bf16.mxu1 %v6868_v0 }
0x14e7   :  { %v1942_v55 = vpop.f32.mrb[12].mxu1 }
0x14e8   :  { %v1946_v56 = vadd.f32 %v1942_v55, %v194_v54  ;;  %v5937_v57 = vpop.f32.mrb[13].mxu1 }
0x14ea   :  { %v5394_v14 = vmul.f32 -1.442695, %v1946_v56 }
0x14ec   :  { %6675 = vpow2.f32 %v5394_v14 }
0x14f6   :  { %v6676_v59 = vpop.eup %6675 }
0x14f7   :  { %v1950_v61 = vadd.f32 1.0, %v6676_v59 }
0x14f9   :  { %6677 = vrcp.f32 %v1950_v61 }
0x1503   :  { %v6678_v42 = vpop.eup %6677 }
0x1504   :  { %v1953_v62 = vmul.f32 2.0, %v6678_v42 }
0x1506   :  { %v5395_v2 = vadd.f32 -1.0, %v1953_v62 }
0x1508   :  { %v1955_v3 = vsel %vm6940_vm5, %v5395_v2, %v6678_v42 }
0x1509   :  { %1958 = vrot.lane.b32.xlu0 %v1955_v3, %s6871_s26  ;;  %v1956_v12 = vmul.f32 %v1955_v3, %v7160_v41  ;;  %v7281_v41 = vld [vmem:[#allocation2 + $0xd0] ss:$0 sm:$0xff] }
0x157b   :  { %v1959_v4 = vpop.permute.xlu0 %1958 }
0x157c   :  { %v1961_v6 = vmul.f32 %v1959_v4, %v1955_v3 }
0x157e   :  { %1963 = vrot.lane.b32.xlu1 %v1961_v6, %s6872_s27 }
0x15f0   :  { %v1964_v51 = vpop.permute.xlu1 %1963 }
0x15f1   :  { %v7253_v8 = vadd.f32 %v1964_v51, %v1956_v12 }
0x15f3   :  { %6679 = vtanh.f32 %v7253_v8 }
0x15fd   :  { %v6680_v11 = vpop.eup %6679 }
0x15fe   :  { %1969 = vrot.lane.b32.xlu0 %v6680_v11, %s6871_s26 }
0x1670   :  { %v1970_v40 = vpop.permute.xlu0 %1969 }
0x1671   :  { %v1972_v49 = vmul.f32 %v1970_v40, %v1955_v3 }
0x1673   :  { %1974 = vrot.lane.b32.xlu1 %v1972_v49, %s6872_s27 }
0x16e5   :  { %v7258_v13 = vpop.permute.xlu1 %1974 }
0x16e6   :  { %5947 = vmatmul.mubr.msk.f32.vlgmr.msra.gmra.mrb[22].mxu0 %vm212_vm6, %v7258_v13 }
0x16e7   :  { %6383 = vmatpush3.bf16.msra.mxu0 %v7021_v17  ;;  %5957 = vmatprep.mubr.msk.f32.mxu0 %vm6869_vm0, %v6870_v1 }
0x16e8   :  { %6384 = vmatprep.subr.bf16.mxu0 %v6868_v0 }
0x16eb   :  { %6386 = vmatpush3.bf16.msra.mxu0 %v7025_v21 }
0x16ec   :  { %6393 = vmatprep.subr.bf16.mxu0 %v6868_v0 }
0x16ee   :  { %5958 = vmatmul.mubr.msk.f32.vlgmr.msra.gmra.mrb[18].mxu0 %vm212_vm6, %v7197_v15  ;;  %v6542_v15 = vadd.f32 %v7281_v41, %v7220_v24 }
0x16ef   :  { %6395 = vmatpush3.bf16.msra.mxu0 %v7125_v63  ;;  %5975 = vmatprep.mubr.msk.f32.mxu0 %vm6869_vm0, %v6870_v1 }
0x16f0   :  { %6408 = vmatprep.subr.bf16.mxu0 %v6868_v0  ;;  %v5391_v18 = vmul.f32 -1.442695, %v6542_v15 }
0x16f2   :  { %5976 = vmatmul.mubr.msk.f32.vlgmr.msra.gmra.mrb[20].mxu0 %vm1084_vm10, %v1706_v46  ;;  %6681 = vpow2.f32 %v5391_v18 }
0x16f3   :  { %6410 = vmatpush3.bf16.msra.mxu0 %v6962_v38  ;;  %6011 = vmatprep.mubr.msk.f32.mxu0 %vm6869_vm0, %v6870_v1 }
0x16f4   :  { %6411 = vmatprep.subr.bf16.mxu0 %v6868_v0 }
0x16f7   :  { %6413 = vmatpush3.bf16.msra.mxu0 %v6972_v43 }
0x16f8   :  { %6414 = vmatprep.subr.bf16.mxu0 %v6868_v0 }
0x16fc   :  { %v6682_v32 = vpop.eup %6681 }
0x16fd   :  { %v1853_v33 = vadd.f32 1.0, %v6682_v32 }
0x17c1   :  { %v2114_v19 = vpop.f32.mrb[18].mxu0 }
0x17c2   :  { %v6543_v9 = vadd.f32 %v7039_v23, %v2114_v19  ;;  %v5959_v20 = vpop.f32.mrb[19].mxu0 }
0x17c4   :  { %v5398_v26 = vmul.f32 -1.442695, %v6543_v9 }
0x17c5   :  { %v2286_v27 = vpop.f32.mrb[20].mxu0 }
0x17c6   :  { %6683 = vpow2.f32 %v5398_v26  ;;  %v6544_v29 = vadd.f32 %v7139_v7, %v2286_v27  ;;  %v5977_v30 = vpop.f32.mrb[21].mxu0 }
0x17c8   :  { %v5402_v31 = vmul.f32 -1.442695, %v6544_v29 }
0x17ca   :  { %6685 = vpow2.f32 %v5402_v31 }
0x17cb   :  { %6687 = vrcp.f32 %v1853_v33 }
0x17d0   :  { %v6684_v22 = vpop.eup %6683 }
0x17d1   :  { %v2122_v34 = vadd.f32 1.0, %v6684_v22 }
0x17d3   :  { %6689 = vrcp.f32 %v2122_v34 }
0x17d4   :  { %v6686_v24 = vpop.eup %6685 }
0x17d5   :  { %v2294_v35 = vadd.f32 1.0, %v6686_v24  ;;  %v6688_v36 = vpop.eup %6687 }
0x17d6   :  { %v1856_v44 = vmul.f32 2.0, %v6688_v36 }
0x17d7   :  { %6691 = vrcp.f32 %v2294_v35 }
0x17d8   :  { %v5392_v56 = vadd.f32 -1.0, %v1856_v44 }
0x17da   :  { %v1858_v59 = vsel %vm7144_vm9, %v5392_v56, %v6688_v36  ;;  %v7346_v36 = vld [vmem:[#allocation2 + $0x28] ss:$0 sm:$0xff] }
0x17db   :  { %v1859_v49 = vmul.f32 0.0, %v1858_v59 }
0x17dd   :  { %v6690_v39 = vpop.eup %6689 }
0x17de   :  { %v2125_v48 = vmul.f32 2.0, %v6690_v39 }
0x17e0   :  { %v5399_v46 = vadd.f32 -1.0, %v2125_v48 }
0x17e1   :  { %v6692_v54 = vpop.eup %6691 }
0x17e2   :  { %v2127_v55 = vsel %vm6940_vm5, %v5399_v46, %v6690_v39  ;;  %v2297_v57 = vmul.f32 2.0, %v6692_v54  ;;  %v199_v39 = vadd.f32 %v7346_v36, %v6991_v50 }
0x17e3   :  { %2130 = vrot.lane.b32.xlu0 %v2127_v55, %s6871_s26  ;;  %v2128_v12 = vmul.f32 %v2127_v55, %v7168_v58 }
0x17e4   :  { %v5403_v14 = vadd.f32 -1.0, %v2297_v57 }
0x17e6   :  { %v2299_v61 = vsel %vm7144_vm9, %v5403_v14, %v6692_v54 }
0x17e7   :  { %1861 = vrot.lane.b32.xlu0 %v1858_v59, %s6873_s0  ;;  %2302 = vrot.lane.b32.xlu1 %v2299_v61, %s6873_s0  ;;  %v2300_v40 = vmul.f32 %v2299_v61, %v7227_v37 }
0x1855   :  { %v2131_v42 = vpop.permute.xlu0 %2130 }
0x1856   :  { %v2133_v62 = vmul.f32 %v2131_v42, %v2127_v55 }
0x1858   :  { %2135 = vrot.lane.b32.xlu1 %v2133_v62, %s6872_s27 }
0x1859   :  { %v1862_v2 = vpop.permute.xlu0 %1861  ;;  %v2303_v3 = vpop.permute.xlu1 %2302 }
0x185a   :  { %v1864_v4 = vmul.f32 %v1862_v2, %v1858_v59  ;;  %v2305_v6 = vmul.f32 %v2303_v3, %v2299_v61 }
0x185c   :  { %1866 = vrot.lane.b32.xlu1 %v1864_v4, %s6874_s12  ;;  %2307 = vrot.lane.b32.xlu0 %v2305_v6, %s6874_s12 }
0x18ca   :  { %v2136_v51 = vpop.permute.xlu1 %2135 }
0x18cb   :  { %v7300_v11 = vadd.f32 %v2136_v51, %v2128_v12 }
0x18cd   :  { %6693 = vtanh.f32 %v7300_v11 }
0x18ce   :  { %v2308_v15 = vpop.permute.xlu0 %2307  ;;  %v1867_v18 = vpop.permute.xlu1 %1866 }
0x18cf   :  { %v7304_v19 = vadd.f32 %v2308_v15, %v2300_v40  ;;  %v7306_v9 = vadd.f32 %v1867_v18, %v1859_v49 }
0x18d1   :  { %6695 = vtanh.f32 %v7304_v19 }
0x18d2   :  { %6697 = vtanh.f32 %v7306_v9 }
0x18d7   :  { %v6694_v20 = vpop.eup %6693 }
0x18d8   :  { %2141 = vrot.lane.b32.xlu0 %v6694_v20, %s6871_s26 }
0x18db   :  { %v6696_v58 = vpop.eup %6695 }
0x18dc   :  { %v6698_v26 = vpop.eup %6697  ;;  %2313 = vrot.lane.b32.xlu1 %v6696_v58, %s6872_s27 }
0x18dd   :  { %1872 = vrot.lane.b32.xlu0 %v6698_v26, %s6872_s27 }
0x194a   :  { %v2142_v37 = vpop.permute.xlu0 %2141 }
0x194b   :  { %v2144_v27 = vmul.f32 %v2142_v37, %v2127_v55 }
0x194d   :  { %2146 = vrot.lane.b32.xlu1 %v2144_v27, %s6872_s27 }
0x194e   :  { %v2314_v29 = vpop.permute.xlu1 %2313 }
0x194f   :  { %v1873_v30 = vpop.permute.xlu0 %1872  ;;  %v2316_v31 = vmul.f32 %v2314_v29, %v2299_v61 }
0x1950   :  { %v1875_v32 = vmul.f32 %v1873_v30, %v1858_v59 }
0x1951   :  { %2318 = vrot.lane.b32.xlu0 %v2316_v31, %s6875_s13 }
0x1952   :  { %2393 = vrot.lane.b32.xlu1 %v1875_v32, %s6875_s13 }
0x19bf   :  { %v2147_v33 = vpop.permute.xlu1 %2146 }
0x19c0   :  { %5969 = vmatmul.mubr.msk.f32.vlgmr.msra.gmra.mrb[14].mxu1 %vm212_vm6, %v2147_v33 }
0x19c1   :  { %6398 = vmatpush3.bf16.msra.mxu1 %v7171_v60  ;;  %5982 = vmatprep.mubr.msk.f32.mxu1 %vm6869_vm0, %v6870_v1 }
0x19c2   :  { %6399 = vmatprep.subr.bf16.mxu1 %v6868_v0 }
0x19c3   :  { %v7321_v22 = vpop.permute.xlu0 %2318 }
0x19c4   :  { %5983 = vmatmul.mubr.msk.f32.vlgmr.msra.gmra.mrb[16].mxu1 %vm1084_vm10, %v7321_v22  ;;  %v2394_v34 = vpop.permute.xlu1 %2393 }
0x19c5   :  { %6401 = vmatpush3.bf16.msra.mxu1 %v7204_v16  ;;  %5989 = vmatprep.mubr.msk.f32.mxu1 %vm6869_vm0, %v6870_v1 }
0x19c6   :  { %6402 = vmatprep.subr.bf16.mxu1 %v6868_v0 }
0x19c8   :  { %5990 = vmatmul.mubr.msk.f32.vlgmr.msra.gmra.mrb[10].mxu1 %vm1084_vm10, %v2394_v34 }
0x19c9   :  { %6404 = vmatpush3.bf16.msra.mxu1 %v6907_v5  ;;  %6000 = vmatprep.mubr.msk.f32.mxu1 %vm6869_vm0, %v6870_v1 }
0x19ca   :  { %6405 = vmatprep.subr.bf16.mxu1 %v6868_v0 }
0x19cd   :  { %6407 = vmatpush3.bf16.msra.mxu1 %v6918_v10 }
0x19ce   :  { %6420 = vmatprep.subr.bf16.mxu1 %v6868_v0 }
0x19d0   :  { %6001 = vmatmul.mubr.msk.f32.vlgmr.msra.gmra.mrb[18].mxu1 %vm212_vm6, %v7258_v13 }
0x19d1   :  { %6422 = vmatpush3.bf16.msra.mxu1 %v7049_v45  ;;  %6033 = vmatprep.mubr.msk.f32.mxu1 %vm6869_vm0, %v6870_v1 }
0x19d2   :  { %6423 = vmatprep.subr.bf16.mxu1 %v6868_v0 }
0x19d5   :  { %6425 = vmatpush3.bf16.msra.mxu1 %v7052_v47 }
0x19d6   :  { %6426 = vmatprep.subr.bf16.mxu1 %v6868_v0 }
0x1a9b   :  { %v7344_v24 = vpop.f32.mrb[10].mxu1 }
0x1a9c   :  { %v5991_v35 = vpop.f32.mrb[11].mxu1 }
0x1aa3   :  { %v2560_v13 = vpop.f32.mrb[18].mxu1 }
0x1aa4   :  { %v2564_v48 = vadd.f32 %v2560_v13, %v199_v39  ;;  %v6002_v44 = vpop.f32.mrb[19].mxu1 }
0x1aa6   :  { %v5409_v46 = vmul.f32 -1.442695, %v2564_v48 }
0x1aa8   :  { %6699 = vpow2.f32 %v5409_v46 }
0x1ab2   :  { %v6700_v54 = vpop.eup %6699 }
0x1ab3   :  { %v2568_v55 = vadd.f32 1.0, %v6700_v54 }
0x1ab5   :  { %6701 = vrcp.f32 %v2568_v55 }
0x1abf   :  { %v6702_v56 = vpop.eup %6701 }
0x1ac0   :  { %v2571_v57 = vmul.f32 2.0, %v6702_v56 }
0x1ac2   :  { %v5410_v14 = vadd.f32 -1.0, %v2571_v57 }
0x1ac4   :  { %v2573_v59 = vsel %vm6940_vm5, %v5410_v14, %v6702_v56 }
0x1ac5   :  { %2576 = vrot.lane.b32.xlu0 %v2573_v59, %s6871_s26  ;;  %v2574_v50 = vmul.f32 %v2573_v59, %v7253_v8 }
0x1b37   :  { %v2577_v61 = vpop.permute.xlu0 %2576 }
0x1b38   :  { %v2579_v42 = vmul.f32 %v2577_v61, %v2573_v59 }
0x1b3a   :  { %2581 = vrot.lane.b32.xlu1 %v2579_v42, %s6872_s27 }
0x1bac   :  { %v2582_v62 = vpop.permute.xlu1 %2581 }
0x1bad   :  { %v7355_v2 = vadd.f32 %v2582_v62, %v2574_v50 }
0x1baf   :  { %6703 = vtanh.f32 %v7355_v2 }
0x1bb9   :  { %v6704_v3 = vpop.eup %6703 }
0x1bba   :  { %2587 = vrot.lane.b32.xlu0 %v6704_v3, %s6871_s26 }
0x1c2c   :  { %v2588_v4 = vpop.permute.xlu0 %2587 }
0x1c2d   :  { %v2590_v6 = vmul.f32 %v2588_v4, %v2573_v59 }
0x1c2f   :  { %2592 = vrot.lane.b32.xlu1 %v2590_v6, %s6872_s27 }
0x1ca1   :  { %v7360_v12 = vpop.permute.xlu1 %2592 }
0x1ca2   :  { %6012 = vmatmul.mubr.msk.f32.vlgmr.msra.gmra.mrb[24].mxu0 %vm212_vm6, %v7360_v12 }
0x1ca3   :  { %6416 = vmatpush3.bf16.msra.mxu0 %v7021_v17  ;;  %6022 = vmatprep.mubr.msk.f32.mxu0 %vm6869_vm0, %v6870_v1 }
0x1ca4   :  { %6417 = vmatprep.subr.bf16.mxu0 %v6868_v0 }
0x1ca7   :  { %6419 = vmatpush3.bf16.msra.mxu0 %v7025_v21 }
0x1ca8   :  { %6429 = vmatprep.subr.bf16.mxu0 %v6868_v0 }
0x1caa   :  { %6023 = vmatmul.mubr.msk.f32.vlgmr.msra.gmra.mrb[22].mxu0 %vm212_vm6, %v2147_v33 }
0x1cab   :  { %6431 = vmatpush3.bf16.msra.mxu0 %v7171_v60  ;;  %6047 = vmatprep.mubr.msk.f32.mxu0 %vm6869_vm0, %v6870_v1 }
0x1cac   :  { %6435 = vmatprep.subr.bf16.mxu0 %v6868_v0 }
0x1d7d   :  { %v2732_v8 = vpop.f32.mrb[22].mxu0 }
0x1d7e   :  { %v6546_v51 = vadd.f32 %v7039_v23, %v2732_v8  ;;  %v6024_v40 = vpop.f32.mrb[23].mxu0 }
0x1d80   :  { %v5413_v49 = vmul.f32 -1.442695, %v6546_v51 }
0x1d82   :  { %6705 = vpow2.f32 %v5413_v49 }
0x1d8c   :  { %v6706_v15 = vpop.eup %6705 }
0x1d8d   :  { %v2740_v18 = vadd.f32 1.0, %v6706_v15 }
0x1d8f   :  { %6707 = vrcp.f32 %v2740_v18 }
0x1d99   :  { %v6708_v20 = vpop.eup %6707 }
0x1d9a   :  { %v2743_v58 = vmul.f32 2.0, %v6708_v20 }
0x1d9c   :  { %v5414_v26 = vadd.f32 -1.0, %v2743_v58 }
0x1d9e   :  { %v2745_v37 = vsel %vm6940_vm5, %v5414_v26, %v6708_v20 }
0x1d9f   :  { %2748 = vrot.lane.b32.xlu0 %v2745_v37, %s6871_s26  ;;  %v2746_v23 = vmul.f32 %v2745_v37, %v7300_v11 }
0x1e11   :  { %v2749_v27 = vpop.permute.xlu0 %2748 }
0x1e12   :  { %v2751_v29 = vmul.f32 %v2749_v27, %v2745_v37 }
0x1e14   :  { %2753 = vrot.lane.b32.xlu1 %v2751_v29, %s6872_s27 }
0x1e86   :  { %v2754_v30 = vpop.permute.xlu1 %2753 }
0x1e87   :  { %v7381_v31 = vadd.f32 %v2754_v30, %v2746_v23 }
0x1e89   :  { %6709 = vtanh.f32 %v7381_v31 }
0x1e93   :  { %v6710_v32 = vpop.eup %6709 }
0x1e94   :  { %2759 = vrot.lane.b32.xlu0 %v6710_v32, %s6871_s26 }
0x1f06   :  { %v2760_v33 = vpop.permute.xlu0 %2759 }
0x1f07   :  { %v2762_v34 = vmul.f32 %v2760_v33, %v2745_v37  ;;  %v7441_v37 = vld [vmem:[#allocation2 + $0x70] ss:$0 sm:$0xff] }
0x1f09   :  { %2764 = vrot.lane.b32.xlu1 %v2762_v34, %s6872_s27 }
0x1f7b   :  { %v2765_v35 = vpop.permute.xlu1 %2764 }
0x1f7c   :  { %6034 = vmatmul.mubr.msk.f32.vlgmr.msra.gmra.mrb[20].mxu1 %vm212_vm6, %v2765_v35 }
0x1f7d   :  { %6428 = vmatpush3.bf16.msra.mxu1 %v7125_v63  ;;  %6040 = vmatprep.mubr.msk.f32.mxu1 %vm6869_vm0, %v6870_v1 }
0x1f7e   :  { %6432 = vmatprep.subr.bf16.mxu1 %v6868_v0 }
0x1f80   :  { %6041 = vmatmul.mubr.msk.f32.vlgmr.msra.gmra.mrb[14].mxu1 %vm1084_vm10, %v7321_v22 }
0x1f81   :  { %6434 = vmatpush3.bf16.msra.mxu1 %v7204_v16  ;;  %6054 = vmatprep.mubr.msk.f32.mxu1 %vm6869_vm0, %v6870_v1 }
0x1f82   :  { %6441 = vmatprep.subr.bf16.mxu1 %v6868_v0 }
0x2053   :  { %v2904_v11 = vpop.f32.mrb[14].mxu1 }
0x2054   :  { %v6547_v39 = vadd.f32 %v7139_v7, %v2904_v11  ;;  %v6042_v13 = vpop.f32.mrb[15].mxu1  ;;  %v6545_v7 = vadd.f32 %v7281_v41, %v7344_v24 }
0x2056   :  { %v5417_v48 = vmul.f32 -1.442695, %v6547_v39  ;;  %v5406_v59 = vmul.f32 -1.442695, %v6545_v7 }
0x2058   :  { %6711 = vpow2.f32 %v5417_v48 }
0x2062   :  { %v6712_v44 = vpop.eup %6711 }
0x2063   :  { %v2912_v46 = vadd.f32 1.0, %v6712_v44 }
0x2065   :  { %6713 = vrcp.f32 %v2912_v46 }
0x2066   :  { %6715 = vpow2.f32 %v5406_v59 }
0x206f   :  { %v6714_v54 = vpop.eup %6713 }
0x2070   :  { %v2915_v55 = vmul.f32 2.0, %v6714_v54  ;;  %v6716_v61 = vpop.eup %6715 }
0x2071   :  { %v2471_v42 = vadd.f32 1.0, %v6716_v61 }
0x2072   :  { %v5418_v56 = vadd.f32 -1.0, %v2915_v55 }
0x2073   :  { %6717 = vrcp.f32 %v2471_v42 }
0x2074   :  { %v2917_v22 = vsel %vm7144_vm9, %v5418_v56, %v6714_v54 }
0x2075   :  { %2920 = vrot.lane.b32.xlu0 %v2917_v22, %s6873_s0  ;;  %v2918_v50 = vmul.f32 %v2917_v22, %v7304_v19 }
0x207d   :  { %v6718_v4 = vpop.eup %6717 }
0x207e   :  { %v2474_v6 = vmul.f32 2.0, %v6718_v4 }
0x2080   :  { %v5407_v51 = vadd.f32 -1.0, %v2474_v6 }
0x2082   :  { %v7411_v24 = vsel %vm7144_vm9, %v5407_v51, %v6718_v4 }
0x20e7   :  { %v2921_v57 = vpop.permute.xlu0 %2920 }
0x20e8   :  { %v2923_v14 = vmul.f32 %v2921_v57, %v2917_v22  ;;  %v2477_v57 = vmul.f32 %v7411_v24, %v7306_v9 }
0x20ea   :  { %2925 = vrot.lane.b32.xlu1 %v2923_v14, %s6874_s12 }
0x215c   :  { %v2926_v62 = vpop.permute.xlu1 %2925 }
0x215d   :  { %v7405_v3 = vadd.f32 %v2926_v62, %v2918_v50 }
0x215f   :  { %6719 = vtanh.f32 %v7405_v3 }
0x2169   :  { %v6720_v8 = vpop.eup %6719 }
0x216a   :  { %2931 = vrot.lane.b32.xlu0 %v6720_v8, %s6872_s27 }
0x216e   :  { %2479 = vrot.lane.b32.xlu0 %v7411_v24, %s6873_s0 }
0x21dc   :  { %v2932_v40 = vpop.permute.xlu0 %2931 }
0x21dd   :  { %v2934_v19 = vmul.f32 %v2932_v40, %v2917_v22 }
0x21df   :  { %2936 = vrot.lane.b32.xlu1 %v2934_v19, %s6875_s13 }
0x21e0   :  { %v2480_v39 = vpop.permute.xlu0 %2479 }
0x21e1   :  { %v2482_v44 = vmul.f32 %v2480_v39, %v7411_v24 }
0x2251   :  { %v7416_v49 = vpop.permute.xlu1 %2936 }
0x2252   :  { %6048 = vmatmul.mubr.msk.f32.vlgmr.msra.gmra.mrb[26].mxu0 %vm1084_vm10, %v7416_v49 }
0x2253   :  { %6437 = vmatpush3.bf16.msra.mxu0 %v6907_v5  ;;  %6065 = vmatprep.mubr.msk.f32.mxu0 %vm6869_vm0, %v6870_v1 }
0x2254   :  { %6438 = vmatprep.subr.bf16.mxu0 %v6868_v0 }
0x2257   :  { %6440 = vmatpush3.bf16.msra.mxu0 %v6918_v10 }
0x2258   :  { %6447 = vmatprep.subr.bf16.mxu0 %v6868_v0 }
0x225a   :  { %6066 = vmatmul.mubr.msk.f32.vlgmr.msra.gmra.mrb[28].mxu0 %vm212_vm6, %v7360_v12  ;;  %v204_v12 = vadd.f32 %v7346_v36, %v6997_v53 }
0x225b   :  { %6449 = vmatpush3.bf16.msra.mxu0 %v7021_v17  ;;  %6087 = vmatprep.mubr.msk.f32.mxu0 %vm6869_vm0, %v6870_v1 }
0x225c   :  { %6450 = vmatprep.subr.bf16.mxu0 %v6868_v0 }
0x225f   :  { %6452 = vmatpush3.bf16.msra.mxu0 %v7025_v21 }
0x2260   :  { %6462 = vmatprep.subr.bf16.mxu0 %v6868_v0 }
0x2262   :  { %6088 = vmatmul.mubr.msk.f32.vlgmr.msra.gmra.mrb[24].mxu0 %vm212_vm6, %v2765_v35 }
0x2263   :  { %6464 = vmatpush3.bf16.msra.mxu0 %v7171_v60  ;;  %6112 = vmatprep.mubr.msk.f32.mxu0 %vm6869_vm0, %v6870_v1 }
0x2264   :  { %6465 = vmatprep.subr.bf16.mxu0 %v6868_v0 }
0x232d   :  { %v3178_v15 = vpop.f32.mrb[28].mxu0 }
0x232e   :  { %v3182_v18 = vadd.f32 %v3178_v15, %v204_v12  ;;  %v6067_v20 = vpop.f32.mrb[29].mxu0 }
0x2330   :  { %v5424_v58 = vmul.f32 -1.442695, %v3182_v18 }
0x2332   :  { %6721 = vpow2.f32 %v5424_v58 }
0x2335   :  { %v3350_v26 = vpop.f32.mrb[24].mxu0 }
0x2336   :  { %v6549_v27 = vadd.f32 %v7441_v37, %v3350_v26  ;;  %v6089_v29 = vpop.f32.mrb[25].mxu0 }
0x2338   :  { %v5428_v23 = vmul.f32 -1.442695, %v6549_v27 }
0x233a   :  { %6723 = vpow2.f32 %v5428_v23 }
0x233c   :  { %v6722_v30 = vpop.eup %6721 }
0x233d   :  { %v3186_v32 = vadd.f32 1.0, %v6722_v30 }
0x233f   :  { %6725 = vrcp.f32 %v3186_v32 }
0x2344   :  { %v6724_v33 = vpop.eup %6723 }
0x2345   :  { %v3358_v34 = vadd.f32 1.0, %v6724_v33 }
0x2347   :  { %6727 = vrcp.f32 %v3358_v34 }
0x2349   :  { %v6726_v53 = vpop.eup %6725 }
0x234a   :  { %v3189_v35 = vmul.f32 2.0, %v6726_v53 }
0x234c   :  { %v5425_v11 = vadd.f32 -1.0, %v3189_v35 }
0x234e   :  { %v3191_v13 = vsel %vm6940_vm5, %v5425_v11, %v6726_v53  ;;  %v7517_v53 = vld [vmem:[#allocation2 + $0xa8] ss:$0 sm:$0xff] }
0x234f   :  { %3194 = vrot.lane.b32.xlu1 %v3191_v13, %s6871_s26  ;;  %v3192_v50 = vmul.f32 %v3191_v13, %v7355_v2 }
0x2351   :  { %v6728_v48 = vpop.eup %6727 }
0x2352   :  { %v3361_v46 = vmul.f32 2.0, %v6728_v48 }
0x2353   :  { %2484 = vrot.lane.b32.xlu1 %v2482_v44, %s6874_s12 }
0x2354   :  { %v5429_v54 = vadd.f32 -1.0, %v3361_v46 }
0x2356   :  { %v3363_v55 = vsel %vm6940_vm5, %v5429_v54, %v6728_v48 }
0x2357   :  { %3366 = vrot.lane.b32.xlu0 %v3363_v55, %s6871_s26  ;;  %v3364_v9 = vmul.f32 %v3363_v55, %v7381_v31 }
0x23c1   :  { %v3195_v56 = vpop.permute.xlu1 %3194 }
0x23c2   :  { %v3197_v22 = vmul.f32 %v3195_v56, %v3191_v13 }
0x23c4   :  { %3199 = vrot.lane.b32.xlu0 %v3197_v22, %s6872_s27 }
0x23c5   :  { %v2485_v14 = vpop.permute.xlu1 %2484 }
0x23c6   :  { %v7455_v7 = vadd.f32 %v2485_v14, %v2477_v57 }
0x23c8   :  { %6729 = vtanh.f32 %v7455_v7 }
0x23c9   :  { %v3367_v59 = vpop.permute.xlu0 %3366 }
0x23ca   :  { %v3369_v61 = vmul.f32 %v3367_v59, %v3363_v55 }
0x23cc   :  { %3371 = vrot.lane.b32.xlu1 %v3369_v61, %s6872_s27 }
0x23d2   :  { %v6730_v42 = vpop.eup %6729 }
0x23d3   :  { %2490 = vrot.lane.b32.xlu0 %v6730_v42, %s6872_s27 }
0x2436   :  { %v3200_v62 = vpop.permute.xlu0 %3199 }
0x2437   :  { %v7461_v4 = vadd.f32 %v3200_v62, %v3192_v50 }
0x2439   :  { %6731 = vtanh.f32 %v7461_v4 }
0x243e   :  { %v3372_v6 = vpop.permute.xlu1 %3371 }
0x243f   :  { %v7465_v8 = vadd.f32 %v3372_v6, %v3364_v9 }
0x2441   :  { %6733 = vtanh.f32 %v7465_v8 }
0x2443   :  { %v6732_v51 = vpop.eup %6731 }
0x2444   :  { %3205 = vrot.lane.b32.xlu1 %v6732_v51, %s6871_s26 }
0x2445   :  { %v2491_v40 = vpop.permute.xlu0 %2490 }
0x2446   :  { %v2493_v19 = vmul.f32 %v2491_v40, %v7411_v24 }
0x2448   :  { %3011 = vrot.lane.b32.xlu1 %v2493_v19, %s6875_s13 }
0x244b   :  { %v6734_v2 = vpop.eup %6733 }
0x244c   :  { %3377 = vrot.lane.b32.xlu0 %v6734_v2, %s6871_s26 }
0x24b6   :  { %v3206_v12 = vpop.permute.xlu1 %3205 }
0x24b7   :  { %v3208_v15 = vmul.f32 %v3206_v12, %v3191_v13  ;;  %v209_v13 = vadd.f32 %v7346_v36, %v6995_v52 }
0x24b9   :  { %3210 = vrot.lane.b32.xlu0 %v3208_v15, %s6872_s27 }
0x24ba   :  { %v3012_v31 = vpop.permute.xlu1 %3011 }
0x24bb   :  { %6055 = vmatmul.mubr.msk.f32.vlgmr.msra.gmra.mrb[16].mxu1 %vm1084_vm10, %v3012_v31 }
0x24bc   :  { %6443 = vmatpush3.bf16.msra.mxu1 %v6962_v38  ;;  %6076 = vmatprep.mubr.msk.f32.mxu1 %vm6869_vm0, %v6870_v1 }
0x24bd   :  { %6444 = vmatprep.subr.bf16.mxu1 %v6868_v0 }
0x24be   :  { %v3378_v24 = vpop.permute.xlu0 %3377 }
0x24bf   :  { %v3380_v18 = vmul.f32 %v3378_v24, %v3363_v55 }
0x24c0   :  { %6446 = vmatpush3.bf16.msra.mxu1 %v6972_v43 }
0x24c1   :  { %3382 = vrot.lane.b32.xlu1 %v3380_v18, %s6872_s27  ;;  %6453 = vmatprep.subr.bf16.mxu1 %v6868_v0 }
0x252b   :  { %v3211_v20 = vpop.permute.xlu0 %3210 }
0x252c   :  { %6077 = vmatmul.mubr.msk.f32.vlgmr.msra.gmra.mrb[22].mxu1 %vm212_vm6, %v3211_v20 }
0x252d   :  { %6455 = vmatpush3.bf16.msra.mxu1 %v7049_v45  ;;  %6098 = vmatprep.mubr.msk.f32.mxu1 %vm6869_vm0, %v6870_v1 }
0x252e   :  { %6456 = vmatprep.subr.bf16.mxu1 %v6868_v0 }
0x2531   :  { %6458 = vmatpush3.bf16.msra.mxu1 %v7052_v47 }
0x2532   :  { %6459 = vmatprep.subr.bf16.mxu1 %v6868_v0 }
0x2533   :  { %v3383_v58 = vpop.permute.xlu1 %3382 }
0x2534   :  { %6099 = vmatmul.mubr.msk.f32.vlgmr.msra.gmra.mrb[24].mxu1 %vm212_vm6, %v3383_v58 }
0x2535   :  { %6461 = vmatpush3.bf16.msra.mxu1 %v7125_v63  ;;  %6105 = vmatprep.mubr.msk.f32.mxu1 %vm6869_vm0, %v6870_v1 }
0x2536   :  { %6468 = vmatprep.subr.bf16.mxu1 %v6868_v0 }
0x2538   :  { %6106 = vmatmul.mubr.msk.f32.vlgmr.msra.gmra.mrb[20].mxu1 %vm1084_vm10, %v7416_v49 }
0x2539   :  { %6470 = vmatpush3.bf16.msra.mxu1 %v6907_v5  ;;  %6130 = vmatprep.mubr.msk.f32.mxu1 %vm6869_vm0, %v6870_v1 }
0x253a   :  { %6471 = vmatprep.subr.bf16.mxu1 %v6868_v0 }
0x253d   :  { %6473 = vmatpush3.bf16.msra.mxu1 %v6918_v10 }
0x253e   :  { %6480 = vmatprep.subr.bf16.mxu1 %v6868_v0 }
0x2540   :  { %6131 = vmatmul.mubr.msk.f32.vlgmr.msra.gmra.mrb[26].mxu1 %vm212_vm6, %v3211_v20 }
0x2541   :  { %6482 = vmatpush3.bf16.msra.mxu1 %v7021_v17  ;;  %6152 = vmatprep.mubr.msk.f32.mxu1 %vm6869_vm0, %v6870_v1 }
0x2542   :  { %6483 = vmatprep.subr.bf16.mxu1 %v6868_v0 }
0x2545   :  { %6485 = vmatpush3.bf16.msra.mxu1 %v7025_v21 }
0x2546   :  { %6492 = vmatprep.subr.bf16.mxu1 %v6868_v0 }
0x2548   :  { %6153 = vmatmul.mubr.msk.f32.vlgmr.msra.gmra.mrb[22].mxu1 %vm212_vm6, %v3383_v58 }
0x2549   :  { %6494 = vmatpush3.bf16.msra.mxu1 %v7125_v63  ;;  %6170 = vmatprep.mubr.msk.f32.mxu1 %vm6869_vm0, %v6870_v1 }
0x254a   :  { %6507 = vmatprep.subr.bf16.mxu1 %v6868_v0 }
0x258e   :  { %v3081_v5 = vpop.f32.mrb[16].mxu1 }
0x258f   :  { %v6548_v10 = vadd.f32 %v7281_v41, %v3081_v5  ;;  %v6056_v49 = vpop.f32.mrb[17].mxu1 }
0x2591   :  { %v5421_v26 = vmul.f32 -1.442695, %v6548_v10 }
0x2593   :  { %6735 = vpow2.f32 %v5421_v26 }
0x259d   :  { %v6736_v27 = vpop.eup %6735 }
0x259e   :  { %v3089_v29 = vadd.f32 1.0, %v6736_v27 }
0x25a0   :  { %6737 = vrcp.f32 %v3089_v29 }
0x25aa   :  { %v6738_v23 = vpop.eup %6737 }
0x25ab   :  { %v3092_v30 = vmul.f32 2.0, %v6738_v23 }
0x25ad   :  { %v5422_v32 = vadd.f32 -1.0, %v3092_v30 }
0x25af   :  { %v3094_v33 = vsel %vm7144_vm9, %v5422_v32, %v6738_v23 }
0x25b0   :  { %3097 = vrot.lane.b32.xlu1 %v3094_v33, %s6873_s0  ;;  %v3095_v52 = vmul.f32 %v3094_v33, %v7455_v7 }
0x260b   :  { %v3522_v34 = vpop.f32.mrb[20].mxu1 }
0x260c   :  { %v6550_v35 = vadd.f32 %v7517_v53, %v3522_v34  ;;  %v6107_v11 = vpop.f32.mrb[21].mxu1 }
0x260e   :  { %v5432_v39 = vmul.f32 -1.442695, %v6550_v35 }
0x2610   :  { %6739 = vpow2.f32 %v5432_v39 }
0x2613   :  { %v3796_v48 = vpop.f32.mrb[26].mxu1 }
0x2614   :  { %v3800_v44 = vadd.f32 %v3796_v48, %v209_v13  ;;  %v6132_v46 = vpop.f32.mrb[27].mxu1 }
0x261a   :  { %v6740_v54 = vpop.eup %6739 }
0x261b   :  { %v3530_v55 = vadd.f32 1.0, %v6740_v54  ;;  %v3968_v56 = vpop.f32.mrb[22].mxu1 }
0x261c   :  { %v6154_v22 = vpop.f32.mrb[23].mxu1  ;;  %v6552_v40 = vadd.f32 %v7441_v37, %v3968_v56 }
0x261d   :  { %6741 = vrcp.f32 %v3530_v55 }
0x261e   :  { %v5443_v19 = vmul.f32 -1.442695, %v6552_v40 }
0x2622   :  { %v3098_v57 = vpop.permute.xlu1 %3097 }
0x2623   :  { %v3100_v14 = vmul.f32 %v3098_v57, %v3094_v33 }
0x2625   :  { %3102 = vrot.lane.b32.xlu1 %v3100_v14, %s6874_s12 }
0x2627   :  { %v6742_v59 = vpop.eup %6741 }
0x2628   :  { %v3533_v61 = vmul.f32 2.0, %v6742_v59 }
0x262a   :  { %v5433_v42 = vadd.f32 -1.0, %v3533_v61 }
0x262c   :  { %v3535_v50 = vsel %vm7144_vm9, %v5433_v42, %v6742_v59 }
0x262d   :  { %3538 = vrot.lane.b32.xlu0 %v3535_v50, %s6873_s0  ;;  %v3536_v15 = vmul.f32 %v3535_v50, %v7405_v3  ;;  %v5439_v3 = vmul.f32 -1.442695, %v3800_v44 }
0x2697   :  { %v3103_v36 = vpop.permute.xlu1 %3102 }
0x2698   :  { %v7527_v62 = vadd.f32 %v3103_v36, %v3095_v52 }
0x269a   :  { %6743 = vtanh.f32 %v7527_v62 }
0x269b   :  { %6745 = vpow2.f32 %v5443_v19 }
0x269f   :  { %v3539_v9 = vpop.permute.xlu0 %3538 }
0x26a0   :  { %v3541_v6 = vmul.f32 %v3539_v9, %v3535_v50 }
0x26a2   :  { %3543 = vrot.lane.b32.xlu0 %v3541_v6, %s6874_s12 }
0x26a4   :  { %v6744_v51 = vpop.eup %6743 }
0x26a5   :  { %3108 = vrot.lane.b32.xlu1 %v6744_v51, %s6872_s27  ;;  %v6746_v2 = vpop.eup %6745 }
0x26a6   :  { %v3976_v12 = vadd.f32 1.0, %v6746_v2 }
0x26a8   :  { %6747 = vrcp.f32 %v3976_v12 }
0x26b2   :  { %v6748_v7 = vpop.eup %6747 }
0x26b3   :  { %v3979_v18 = vmul.f32 2.0, %v6748_v7 }
0x26b5   :  { %v5444_v5 = vadd.f32 -1.0, %v3979_v18 }
0x26b7   :  { %v7540_v10 = vsel %vm6940_vm5, %v5444_v5, %v6748_v7 }
0x2714   :  { %v3544_v31 = vpop.permute.xlu0 %3543 }
0x2715   :  { %v7534_v24 = vadd.f32 %v3544_v31, %v3536_v15 }
0x2717   :  { %6749 = vtanh.f32 %v7534_v24  ;;  %v3109_v20 = vpop.permute.xlu1 %3108 }
0x2718   :  { %v3111_v58 = vmul.f32 %v3109_v20, %v3094_v33  ;;  %6751 = vpow2.f32 %v5439_v3  ;;  %v3982_v20 = vmul.f32 %v7540_v10, %v7465_v8 }
0x271a   :  { %3629 = vrot.lane.b32.xlu1 %v3111_v58, %s6875_s13 }
0x271e   :  { %3984 = vrot.lane.b32.xlu1 %v7540_v10, %s6871_s26 }
0x2721   :  { %v6750_v49 = vpop.eup %6749 }
0x2722   :  { %3549 = vrot.lane.b32.xlu0 %v6750_v49, %s6872_s27  ;;  %v6752_v26 = vpop.eup %6751 }
0x2723   :  { %v3804_v27 = vadd.f32 1.0, %v6752_v26 }
0x2725   :  { %6753 = vrcp.f32 %v3804_v27 }
0x272f   :  { %v6754_v29 = vpop.eup %6753 }
0x2730   :  { %v3807_v23 = vmul.f32 2.0, %v6754_v29 }
0x2732   :  { %v5440_v33 = vadd.f32 -1.0, %v3807_v23 }
0x2734   :  { %v7548_v34 = vsel %vm6940_vm5, %v5440_v33, %v6754_v29 }
0x2735   :  { %v3810_v12 = vmul.f32 %v7548_v34, %v7461_v4 }
0x278c   :  { %v3630_v11 = vpop.permute.xlu1 %3629 }
0x2790   :  { %v3985_v6 = vpop.permute.xlu1 %3984 }
0x2791   :  { %v3987_v40 = vmul.f32 %v3985_v6, %v7540_v10 }
0x2794   :  { %v3550_v30 = vpop.permute.xlu0 %3549 }
0x2795   :  { %v3552_v32 = vmul.f32 %v3550_v30, %v3535_v50 }
0x2797   :  { %3554 = vrot.lane.b32.xlu0 %v3552_v32, %s6875_s13 }
0x279b   :  { %3812 = vrot.lane.b32.xlu0 %v7548_v34, %s6871_s26 }
0x2809   :  { %v3555_v35 = vpop.permute.xlu0 %3554 }
0x280a   :  { %6113 = vmatmul.mubr.msk.f32.vlgmr.msra.gmra.mrb[30].mxu0 %vm1084_vm10, %v3555_v35  ;;  %6171 = vmatmul.mubr.msk.f32.vlgmr.msra.gmra.mrb[24].mxu1 %vm1084_vm10, %v3555_v35 }
0x280b   :  { %6467 = vmatpush3.bf16.msra.mxu0 %v7204_v16  ;;  %6119 = vmatprep.mubr.msk.f32.mxu0 %vm6869_vm0, %v6870_v1 }
0x280c   :  { %6474 = vmatprep.subr.bf16.mxu0 %v6868_v0  ;;  %6509 = vmatpush3.bf16.msra.mxu1 %v7049_v45 }
0x280d   :  { %6510 = vmatprep.subr.bf16.mxu1 %v6868_v0  ;;  %6206 = vmatprep.mubr.msk.f32.mxu1 %vm6869_vm0, %v6870_v1  ;;  %v3813_v50 = vpop.permute.xlu0 %3812 }
0x280e   :  { %6120 = vmatmul.mubr.msk.f32.vlgmr.msra.gmra.mrb[26].mxu0 %vm1084_vm10, %v3630_v11  ;;  %v3815_v9 = vmul.f32 %v3813_v50, %v7548_v34 }
0x280f   :  { %6476 = vmatpush3.bf16.msra.mxu0 %v6962_v38  ;;  %6141 = vmatprep.mubr.msk.f32.mxu0 %vm6869_vm0, %v6870_v1 }
0x2810   :  { %6477 = vmatprep.subr.bf16.mxu0 %v6868_v0  ;;  %6512 = vmatpush3.bf16.msra.mxu1 %v7052_v47 }
0x2811   :  { %6516 = vmatprep.subr.bf16.mxu1 %v6868_v0 }
0x2813   :  { %6479 = vmatpush3.bf16.msra.mxu0 %v6972_v43 }
0x2814   :  { %6486 = vmatprep.subr.bf16.mxu0 %v6868_v0 }
0x28dd   :  { %v4140_v39 = vpop.f32.mrb[24].mxu1 }
0x28de   :  { %v6553_v13 = vadd.f32 %v7517_v53, %v4140_v39  ;;  %v6172_v48 = vpop.f32.mrb[25].mxu1 }
0x28e0   :  { %v5447_v44 = vmul.f32 -1.442695, %v6553_v13 }
0x28e1   :  { %v3699_v46 = vpop.f32.mrb[26].mxu0 }
0x28e2   :  { %6755 = vpow2.f32 %v5447_v44  ;;  %v6551_v38 = vadd.f32 %v7281_v41, %v3699_v46  ;;  %v6121_v54 = vpop.f32.mrb[27].mxu0 }
0x28e4   :  { %v5436_v55 = vmul.f32 -1.442695, %v6551_v38 }
0x28e6   :  { %6757 = vpow2.f32 %v5436_v55 }
0x28ec   :  { %v6756_v56 = vpop.eup %6755 }
0x28ed   :  { %v4148_v22 = vadd.f32 1.0, %v6756_v56 }
0x28ef   :  { %6759 = vrcp.f32 %v4148_v22 }
0x28f0   :  { %v6758_v57 = vpop.eup %6757 }
0x28f1   :  { %v3707_v14 = vadd.f32 1.0, %v6758_v57 }
0x28f3   :  { %6761 = vrcp.f32 %v3707_v14 }
0x28f9   :  { %v6760_v43 = vpop.eup %6759 }
0x28fa   :  { %v4151_v59 = vmul.f32 2.0, %v6760_v43 }
0x28fc   :  { %v5448_v61 = vadd.f32 -1.0, %v4151_v59 }
0x28fd   :  { %v6762_v42 = vpop.eup %6761 }
0x28fe   :  { %v4153_v52 = vsel %vm7144_vm9, %v5448_v61, %v6760_v43  ;;  %v3710_v36 = vmul.f32 2.0, %v6762_v42 }
0x28ff   :  { %4156 = vrot.lane.b32.xlu0 %v4153_v52, %s6873_s0  ;;  %v4154_v4 = vmul.f32 %v4153_v52, %v7534_v24 }
0x2900   :  { %v5437_v41 = vadd.f32 -1.0, %v3710_v36 }
0x2902   :  { %v3712_v51 = vsel %vm7144_vm9, %v5437_v41, %v6762_v42 }
0x2903   :  { %3715 = vrot.lane.b32.xlu1 %v3712_v51, %s6873_s0  ;;  %3817 = vrot.lane.b32.xlu0 %v3815_v9, %s6872_s27  ;;  %v3713_v8 = vmul.f32 %v3712_v51, %v7527_v62 }
0x2907   :  { %3989 = vrot.lane.b32.xlu1 %v3987_v40, %s6872_s27 }
0x2971   :  { %v4157_v19 = vpop.permute.xlu0 %4156 }
0x2972   :  { %v4159_v2 = vmul.f32 %v4157_v19, %v4153_v52 }
0x2974   :  { %4161 = vrot.lane.b32.xlu0 %v4159_v2, %s6874_s12 }
0x2975   :  { %v3716_v7 = vpop.permute.xlu1 %3715  ;;  %v3818_v15 = vpop.permute.xlu0 %3817 }
0x2976   :  { %v3718_v31 = vmul.f32 %v3716_v7, %v3712_v51  ;;  %v3820_v18 = vadd.f32 %v3818_v15, %v3810_v12 }
0x2978   :  { %6763 = vtanh.f32 %v3820_v18  ;;  %3720 = vrot.lane.b32.xlu1 %v3718_v31, %s6874_s12 }
0x2979   :  { %v3990_v58 = vpop.permute.xlu1 %3989 }
0x297a   :  { %v7589_v5 = vadd.f32 %v3990_v58, %v3982_v20 }
0x297c   :  { %6765 = vtanh.f32 %v7589_v5 }
0x2982   :  { %v6764_v49 = vpop.eup %6763 }
0x2983   :  { %3823 = vrot.lane.b32.xlu0 %v6764_v49, %s6871_s26 }
0x2986   :  { %v6766_v3 = vpop.eup %6765 }
0x2987   :  { %3995 = vrot.lane.b32.xlu1 %v6766_v3, %s6871_s26 }
0x29e6   :  { %v4162_v26 = vpop.permute.xlu0 %4161 }
0x29e7   :  { %v7595_v27 = vadd.f32 %v4162_v26, %v4154_v4 }
0x29e9   :  { %6767 = vtanh.f32 %v7595_v27 }
0x29ea   :  { %v3721_v29 = vpop.permute.xlu1 %3720 }
0x29eb   :  { %v7599_v23 = vadd.f32 %v3721_v29, %v3713_v8 }
0x29ed   :  { %6769 = vtanh.f32 %v7599_v23 }
0x29f3   :  { %v6768_v30 = vpop.eup %6767 }
0x29f4   :  { %4167 = vrot.lane.b32.xlu0 %v6768_v30, %s6872_s27 }
0x29f5   :  { %v3824_v32 = vpop.permute.xlu0 %3823 }
0x29f6   :  { %v3826_v33 = vmul.f32 %v3824_v32, %v7548_v34 }
0x29f7   :  { %v6770_v35 = vpop.eup %6769 }
0x29f8   :  { %3726 = vrot.lane.b32.xlu1 %v6770_v35, %s6872_s27  ;;  %3828 = vrot.lane.b32.xlu0 %v3826_v33, %s6872_s27 }
0x29f9   :  { %v3996_v24 = vpop.permute.xlu1 %3995 }
0x29fa   :  { %v3998_v11 = vmul.f32 %v3996_v24, %v7540_v10 }
0x29fc   :  { %4000 = vrot.lane.b32.xlu1 %v3998_v11, %s6872_s27 }
0x2a66   :  { %v4168_v62 = vpop.permute.xlu0 %4167 }
0x2a67   :  { %v4170_v39 = vmul.f32 %v4168_v62, %v4153_v52 }
0x2a69   :  { %4172 = vrot.lane.b32.xlu0 %v4170_v39, %s6875_s13 }
0x2a6a   :  { %v3727_v13 = vpop.permute.xlu1 %3726  ;;  %v3829_v48 = vpop.permute.xlu0 %3828 }
0x2a6b   :  { %v3729_v44 = vmul.f32 %v3727_v13, %v3712_v51  ;;  %6142 = vmatmul.mubr.msk.f32.vlgmr.msra.gmra.mrb[32].mxu0 %vm212_vm6, %v3829_v48 }
0x2a6c   :  { %6488 = vmatpush3.bf16.msra.mxu0 %v7049_v45  ;;  %6163 = vmatprep.mubr.msk.f32.mxu0 %vm6869_vm0, %v6870_v1 }
0x2a6d   :  { %4247 = vrot.lane.b32.xlu1 %v3729_v44, %s6875_s13  ;;  %6489 = vmatprep.subr.bf16.mxu0 %v6868_v0 }
0x2a6e   :  { %v4001_v10 = vpop.permute.xlu1 %4000 }
0x2a70   :  { %6491 = vmatpush3.bf16.msra.mxu0 %v7052_v47 }
0x2a71   :  { %6495 = vmatprep.subr.bf16.mxu0 %v6868_v0 }
0x2a73   :  { %6164 = vmatmul.mubr.msk.f32.vlgmr.msra.gmra.mrb[34].mxu0 %vm212_vm6, %v4001_v10 }
0x2a74   :  { %6497 = vmatpush3.bf16.msra.mxu0 %v7171_v60  ;;  %6177 = vmatprep.mubr.msk.f32.mxu0 %vm6869_vm0, %v6870_v1 }
0x2a75   :  { %6498 = vmatprep.subr.bf16.mxu0 %v6868_v0 }
0x2adb   :  { %v4173_v45 = vpop.permute.xlu0 %4172 }
0x2adc   :  { %6178 = vmatmul.mubr.msk.f32.vlgmr.msra.gmra.mrb[36].mxu0 %vm1084_vm10, %v4173_v45 }
0x2add   :  { %6500 = vmatpush3.bf16.msra.mxu0 %v7204_v16  ;;  %6184 = vmatprep.mubr.msk.f32.mxu0 %vm6869_vm0, %v6870_v1 }
0x2ade   :  { %6501 = vmatprep.subr.bf16.mxu0 %v6868_v0 }
0x2adf   :  { %v4248_v47 = vpop.permute.xlu1 %4247 }
0x2ae0   :  { %6185 = vmatmul.mubr.msk.f32.vlgmr.msra.gmra.mrb[30].mxu0 %vm1084_vm10, %v4248_v47 }
0x2ae1   :  { %6503 = vmatpush3.bf16.msra.mxu0 %v7021_v17  ;;  %6195 = vmatprep.mubr.msk.f32.mxu0 %vm6869_vm0, %v6870_v1 }
0x2ae2   :  { %6504 = vmatprep.subr.bf16.mxu0 %v6868_v0 }
0x2ae5   :  { %6506 = vmatpush3.bf16.msra.mxu0 %v7025_v21  ;;  %v7644_v21 = vld [vmem:[#allocation2 + $0xd0] ss:$0 sm:$0xff] }
0x2ae6   :  { %6513 = vmatprep.subr.bf16.mxu0 %v6868_v0 }
0x2ae8   :  { %6196 = vmatmul.mubr.msk.f32.vlgmr.msra.gmra.mrb[32].mxu0 %vm212_vm6, %v4001_v10 }
0x2ae9   :  { %6515 = vmatpush3.bf16.msra.mxu0 %v7125_v63  ;;  %6213 = vmatprep.mubr.msk.f32.mxu0 %vm6869_vm0, %v6870_v1 }
0x2aea   :  { %6519 = vmatprep.subr.bf16.mxu0 %v6868_v0 }
0x2aec   :  { %6214 = vmatmul.mubr.msk.f32.vlgmr.msra.gmra.mrb[34].mxu0 %vm1084_vm10, %v4173_v45 }
0x2aed   :  { %6521 = vmatpush3.bf16.msra.mxu0 %v7204_v16  ;;  %6227 = vmatprep.mubr.msk.f32.mxu0 %vm6869_vm0, %v6870_v1 }
0x2aee   :  { %6534 = vmatprep.subr.bf16.mxu0 %v6868_v0 }
0x2bb3   :  { %v4317_v17 = vpop.f32.mrb[30].mxu0 }
0x2bb4   :  { %v6554_v34 = vadd.f32 %v7644_v21, %v4317_v17  ;;  %v6186_v46 = vpop.f32.mrb[31].mxu0 }
0x2bb6   :  { %v5451_v38 = vmul.f32 -1.442695, %v6554_v34 }
0x2bb8   :  { %6771 = vpow2.f32 %v5451_v38 }
0x2bbb   :  { %v4414_v54 = vpop.f32.mrb[32].mxu0 }
0x2bbc   :  { %v6555_v55 = vadd.f32 %v7441_v37, %v4414_v54  ;;  %v6197_v56 = vpop.f32.mrb[33].mxu0 }
0x2bbe   :  { %v5454_v22 = vmul.f32 -1.442695, %v6555_v55 }
0x2bbf   :  { %v4586_v57 = vpop.f32.mrb[34].mxu0 }
0x2bc0   :  { %6773 = vpow2.f32 %v5454_v22  ;;  %v6556_v14 = vadd.f32 %v7517_v53, %v4586_v57  ;;  %v6215_v43 = vpop.f32.mrb[35].mxu0 }
0x2bc2   :  { %v5458_v59 = vmul.f32 -1.442695, %v6556_v14  ;;  %v6772_v61 = vpop.eup %6771 }
0x2bc3   :  { %v4325_v42 = vadd.f32 1.0, %v6772_v61 }
0x2bc4   :  { %6775 = vpow2.f32 %v5458_v59 }
0x2bc5   :  { %6777 = vrcp.f32 %v4325_v42 }
0x2bca   :  { %v6774_v50 = vpop.eup %6773 }
0x2bcb   :  { %v4422_v52 = vadd.f32 1.0, %v6774_v50 }
0x2bcd   :  { %6779 = vrcp.f32 %v4422_v52 }
0x2bce   :  { %v6776_v36 = vpop.eup %6775 }
0x2bcf   :  { %v4594_v41 = vadd.f32 1.0, %v6776_v36  ;;  %v6778_v9 = vpop.eup %6777 }
0x2bd0   :  { %v4328_v51 = vmul.f32 2.0, %v6778_v9 }
0x2bd1   :  { %6781 = vrcp.f32 %v4594_v41 }
0x2bd2   :  { %v5452_v12 = vadd.f32 -1.0, %v4328_v51 }
0x2bd4   :  { %v4330_v31 = vsel %vm7144_vm9, %v5452_v12, %v6778_v9 }
0x2bd5   :  { %v4331_v32 = vmul.f32 %v4330_v31, %v7599_v23 }
0x2bd7   :  { %v6780_v37 = vpop.eup %6779 }
0x2bd8   :  { %v4425_v6 = vmul.f32 2.0, %v6780_v37 }
0x2bda   :  { %v5455_v40 = vadd.f32 -1.0, %v4425_v6 }
0x2bdb   :  { %v6782_v19 = vpop.eup %6781 }
0x2bdc   :  { %v4427_v2 = vsel %vm6940_vm5, %v5455_v40, %v6780_v37  ;;  %v4597_v7 = vmul.f32 2.0, %v6782_v19 }
0x2bdd   :  { %4430 = vrot.lane.b32.xlu0 %v4427_v2, %s6871_s26  ;;  %v4428_v26 = vmul.f32 %v4427_v2, %v7589_v5 }
0x2bde   :  { %v5459_v15 = vadd.f32 -1.0, %v4597_v7 }
0x2be0   :  { %v4599_v18 = vsel %vm7144_vm9, %v5459_v15, %v6782_v19 }
0x2be1   :  { %4333 = vrot.lane.b32.xlu0 %v4330_v31, %s6873_s0  ;;  %4602 = vrot.lane.b32.xlu1 %v4599_v18, %s6873_s0  ;;  %v4600_v30 = vmul.f32 %v4599_v18, %v7595_v27 }
0x2c4f   :  { %v4431_v20 = vpop.permute.xlu0 %4430 }
0x2c50   :  { %v4433_v58 = vmul.f32 %v4431_v20, %v4427_v2 }
0x2c52   :  { %4435 = vrot.lane.b32.xlu1 %v4433_v58, %s6872_s27 }
0x2c53   :  { %v4334_v25 = vpop.permute.xlu0 %4333  ;;  %v4603_v49 = vpop.permute.xlu1 %4602 }
0x2c54   :  { %v4336_v3 = vmul.f32 %v4334_v25, %v4330_v31  ;;  %v4605_v4 = vmul.f32 %v4603_v49, %v4599_v18 }
0x2c56   :  { %4338 = vrot.lane.b32.xlu1 %v4336_v3, %s6874_s12  ;;  %4607 = vrot.lane.b32.xlu0 %v4605_v4, %s6874_s12 }
0x2cc4   :  { %v4436_v8 = vpop.permute.xlu1 %4435 }
0x2cc5   :  { %v4438_v29 = vadd.f32 %v4436_v8, %v4428_v26 }
0x2cc7   :  { %6783 = vtanh.f32 %v4438_v29 }
0x2cc8   :  { %v4608_v33 = vpop.permute.xlu0 %4607  ;;  %v4339_v35 = vpop.permute.xlu1 %4338 }
0x2cc9   :  { %v7664_v24 = vadd.f32 %v4608_v33, %v4600_v30  ;;  %v7666_v11 = vadd.f32 %v4339_v35, %v4331_v32 }
0x2ccb   :  { %6785 = vtanh.f32 %v7664_v24 }
0x2ccc   :  { %6787 = vtanh.f32 %v7666_v11 }
0x2cd1   :  { %v6784_v62 = vpop.eup %6783 }
0x2cd2   :  { %4441 = vrot.lane.b32.xlu0 %v6784_v62, %s6871_s26 }
0x2cd5   :  { %v6786_v5 = vpop.eup %6785 }
0x2cd6   :  { %v6788_v39 = vpop.eup %6787  ;;  %4613 = vrot.lane.b32.xlu1 %v6786_v5, %s6872_s27 }
0x2cd7   :  { %4344 = vrot.lane.b32.xlu0 %v6788_v39, %s6872_s27 }
0x2d44   :  { %v4442_v27 = vpop.permute.xlu0 %4441 }
0x2d45   :  { %v4444_v23 = vmul.f32 %v4442_v27, %v4427_v2 }
0x2d47   :  { %4446 = vrot.lane.b32.xlu1 %v4444_v23, %s6872_s27 }
0x2d48   :  { %v4614_v13 = vpop.permute.xlu1 %4613 }
0x2d49   :  { %v4345_v48 = vpop.permute.xlu0 %4344  ;;  %v4616_v44 = vmul.f32 %v4614_v13, %v4599_v18 }
0x2d4a   :  { %v4347_v10 = vmul.f32 %v4345_v48, %v4330_v31 }
0x2d4b   :  { %4618 = vrot.lane.b32.xlu0 %v4616_v44, %s6875_s13 }
0x2d4c   :  { %4693 = vrot.lane.b32.xlu1 %v4347_v10, %s6875_s13 }
0x2db9   :  { %v4447_v45 = vpop.permute.xlu1 %4446 }
0x2dba   :  { %6207 = vmatmul.mubr.msk.f32.vlgmr.msra.gmra.mrb[28].mxu1 %vm212_vm6, %v4447_v45 }
0x2dbb   :  { %6518 = vmatpush3.bf16.msra.mxu1 %v7171_v60  ;;  %6220 = vmatprep.mubr.msk.f32.mxu1 %vm6869_vm0, %v6870_v1 }
0x2dbc   :  { %6522 = vmatprep.subr.bf16.mxu1 %v6868_v0 }
0x2dbd   :  { %v4619_v47 = vpop.permute.xlu0 %4618 }
0x2dbe   :  { %v4694_v17 = vpop.permute.xlu1 %4693  ;;  %6221 = vmatmul.mubr.msk.f32.vlgmr.msra.gmra.mrb[30].mxu1 %vm1084_vm10, %v4619_v47 }
0x2dbf   :  { %6228 = vmatmul.mubr.msk.f32.vlgmr.msra.gmra.mrb[36].mxu0 %vm1084_vm10, %v4694_v17  ;;  %6524 = vmatpush3.bf16.msra.mxu1 %v7125_v63 }
0x2dc0   :  { %6234 = vmatprep.mubr.msk.f32.mxu1 %vm6869_vm0, %v6870_v1  ;;  %6525 = vmatprep.subr.bf16.mxu1 %v6868_v0 }
0x2dc1   :  { %6262 = vmatprep.mubr.msk.f32.mxu0 %vm6869_vm0, %v6870_v1 }
0x2dc2   :  { %6235 = vmatmul.mubr.msk.f32.vlgmr.msra.gmra.mrb[28].mxu1 %vm1084_vm10, %v4619_v47 }
0x2dc3   :  { %6527 = vmatpush3.bf16.msra.mxu1 %v7171_v60  ;;  %6241 = vmatprep.mubr.msk.f32.mxu1 %vm6869_vm0, %v6870_v1 }
0x2dc4   :  { %6528 = vmatprep.subr.bf16.mxu1 %v6868_v0 }
0x2e92   :  { %v4763_v34 = vpop.f32.mrb[36].mxu0 }
0x2e93   :  { %v6557_v63 = vadd.f32 %v7644_v21, %v4763_v34  ;;  %v6229_v46 = vpop.f32.mrb[37].mxu0 }
0x2e95   :  { %v5462_v38 = vmul.f32 -1.442695, %v6557_v63  ;;  %v4860_v54 = vpop.f32.mrb[28].mxu1 }
0x2e96   :  { %v6558_v55 = vadd.f32 %v7517_v53, %v4860_v54  ;;  %v6236_v56 = vpop.f32.mrb[29].mxu1 }
0x2e97   :  { %6789 = vpow2.f32 %v5462_v38 }
0x2e98   :  { %v5465_v22 = vmul.f32 -1.442695, %v6558_v55 }
0x2e9a   :  { %6791 = vpow2.f32 %v5465_v22 }
0x2ea1   :  { %v6790_v57 = vpop.eup %6789 }
0x2ea2   :  { %v4771_v14 = vadd.f32 1.0, %v6790_v57 }
0x2ea4   :  { %v6792_v60 = vpop.eup %6791  ;;  %6793 = vrcp.f32 %v4771_v14 }
0x2ea5   :  { %v4868_v43 = vadd.f32 1.0, %v6792_v60  ;;  %v53_v60 = vld [vmem:[#allocation2 + $0xd8] sm:$0xff] }
0x2ea7   :  { %6795 = vrcp.f32 %v4868_v43  ;;  %v54_v43 = vld [vmem:[#allocation2 + $0xe0] sm:$0xff] }
0x2eae   :  { %v6794_v59 = vpop.eup %6793 }
0x2eaf   :  { %v4774_v61 = vmul.f32 2.0, %v6794_v59 }
0x2eb1   :  { %v6796_v42 = vpop.eup %6795  ;;  %v5463_v50 = vadd.f32 -1.0, %v4774_v61 }
0x2eb2   :  { %v4871_v52 = vmul.f32 2.0, %v6796_v42 }
0x2eb3   :  { %v4776_v36 = vsel %vm7144_vm9, %v5463_v50, %v6794_v59  ;;  %v6535_v59 = vpack.c.bf16 %v54_v43, %v53_v60 }
0x2eb4   :  { %4779 = vrot.lane.b32.xlu1 %v4776_v36, %s6873_s0  ;;  %v5466_v53 = vadd.f32 -1.0, %v4871_v52  ;;  %v4777_v40 = vmul.f32 %v4776_v36, %v7666_v11  ;;  %v56_v52 = vld [vmem:[#allocation2 + $0xf0] sm:$0xff] }
0x2eb5   :  { %6536 = vmatpush3.bf16.msra.mxu0 %v6535_v59 }
0x2eb6   :  { %v4873_v41 = vsel %vm7144_vm9, %v5466_v53, %v6796_v42  ;;  %6265 = vmatprep.subr.mxu0 %v6870_v1 }
0x2eb7   :  { %4876 = vrot.lane.b32.xlu0 %v4873_v41, %s6873_s0  ;;  %v4874_v12 = vmul.f32 %v4873_v41, %v7664_v24 }
0x2f26   :  { %v4780_v9 = vpop.permute.xlu1 %4779 }
0x2f27   :  { %v4782_v37 = vmul.f32 %v4780_v9, %v4776_v36 }
0x2f29   :  { %4784 = vrot.lane.b32.xlu1 %v4782_v37, %s6874_s12  ;;  %v4877_v6 = vpop.permute.xlu0 %4876 }
0x2f2a   :  { %v4879_v51 = vmul.f32 %v4877_v6, %v4873_v41  ;;  %v5476_v6 = vld [vmem:[#allocation2 + $0xf8] ss:$0 sm:$0xff] }
0x2f2c   :  { %4881 = vrot.lane.b32.xlu0 %v4879_v51, %s6874_s12 }
0x2f9b   :  { %v4785_v19 = vpop.permute.xlu1 %4784 }
0x2f9c   :  { %v4787_v2 = vadd.f32 %v4785_v19, %v4777_v40 }
0x2f9e   :  { %6797 = vtanh.f32 %v4787_v2  ;;  %v4882_v7 = vpop.permute.xlu0 %4881 }
0x2f9f   :  { %v4884_v15 = vadd.f32 %v4882_v7, %v4874_v12 }
0x2fa1   :  { %6799 = vtanh.f32 %v4884_v15 }
0x2fa8   :  { %v6798_v31 = vpop.eup %6797 }
0x2fa9   :  { %4790 = vrot.lane.b32.xlu1 %v6798_v31, %s6872_s27 }
0x2fab   :  { %v6800_v18 = vpop.eup %6799 }
0x2fac   :  { %4887 = vrot.lane.b32.xlu0 %v6800_v18, %s6872_s27 }
0x301b   :  { %v4791_v20 = vpop.permute.xlu1 %4790 }
0x301c   :  { %v4793_v58 = vmul.f32 %v4791_v20, %v4776_v36  ;;  %v5474_v36 = vld [vmem:[#allocation2 + $0xe8] ss:$0 sm:$0xff] }
0x301e   :  { %4967 = vrot.lane.b32.xlu1 %v4793_v58, %s6875_s13  ;;  %v4888_v25 = vpop.permute.xlu0 %4887 }
0x301f   :  { %v4890_v49 = vmul.f32 %v4888_v25, %v4873_v41 }
0x3021   :  { %4892 = vrot.lane.b32.xlu0 %v4890_v49, %s6875_s13 }
0x3090   :  { %v4968_v4 = vpop.permute.xlu1 %4967 }
0x3093   :  { %v4893_v3 = vpop.permute.xlu0 %4892 }
0x3094   :  { %6242 = vmatmul.mubr.msk.f32.vlgmr.msra.gmra.mrb[32].mxu1 %vm1084_vm10, %v4893_v3 }
0x3095   :  { %6530 = vmatpush3.bf16.msra.mxu1 %v7204_v16  ;;  %6248 = vmatprep.mubr.msk.f32.mxu1 %vm6869_vm0, %v6870_v1 }
0x3096   :  { %6531 = vmatprep.subr.bf16.mxu1 %v6868_v0 }
0x3098   :  { %6249 = vmatmul.mubr.msk.f32.vlgmr.msra.gmra.mrb[30].mxu1 %vm1084_vm10, %v4968_v4 }
0x3099   :  { %6533 = vmatpush3.bf16.msra.mxu1 %v7204_v16  ;;  %6255 = vmatprep.mubr.msk.f32.mxu1 %vm6869_vm0, %v6870_v1 }
0x316b   :  { %v5037_v26 = vpop.f32.mrb[30].mxu1 }
0x316c   :  { %v6559_v8 = vadd.f32 %v7644_v21, %v5037_v26  ;;  %v6250_v29 = vpop.f32.mrb[31].mxu1 }
0x316e   :  { %v5469_v30 = vmul.f32 -1.442695, %v6559_v8 }
0x3170   :  { %6801 = vpow2.f32 %v5469_v30 }
0x317a   :  { %v6802_v32 = vpop.eup %6801 }
0x317b   :  { %v5045_v33 = vadd.f32 1.0, %v6802_v32 }
0x317d   :  { %6803 = vrcp.f32 %v5045_v33 }
0x3187   :  { %v6804_v35 = vpop.eup %6803 }
0x3188   :  { %v5048_v24 = vmul.f32 2.0, %v6804_v35 }
0x318a   :  { %v5470_v0 = vadd.f32 -1.0, %v5048_v24 }
0x318c   :  { %v5050_v11 = vsel %vm7144_vm9, %v5470_v0, %v6804_v35 }
0x318d   :  { %5053 = vrot.lane.b32.xlu0 %v5050_v11, %s6873_s0  ;;  %v5051_v5 = vmul.f32 %v5050_v11, %v4787_v2 }
0x31ff   :  { %v5054_v16 = vpop.permute.xlu0 %5053 }
0x3200   :  { %v5056_v62 = vmul.f32 %v5054_v16, %v5050_v11 }
0x3202   :  { %5058 = vrot.lane.b32.xlu1 %v5056_v62, %s6874_s12 }
0x3274   :  { %v5059_v39 = vpop.permute.xlu1 %5058 }
0x3275   :  { %v5061_v27 = vadd.f32 %v5059_v39, %v5051_v5 }
0x3277   :  { %6805 = vtanh.f32 %v5061_v27 }
0x3281   :  { %v6806_v23 = vpop.eup %6805 }
0x3282   :  { %5064 = vrot.lane.b32.xlu0 %v6806_v23, %s6872_s27 }
0x32f4   :  { %v5065_v13 = vpop.permute.xlu0 %5064 }
0x32f5   :  { %v5067_v48 = vmul.f32 %v5065_v13, %v5050_v11 }
0x32f7   :  { %5069 = vrot.lane.b32.xlu1 %v5067_v48, %s6875_s13 }
0x3369   :  { %v5070_v44 = vpop.permute.xlu1 %5069 }
0x336a   :  { %6256 = vmatmul.mubr.msk.f32.vlgmr.msra.gmra.mrb[32].mxu1 %vm1084_vm10, %v5070_v44 }
0x343d   :  { %v5139_v10 = vpop.f32.mrb[32].mxu1 }
0x343e   :  { %v6560_v45 = vadd.f32 %v7644_v21, %v5139_v10  ;;  %v6257_v47 = vpop.f32.mrb[33].mxu1 }
0x3440   :  { %v5472_v17 = vmul.f32 -1.442695, %v6560_v45 }
0x3442   :  { %6807 = vpow2.f32 %v5472_v17 }
0x344c   :  { %v6808_v34 = vpop.eup %6807 }
0x344d   :  { %v5147_v63 = vadd.f32 1.0, %v6808_v34 }
0x344f   :  { %6809 = vrcp.f32 %v5147_v63 }
0x3459   :  { %v6810_v46 = vpop.eup %6809 }
0x345a   :  { %v5150_v38 = vmul.f32 2.0, %v6810_v46 }
0x345c   :  { %v5473_v54 = vadd.f32 -1.0, %v5150_v38 }
0x345e   :  { %v5152_v55 = vsel %vm7144_vm9, %v5473_v54, %v6810_v46 }
0x345f   :  { %5155 = vrot.lane.b32.xlu0 %v5152_v55, %s6873_s0  ;;  %v5153_v57 = vmul.f32 %v5152_v55, %v5061_v27 }
0x34d1   :  { %v5156_v56 = vpop.permute.xlu0 %5155 }
0x34d2   :  { %v5158_v22 = vmul.f32 %v5156_v56, %v5152_v55 }
0x34d4   :  { %5160 = vrot.lane.b32.xlu1 %v5158_v22, %s6874_s12 }
0x3546   :  { %v5161_v21 = vpop.permute.xlu1 %5160 }
0x3547   :  { %v5163_v14 = vadd.f32 %v5161_v21, %v5153_v57 }
0x3549   :  { %6811 = vtanh.f32 %v5163_v14 }
0x3553   :  { %v6812_v61 = vpop.eup %6811 }
0x3554   :  { %5166 = vrot.lane.b32.xlu0 %v6812_v61, %s6872_s27 }
0x35c6   :  { %v5167_v28 = vpop.permute.xlu0 %5166 }
0x35c7   :  { %v5169_v42 = vmul.f32 %v5167_v28, %v5152_v55 }
0x35c9   :  { %5175 = vrot.lane.b32.xlu1 %v5169_v42, %s6875_s13 }
0x363b   :  { %v5176_v50 = vpop.permute.xlu1 %5175 }
0x363c   :  { %6263 = vmatmul.mubr.msk.f32.vlgmr.msra.gmra.mrb[38].mxu0 %vm1084_vm10, %v5176_v50 }
0x363d   :  { %6267 = vmatprep.mubr.msk.f32.mxu0 %vm6869_vm0, %v6870_v1  ;;  %6266 = vmatpush3.msra.mxu0 %v56_v52 }
0x370f   :  { %v5245_v53 = vpop.f32.mrb[38].mxu0 }
0x3710   :  { %v5246_v41 = vadd.f32 %v5474_v36, %v5245_v53  ;;  %v6264_v9 = vpop.f32.mrb[39].mxu0 }
0x3712   :  { %v5249_v37 = vmax.f32 %v5246_v41, 0.0 }
0x3714   :  { %6268 = vmatmul.mubr.msk.f32.vlgmr.msra.gmra.mrb[40].mxu0 %vm5254_vm11, %v5249_v37 }
0x37e7   :  { %v5324_v51 = vpop.f32.mrb[40].mxu0 }
0x37e8   :  { %v5325_v40 = vadd.f32 %v5476_v6, %v5324_v51  ;;  %v6269_v19 = vpop.f32.mrb[41].mxu0 }
0x37ea   :  { %5329 = vst.msk [vmem:[#allocation5] sm:$0x3] %vm5328_vm12, %v5325_v40 }
0x37eb   :  { %6850 = shalt.err (!%p6847_p12)
}
0x37ec   :  { %s6851_s19 = scalar_lea.hbm %s7752_s2, 32 }
0x37ed   :  { %p6852_p13 = scmp.ne.s32.totalorder %s7752_s2, %s6851_s19  ;;  %p6855_p0 = scmp.lt.u32.totalorder %s6851_s19, %s7752_s2 }
0x37ef   :  { %p6857_p1 = pnand %p6855_p0, %p6852_p13 }
0x37f1   :  { %6860 = shalt.err (!%p6857_p1)
}
0x37f2   :  { %5339 = dma.vmem_to_hbm [thread:$0]  %s5337_s15, 32, %s7752_s2, [#allocation4]  }
0x37f3   :  { %6863 = dma.done.wait [#allocation4], 32  }
0x37f4   :  { %6864 = vsyncadd [#allocation4], 4294967264 }
0x37f5   :  { %5343 = vsyncpa [#allocation3], 1 }
0x37f6   :  { %5344 = vsyncpa [#allocation4], 1 }

</bundles_post_ra>
